<compile_context>
chip_gen: v7x
topology: tpu7x:2x2x1
jax: 0.10.0
libtpu: 0.0.40
codegen_flags: <defaults>
</compile_context>

<pallas_src>
import functools

import jax
import jax.numpy as jnp
from jax.experimental import pallas as pl
from jax.experimental.pallas import tpu as pltpu


# ------------------------------ helpers -------------------------------------

def _round_up(x, m):
    return ((x + m - 1) // m) * m


def _pick_tile(dim, preferred, align):
    """Largest tile <= preferred that is the full dim or an `align`-multiple
    divisor; falls back to `preferred` (partial edge blocks are safe here
    because padding only ever lands in discarded output rows/cols)."""
    if dim <= preferred:
        return dim
    for t in range(preferred, align - 1, -align):
        if dim % t == 0:
            return t
    return preferred


@functools.lru_cache(maxsize=None)
def _vmem_limit_bytes():
    """Generation-aware scoped-VMEM budget: ~3/4 of physical, capped at
    100 MiB (=> ~96 MiB on v5e/v6e's 128 MiB, ~48 MiB on v7x's 64 MiB)."""
    cap = 64 * 1024 * 1024
    try:
        cap = int(pltpu.get_tpu_info().vmem_capacity_bytes)
    except Exception:
        pass
    return int(min(cap * 3 // 4, 100 * 1024 * 1024))


# --------------------------- tiled linear (+epilogue) ------------------------

def _make_linear_kernel(activation, has_residual):
    def kernel(*refs):
        if has_residual:
            x_ref, w_ref, b_ref, r_ref, o_ref, acc_ref = refs
        else:
            x_ref, w_ref, b_ref, o_ref, acc_ref = refs
            r_ref = None
        k = pl.program_id(2)

        @pl.when(k == 0)
        def _init():
            acc_ref[...] = jnp.zeros_like(acc_ref)

        acc_ref[...] += jnp.dot(x_ref[...], w_ref[...],
                                preferred_element_type=jnp.float32)

        @pl.when(k == pl.num_programs(2) - 1)
        def _finalize():
            y = acc_ref[...] + b_ref[...]
            if activation == "quickgelu":
                y = y * jax.nn.sigmoid(1.702 * y)
            if r_ref is not None:
                y = y + r_ref[...].astype(jnp.float32)
            o_ref[...] = y.astype(o_ref.dtype)

    return kernel


def pallas_linear(x, w, b=None, *, activation="none", residual=None,
                  out_dtype=jnp.bfloat16, tm=512, tn=512, tk=1024):
    """y = act(x @ w + b) [+ residual].  bf16 MXU inputs, f32 accumulation.

    tm=512 keeps the i-grid at 1-2 blocks for ViT-scale M so each weight tile
    is DMA'd from HBM once; full-K blocks up to K<=tk avoid any K padding for
    the patch embedding / width-sized contractions."""
    M, K = x.shape
    Kw, N = w.shape
    assert Kw == K

    tm_ = _pick_tile(M, tm, 8)
    tn_ = _pick_tile(N, tn, 128)

    # K tiling: single full-K block when it fits, else 128-aligned tiles.
    if K <= tk:
        tk_, Kp = K, K
    else:
        Kp = _round_up(K, 128)
        tk_ = None
        for t in range(tk, 127, -128):
            if Kp % t == 0:
                tk_ = t
                break
        if tk_ is None:
            tk_ = tk
            Kp = _round_up(Kp, tk_)

    # Weights are expected pre-stored in bf16 (init); cast is a no-op then.
    xc = x if x.dtype == jnp.bfloat16 else x.astype(jnp.bfloat16)
    wc = w if w.dtype == jnp.bfloat16 else w.astype(jnp.bfloat16)
    if Kp != K:  # does not trigger for any CLIP shape; kept for generality
        xc = jnp.pad(xc, ((0, 0), (0, Kp - K)))
        wc = jnp.pad(wc, ((0, Kp - K), (0, 0)))

    if b is None:
        b = jnp.zeros((N,), jnp.float32)
    b2 = b.reshape(1, N).astype(jnp.float32)

    grid = (pl.cdiv(M, tm_), pl.cdiv(N, tn_), Kp // tk_)

    in_specs = [
        pl.BlockSpec((tm_, tk_), lambda i, j, k: (i, k)),
        pl.BlockSpec((tk_, tn_), lambda i, j, k: (k, j)),
        pl.BlockSpec((1, tn_), lambda i, j, k: (0, j)),
    ]
    inputs = [xc, wc, b2]
    if residual is not None:
        in_specs.append(pl.BlockSpec((tm_, tn_), lambda i, j, k: (i, j)))
        inputs.append(residual)

    bytes_accessed = 2 * (M * K + K * N + M * N) + (
        2 * M * N if residual is not None else 0)

    return pl.pallas_call(
        _make_linear_kernel(activation, residual is not None),
        out_shape=jax.ShapeDtypeStruct((M, N), out_dtype),
        grid=grid,
        in_specs=in_specs,
        out_specs=pl.BlockSpec((tm_, tn_), lambda i, j, k: (i, j)),
        scratch_shapes=[pltpu.VMEM((tm_, tn_), jnp.float32)],
        compiler_params=pltpu.CompilerParams(
            dimension_semantics=("parallel", "parallel", "arbitrary"),
            vmem_limit_bytes=_vmem_limit_bytes()),
        cost_estimate=pl.CostEstimate(
            flops=2 * M * N * K,
            transcendentals=M * N if activation == "quickgelu" else 0,
            bytes_accessed=bytes_accessed),
    )(*inputs)


# --------------------- fused LayerNorm + linear (+QuickGELU) -----------------

def _ln_linear_kernel(x_ref, g_ref, b_ref, w_ref, bias_ref, o_ref, xn_ref, *,
                      activation):
    # LayerNorm is computed once per row block (j == 0) and cached in a bf16
    # VMEM scratch that feeds the MXU for every N tile.
    @pl.when(pl.program_id(1) == 0)
    def _compute_ln():
        x = x_ref[...].astype(jnp.float32)
        mean = jnp.mean(x, axis=-1, keepdims=True)
        var = jnp.mean(jnp.square(x - mean), axis=-1, keepdims=True)
        xn = (x - mean) * jax.lax.rsqrt(var + 1e-5)
        xn = xn * g_ref[...] + b_ref[...]
        xn_ref[...] = xn.astype(jnp.bfloat16)

    acc = jnp.dot(xn_ref[...], w_ref[...], preferred_element_type=jnp.float32)
    y = acc + bias_ref[...]
    if activation == "quickgelu":
        y = y * jax.nn.sigmoid(1.702 * y)
    o_ref[...] = y.astype(o_ref.dtype)


def pallas_ln_linear(x, gamma, beta, w, b=None, *, activation="none",
                     out_dtype=jnp.bfloat16, tm=512, tn=512):
    """y = act(LayerNorm(x) @ w + b).  Requires full-K blocks (K = model width)."""
    M, K = x.shape
    Kw, N = w.shape
    assert Kw == K

    tm_ = _pick_tile(M, tm, 8)
    tn_ = _pick_tile(N, tn, 128)

    if b is None:
        b = jnp.zeros((N,), jnp.float32)
    wc = w if w.dtype == jnp.bfloat16 else w.astype(jnp.bfloat16)

    return pl.pallas_call(
        functools.partial(_ln_linear_kernel, activation=activation),
        out_shape=jax.ShapeDtypeStruct((M, N), out_dtype),
        grid=(pl.cdiv(M, tm_), pl.cdiv(N, tn_)),
        in_specs=[
            pl.BlockSpec((tm_, K), lambda i, j: (i, 0)),
            pl.BlockSpec((1, K), lambda i, j: (0, 0)),
            pl.BlockSpec((1, K), lambda i, j: (0, 0)),
            pl.BlockSpec((K, tn_), lambda i, j: (0, j)),
            pl.BlockSpec((1, tn_), lambda i, j: (0, j)),
        ],
        out_specs=pl.BlockSpec((tm_, tn_), lambda i, j: (i, j)),
        scratch_shapes=[pltpu.VMEM((tm_, K), jnp.bfloat16)],
        compiler_params=pltpu.CompilerParams(
            # j depends on the LN scratch computed at j==0 -> "arbitrary".
            dimension_semantics=("parallel", "arbitrary"),
            vmem_limit_bytes=_vmem_limit_bytes()),
        cost_estimate=pl.CostEstimate(
            flops=2 * M * N * K + 10 * M * K,
            transcendentals=M * N if activation == "quickgelu" else M,
            bytes_accessed=2 * M * K + 2 * K * N + 2 * M * N),
    )(x,
      gamma.reshape(1, K).astype(jnp.float32),
      beta.reshape(1, K).astype(jnp.float32),
      wc,
      b.reshape(1, N).astype(jnp.float32))


# --------------- ln_pre fused with positional-embedding add ------------------

def _ln_pre_kernel(x_ref, pos_ref, g_ref, b_ref, o_ref):
    x = x_ref[...].astype(jnp.float32) + pos_ref[...]
    mean = jnp.mean(x, axis=-1, keepdims=True)
    var = jnp.mean(jnp.square(x - mean), axis=-1, keepdims=True)
    y = (x - mean) * jax.lax.rsqrt(var + 1e-5)
    o_ref[...] = (y * g_ref[...] + b_ref[...]).astype(o_ref.dtype)


def pallas_ln_pre(h3, pos_emb, gamma, beta, *, tt=512):
    """out = LayerNorm(h3 + pos_emb), h3: (B, T, W) bf16, pos_emb: (T, W) f32."""
    B, T, W = h3.shape
    tt_ = _pick_tile(T, tt, 8)
    return pl.pallas_call(
        _ln_pre_kernel,
        out_shape=jax.ShapeDtypeStruct((B, T, W), jnp.bfloat16),
        grid=(B, pl.cdiv(T, tt_)),
        in_specs=[
            pl.BlockSpec((1, tt_, W), lambda b, t: (b, t, 0)),
            pl.BlockSpec((1, tt_, W), lambda b, t: (0, t, 0)),
            pl.BlockSpec((1, 1, W), lambda b, t: (0, 0, 0)),
            pl.BlockSpec((1, 1, W), lambda b, t: (0, 0, 0)),
        ],
        out_specs=pl.BlockSpec((1, tt_, W), lambda b, t: (b, t, 0)),
        compiler_params=pltpu.CompilerParams(
            dimension_semantics=("parallel", "parallel"),
            vmem_limit_bytes=_vmem_limit_bytes()),
    )(h3,
      pos_emb.reshape(1, T, W).astype(jnp.float32),
      gamma.reshape(1, 1, W).astype(jnp.float32),
      beta.reshape(1, 1, W).astype(jnp.float32))


# ----------------------------- attention -------------------------------------

def _attention_kernel(q_ref, k_ref, v_ref, o_ref, *, heads_per_block, head_dim):
    d = head_dim
    scale = 1.0 / (d ** 0.5)
    for h in range(heads_per_block):            # small, statically unrolled
        sl = slice(h * d, (h + 1) * d)
        q = (q_ref[0, :, sl].astype(jnp.float32) * scale).astype(jnp.bfloat16)
        k = k_ref[0, :, sl]
        v = v_ref[0, :, sl]
        s = jax.lax.dot_general(q, k, (((1,), (1,)), ((), ())),
                                preferred_element_type=jnp.float32)
        s = s - jnp.max(s, axis=-1, keepdims=True)
        p = jnp.exp(s)
        l = jnp.sum(p, axis=-1, keepdims=True)
        o = jnp.dot(p.astype(jnp.bfloat16), v, preferred_element_type=jnp.float32)
        o_ref[0, :, sl] = (o * pl.reciprocal(l, approx=True)).astype(o_ref.dtype)


def _pick_head_group(heads, d):
    """Largest head group with 128 <= G*d <= 512 lanes, preferring >= 2 groups
    so both TCs of a v7x chip get work."""
    best = None
    for g in range(heads, 0, -1):
        if heads % g:
            continue
        hd = g * d
        if hd % 128 or hd > 512:
            continue
        if best is None:
            best = g
        if heads // g >= 2:
            return g
    return best if best is not None else heads


def pallas_attention(qkv, B, T, heads, d):
    """Multi-head attention fed directly from packed bf16 qkv (B*T, 3W).

    q/k/v column ranges (and head groups) are selected with BlockSpec
    index_maps, so no host-side transposes are needed."""
    W = heads * d
    G = _pick_head_group(heads, d)
    hd = G * d
    ngroups = heads // G
    nW = W // hd
    qkv3 = qkv.reshape(B, T, 3 * W)

    spec = lambda off: pl.BlockSpec((1, T, hd),
                                    lambda b, g, _o=off: (b, 0, g + _o))

    return pl.pallas_call(
        functools.partial(_attention_kernel, heads_per_block=G, head_dim=d),
        out_shape=jax.ShapeDtypeStruct((B, T, W), qkv.dtype),
        grid=(B, ngroups),
        in_specs=[spec(0), spec(nW), spec(2 * nW)],
        out_specs=pl.BlockSpec((1, T, hd), lambda b, g: (b, 0, g)),
        compiler_params=pltpu.CompilerParams(
            dimension_semantics=("parallel", "parallel"),
            vmem_limit_bytes=_vmem_limit_bytes()),
        cost_estimate=pl.CostEstimate(
            flops=4 * B * heads * T * T * d,
            transcendentals=B * heads * T * T,
            bytes_accessed=8 * B * T * W),
    )(qkv3, qkv3, qkv3)


# ------------------------- parameters (synthetic) -----------------------------

def init_clip_params(key, *, in_ch, patch, image_size, width, layers, heads,
                     out_dim, num_classes):
    n_patches = (image_size // patch) ** 2
    T = n_patches + 1
    keys = list(jax.random.split(key, 8 + 8 * layers))
    kit = iter(keys)

    def nrm_bf16(shape, std=0.02):
        # Weights stored in bf16 once at init (no per-forward convert).
        return (std * jax.random.normal(next(kit), shape)).astype(jnp.bfloat16)

    def nrm_f32(shape, std=0.02):
        return (std * jax.random.normal(next(kit), shape)).astype(jnp.float32)

    params = {
        "patch_w": nrm_bf16((in_ch * patch * patch, width)),   # conv1 as matmul
        "class_emb": nrm_f32((width,)),
        "pos_emb": nrm_f32((T, width), std=0.01),
        "ln_pre_g": jnp.ones((width,), jnp.float32),
        "ln_pre_b": jnp.zeros((width,), jnp.float32),
        "ln_post_g": jnp.ones((width,), jnp.float32),
        "ln_post_b": jnp.zeros((width,), jnp.float32),
        "proj": nrm_bf16((width, out_dim)),                    # visual projection
        "fc_w": nrm_f32((out_dim, num_classes)),               # CLIPModel.fc
        "fc_b": jnp.zeros((num_classes,), jnp.float32),
        "blocks": [],
    }
    for _ in range(layers):
        params["blocks"].append({
            "ln1_g": jnp.ones((width,), jnp.float32),
            "ln1_b": jnp.zeros((width,), jnp.float32),
            "qkv_w": nrm_bf16((width, 3 * width)),
            "qkv_b": jnp.zeros((3 * width,), jnp.float32),
            "out_w": nrm_bf16((width, width)),
            "out_b": jnp.zeros((width,), jnp.float32),
            "ln2_g": jnp.ones((width,), jnp.float32),
            "ln2_b": jnp.zeros((width,), jnp.float32),
            "fc1_w": nrm_bf16((width, 4 * width)),
            "fc1_b": jnp.zeros((4 * width,), jnp.float32),
            "fc2_w": nrm_bf16((4 * width, width)),
            "fc2_b": jnp.zeros((width,), jnp.float32),
        })
    return params


# --------------------------------- forward ------------------------------------

def clip_forward(params, x, *, patch, heads, return_feature=False):
    B, C, H, W = x.shape
    ph, pw = H // patch, W // patch
    width = params["patch_w"].shape[1]
    d = width // heads

    # Patch extraction (glue): NCHW -> (B*n_patches, C*ps*ps), channel-major
    # to match Conv2d weight flattening.  Cast host f32 input to bf16 once.
    patches = x.reshape(B, C, ph, patch, pw, patch)
    patches = patches.transpose(0, 2, 4, 1, 3, 5).reshape(
        B * ph * pw, C * patch * patch).astype(jnp.bfloat16)

    emb = pallas_linear(patches, params["patch_w"])          # (B*np, width) bf16
    emb = emb.reshape(B, ph * pw, width)

    cls = jnp.broadcast_to(
        params["class_emb"].astype(jnp.bfloat16)[None, None, :], (B, 1, width))
    h3 = jnp.concatenate([cls, emb], axis=1)                 # (B, T, width) bf16
    T = h3.shape[1]

    # ln_pre fused with the positional-embedding add.
    h = pallas_ln_pre(h3, params["pos_emb"], params["ln_pre_g"],
                      params["ln_pre_b"]).reshape(B * T, width)

    for blk in params["blocks"]:
        # attention sub-block: fused LN1 + QKV projection (bf16 stream)
        qkv = pallas_ln_linear(h, blk["ln1_g"], blk["ln1_b"],
                               blk["qkv_w"], blk["qkv_b"])    # (B*T, 3W) bf16
        attn = pallas_attention(qkv, B, T, heads, d).reshape(B * T, width)
        h = pallas_linear(attn, blk["out_w"], blk["out_b"], residual=h)

        # MLP sub-block: fused LN2 + fc1 + QuickGELU, then fc2 + residual
        m = pallas_ln_linear(h, blk["ln2_g"], blk["ln2_b"],
                             blk["fc1_w"], blk["fc1_b"], activation="quickgelu")
        h = pallas_linear(m, blk["fc2_w"], blk["fc2_b"], residual=h)

    cls_tok = h.reshape(B, T, width)[:, 0, :]                 # (B, width) bf16
    features = pallas_ln_linear(cls_tok, params["ln_post_g"], params["ln_post_b"],
                                params["proj"], out_dtype=jnp.float32)  # (B, out_dim)
    # Final classifier: num_classes (1) << 128 lanes -> plain jnp per perf review.
    logits = features @ params["fc_w"] + params["fc_b"]
    if return_feature:
        return logits, features
    return logits


# ----------------------------------- main --------------------------------------

if __name__ == "__main__":
    # Small ViT-style stand-in for CLIP 'ViT-L/14'
    # (real: width=1024, layers=24, heads=16 (head_dim=64), patch=14, out_dim=768).
    B, C, IMG = 2, 3, 32
    PATCH, WIDTH, LAYERS, HEADS, OUT_DIM, NUM_CLASSES = 8, 128, 2, 2, 128, 1

    key = jax.random.PRNGKey(0)
    k_param, k_x = jax.random.split(key)
    params = init_clip_params(k_param, in_ch=C, patch=PATCH, image_size=IMG,
                              width=WIDTH, layers=LAYERS, heads=HEADS,
                              out_dim=OUT_DIM, num_classes=NUM_CLASSES)
    x = jax.random.normal(k_x, (B, C, IMG, IMG), dtype=jnp.float32)

    fwd = jax.jit(functools.partial(clip_forward, patch=PATCH, heads=HEADS,
                                    return_feature=True))
    logits, features = fwd(params, x)
    logits = jax.block_until_ready(logits)
    features = jax.block_until_ready(features)
    assert logits.shape == (B, NUM_CLASSES)
    assert features.shape == (B, OUT_DIM)
    # TODO(synk): clip.load() checkpoint weights / torchvision preprocess have no
    # kernel equivalent; weights here are deterministic synthetic stand-ins.
    print("KERNEL_OK")
</pallas_src>

<mosaic_0001>
module attributes {stable_mosaic.version = 11 : i64} {
  func.func @kernel(%arg0: i32, %arg1: i32, %arg2: i32, %arg3: memref<32x192xbf16, #tpu.memory_space<vmem>>, %arg4: memref<192x128xbf16, #tpu.memory_space<vmem>>, %arg5: memref<1x128xf32, #tpu.memory_space<vmem>>, %arg6: memref<32x128xbf16, #tpu.memory_space<vmem>>, %arg7: memref<32x128xf32, #tpu.memory_space<vmem>>) attributes {dimension_semantics = [#tpu.dimension_semantics<parallel>, #tpu.dimension_semantics<parallel>, #tpu.dimension_semantics<arbitrary>], iteration_bounds = array<i64: 1, 1, 1>, scalar_prefetch = 0 : i64, scratch_operands = 1 : i64, tpu.core_type = #tpu.core_type<tc>, window_params = [{transform_indices = @transform_0, window_bounds = array<i64: 32, 192>}, {transform_indices = @transform_1, window_bounds = array<i64: 192, 128>}, {transform_indices = @transform_2, window_bounds = array<i64: 1, 128>}, {transform_indices = @transform_3, window_bounds = array<i64: 32, 128>}]} {
    %c0_i32 = arith.constant 0 : i32
    %0 = arith.cmpi eq, %arg2, %c0_i32 : i32
    %1 = arith.extui %0 : i1 to i32
    %c0_i32_0 = arith.constant 0 : i32
    %2 = arith.cmpi ne, %1, %c0_i32_0 : i32
    scf.if %2 {
      %cst_10 = arith.constant 0.000000e+00 : f32
      %12 = vector.broadcast %cst_10 : f32 to vector<32x128xf32>
      %c0_11 = arith.constant 0 : index
      %c0_12 = arith.constant 0 : index
      %13 = vector.load %arg7[%c0_11, %c0_12] : memref<32x128xf32, #tpu.memory_space<vmem>>, vector<32x128xf32>
      tpu.vector_store %arg7[%c0_11, %c0_12], %12 {strides = array<i32>} : memref<32x128xf32, #tpu.memory_space<vmem>>, vector<32x128xf32>,
    } else {
    }
    %c0 = arith.constant 0 : index
    %c0_1 = arith.constant 0 : index
    %3 = vector.load %arg7[%c0, %c0_1] : memref<32x128xf32, #tpu.memory_space<vmem>>, vector<32x128xf32>
    %c0_2 = arith.constant 0 : index
    %c0_3 = arith.constant 0 : index
    %4 = vector.load %arg3[%c0_2, %c0_3] : memref<32x192xbf16, #tpu.memory_space<vmem>>, vector<32x192xbf16>
    %c0_4 = arith.constant 0 : index
    %c0_5 = arith.constant 0 : index
    %5 = vector.load %arg4[%c0_4, %c0_5] : memref<192x128xbf16, #tpu.memory_space<vmem>>, vector<192x128xbf16>
    %cst = arith.constant dense<0.000000e+00> : vector<32x128xf32>
    %6 = tpu.matmul %4, %5, %cst {dimension_numbers = #tpu.dot_dimension_numbers<[1], [0], [0], [1], [0, 0, 1, 1], [], []>} : vector<32x192xbf16>, vector<192x128xbf16>, vector<32x128xf32> -> vector<32x128xf32>
    %7 = arith.addf %3, %6 : vector<32x128xf32>
    %c0_6 = arith.constant 0 : index
    %c0_7 = arith.constant 0 : index
    %8 = vector.load %arg7[%c0_6, %c0_7] : memref<32x128xf32, #tpu.memory_space<vmem>>, vector<32x128xf32>
    tpu.vector_store %arg7[%c0_6, %c0_7], %7 {strides = array<i32>} : memref<32x128xf32, #tpu.memory_space<vmem>>, vector<32x128xf32>,
    %c0_i32_8 = arith.constant 0 : i32
    %9 = arith.cmpi eq, %arg2, %c0_i32_8 : i32
    %10 = arith.extui %9 : i1 to i32
    %c0_i32_9 = arith.constant 0 : i32
    %11 = arith.cmpi ne, %10, %c0_i32_9 : i32
    scf.if %11 {
      %c0_10 = arith.constant 0 : index
      %c0_11 = arith.constant 0 : index
      %12 = vector.load %arg7[%c0_10, %c0_11] : memref<32x128xf32, #tpu.memory_space<vmem>>, vector<32x128xf32>
      %c0_12 = arith.constant 0 : index
      %c0_13 = arith.constant 0 : index
      %13 = vector.load %arg5[%c0_12, %c0_13] : memref<1x128xf32, #tpu.memory_space<vmem>>, vector<1x128xf32>
      %14 = vector.broadcast %13 : vector<1x128xf32> to vector<32x128xf32>
      %15 = arith.addf %12, %14 : vector<32x128xf32>
      %16 = arith.truncf %15 : vector<32x128xf32> to vector<32x128xbf16>
      %c0_14 = arith.constant 0 : index
      %c0_15 = arith.constant 0 : index
      %17 = vector.load %arg6[%c0_14, %c0_15] : memref<32x128xbf16, #tpu.memory_space<vmem>>, vector<32x128xbf16>
      tpu.vector_store %arg6[%c0_14, %c0_15], %16 {strides = array<i32>} : memref<32x128xbf16, #tpu.memory_space<vmem>>, vector<32x128xbf16>,
    } else {
    }
    return
  }
  func.func @transform_0(%arg0: i32, %arg1: i32, %arg2: i32) -> (i32, i32) {
    %c0_i32 = arith.constant 0 : i32
    return %arg0, %arg2 : i32, i32
  }
  func.func @transform_1(%arg0: i32, %arg1: i32, %arg2: i32) -> (i32, i32) {
    %c0_i32 = arith.constant 0 : i32
    return %arg2, %arg1 : i32, i32
  }
  func.func @transform_2(%arg0: i32, %arg1: i32, %arg2: i32) -> (i32, i32) {
    %c0_i32 = arith.constant 0 : i32
    %c0_i32_0 = arith.constant 0 : i32
    return %c0_i32, %arg1 : i32, i32
  }
  func.func @transform_3(%arg0: i32, %arg1: i32, %arg2: i32) -> (i32, i32) {
    %c0_i32 = arith.constant 0 : i32
    return %arg0, %arg1 : i32, i32
  }
}

module attributes {stable_mosaic.version = 11 : i64} {
  func.func @_ln_pre_kernel(%arg0: i32, %arg1: i32, %arg2: memref<1x17x128xbf16, #tpu.memory_space<vmem>>, %arg3: memref<1x17x128xf32, #tpu.memory_space<vmem>>, %arg4: memref<1x1x128xf32, #tpu.memory_space<vmem>>, %arg5: memref<1x1x128xf32, #tpu.memory_space<vmem>>, %arg6: memref<1x17x128xbf16, #tpu.memory_space<vmem>>) attributes {dimension_semantics = [#tpu.dimension_semantics<parallel>, #tpu.dimension_semantics<parallel>], iteration_bounds = array<i64: 2, 1>, scalar_prefetch = 0 : i64, scratch_operands = 0 : i64, tpu.core_type = #tpu.core_type<tc>, window_params = [{transform_indices = @transform_0, window_bounds = array<i64: 1, 17, 128>}, {transform_indices = @transform_1, window_bounds = array<i64: 1, 17, 128>}, {pipeline_mode = #tpu.pipeline_mode<synchronous>, transform_indices = @transform_2, window_bounds = array<i64: 1, 1, 128>}, {pipeline_mode = #tpu.pipeline_mode<synchronous>, transform_indices = @transform_3, window_bounds = array<i64: 1, 1, 128>}, {transform_indices = @transform_4, window_bounds = array<i64: 1, 17, 128>}]} {
    %c0 = arith.constant 0 : index
    %c0_0 = arith.constant 0 : index
    %c0_1 = arith.constant 0 : index
    %0 = vector.load %arg2[%c0, %c0_0, %c0_1] : memref<1x17x128xbf16, #tpu.memory_space<vmem>>, vector<1x17x128xbf16>
    %1 = arith.extf %0 : vector<1x17x128xbf16> to vector<1x17x128xf32>
    %c0_2 = arith.constant 0 : index
    %c0_3 = arith.constant 0 : index
    %c0_4 = arith.constant 0 : index
    %2 = vector.load %arg3[%c0_2, %c0_3, %c0_4] : memref<1x17x128xf32, #tpu.memory_space<vmem>>, vector<1x17x128xf32>
    %3 = arith.addf %1, %2 : vector<1x17x128xf32>
    %cst = arith.constant dense<0.000000e+00> : vector<1x17xf32>
    %4 = vector.multi_reduction <add>, %3, %cst [2] : vector<1x17x128xf32> to vector<1x17xf32>
    %5 = vector.shape_cast %4 : vector<1x17xf32> to vector<1x17x1xf32>
    %cst_5 = arith.constant 1.280000e+02 : f32
    %6 = vector.broadcast %cst_5 : f32 to vector<1x17x1xf32>
    %7 = arith.divf %5, %6 : vector<1x17x1xf32>
    %8 = vector.broadcast %7 : vector<1x17x1xf32> to vector<1x17x128xf32>
    %9 = arith.subf %3, %8 : vector<1x17x128xf32>
    %10 = arith.mulf %9, %9 : vector<1x17x128xf32>
    %cst_6 = arith.constant dense<0.000000e+00> : vector<1x17xf32>
    %11 = vector.multi_reduction <add>, %10, %cst_6 [2] : vector<1x17x128xf32> to vector<1x17xf32>
    %12 = vector.shape_cast %11 : vector<1x17xf32> to vector<1x17x1xf32>
    %cst_7 = arith.constant 1.280000e+02 : f32
    %13 = vector.broadcast %cst_7 : f32 to vector<1x17x1xf32>
    %14 = arith.divf %12, %13 : vector<1x17x1xf32>
    %15 = vector.broadcast %7 : vector<1x17x1xf32> to vector<1x17x128xf32>
    %16 = arith.subf %3, %15 : vector<1x17x128xf32>
    %cst_8 = arith.constant 9.99999974E-6 : f32
    %17 = vector.broadcast %cst_8 : f32 to vector<1x17x1xf32>
    %18 = arith.addf %14, %17 : vector<1x17x1xf32>
    %19 = math.rsqrt %18 : vector<1x17x1xf32>
    %20 = vector.broadcast %19 : vector<1x17x1xf32> to vector<1x17x128xf32>
    %21 = arith.mulf %16, %20 : vector<1x17x128xf32>
    %c0_9 = arith.constant 0 : index
    %c0_10 = arith.constant 0 : index
    %c0_11 = arith.constant 0 : index
    %22 = vector.load %arg4[%c0_9, %c0_10, %c0_11] : memref<1x1x128xf32, #tpu.memory_space<vmem>>, vector<1x1x128xf32>
    %23 = vector.broadcast %22 : vector<1x1x128xf32> to vector<1x17x128xf32>
    %24 = arith.mulf %21, %23 : vector<1x17x128xf32>
    %c0_12 = arith.constant 0 : index
    %c0_13 = arith.constant 0 : index
    %c0_14 = arith.constant 0 : index
    %25 = vector.load %arg5[%c0_12, %c0_13, %c0_14] : memref<1x1x128xf32, #tpu.memory_space<vmem>>, vector<1x1x128xf32>
    %26 = vector.broadcast %25 : vector<1x1x128xf32> to vector<1x17x128xf32>
    %27 = arith.addf %24, %26 : vector<1x17x128xf32>
    %28 = arith.truncf %27 : vector<1x17x128xf32> to vector<1x17x128xbf16>
    %c0_15 = arith.constant 0 : index
    %c0_16 = arith.constant 0 : index
    %c0_17 = arith.constant 0 : index
    %29 = vector.load %arg6[%c0_15, %c0_16, %c0_17] : memref<1x17x128xbf16, #tpu.memory_space<vmem>>, vector<1x17x128xbf16>
    tpu.vector_store %arg6[%c0_15, %c0_16, %c0_17], %28 {strides = array<i32>} : memref<1x17x128xbf16, #tpu.memory_space<vmem>>, vector<1x17x128xbf16>,
    return
  }
  func.func @transform_0(%arg0: i32, %arg1: i32) -> (i32, i32, i32) {
    %c0_i32 = arith.constant 0 : i32
    %c0_i32_0 = arith.constant 0 : i32
    return %arg0, %arg1, %c0_i32 : i32, i32, i32
  }
  func.func @transform_1(%arg0: i32, %arg1: i32) -> (i32, i32, i32) {
    %c0_i32 = arith.constant 0 : i32
    %c0_i32_0 = arith.constant 0 : i32
    %c0_i32_1 = arith.constant 0 : i32
    return %c0_i32, %arg1, %c0_i32_0 : i32, i32, i32
  }
  func.func @transform_2(%arg0: i32, %arg1: i32) -> (i32, i32, i32) {
    %c0_i32 = arith.constant 0 : i32
    %c0_i32_0 = arith.constant 0 : i32
    %c0_i32_1 = arith.constant 0 : i32
    %c0_i32_2 = arith.constant 0 : i32
    return %c0_i32, %c0_i32_0, %c0_i32_1 : i32, i32, i32
  }
  func.func @transform_3(%arg0: i32, %arg1: i32) -> (i32, i32, i32) {
    %c0_i32 = arith.constant 0 : i32
    %c0_i32_0 = arith.constant 0 : i32
    %c0_i32_1 = arith.constant 0 : i32
    %c0_i32_2 = arith.constant 0 : i32
    return %c0_i32, %c0_i32_0, %c0_i32_1 : i32, i32, i32
  }
  func.func @transform_4(%arg0: i32, %arg1: i32) -> (i32, i32, i32) {
    %c0_i32 = arith.constant 0 : i32
    %c0_i32_0 = arith.constant 0 : i32
    return %arg0, %arg1, %c0_i32 : i32, i32, i32
  }
}

module attributes {stable_mosaic.version = 11 : i64} {
  func.func @_ln_linear_kernel(%arg0: i32, %arg1: i32, %arg2: memref<34x128xbf16, #tpu.memory_space<vmem>>, %arg3: memref<1x128xf32, #tpu.memory_space<vmem>>, %arg4: memref<1x128xf32, #tpu.memory_space<vmem>>, %arg5: memref<128x384xbf16, #tpu.memory_space<vmem>>, %arg6: memref<1x384xf32, #tpu.memory_space<vmem>>, %arg7: memref<34x384xbf16, #tpu.memory_space<vmem>>, %arg8: memref<34x128xbf16, #tpu.memory_space<vmem>>) attributes {dimension_semantics = [#tpu.dimension_semantics<parallel>, #tpu.dimension_semantics<arbitrary>], iteration_bounds = array<i64: 1, 1>, scalar_prefetch = 0 : i64, scratch_operands = 1 : i64, tpu.core_type = #tpu.core_type<tc>, window_params = [{transform_indices = @transform_0, window_bounds = array<i64: 34, 128>}, {pipeline_mode = #tpu.pipeline_mode<synchronous>, transform_indices = @transform_1, window_bounds = array<i64: 1, 128>}, {pipeline_mode = #tpu.pipeline_mode<synchronous>, transform_indices = @transform_2, window_bounds = array<i64: 1, 128>}, {transform_indices = @transform_3, window_bounds = array<i64: 128, 384>}, {transform_indices = @transform_4, window_bounds = array<i64: 1, 384>}, {transform_indices = @transform_5, window_bounds = array<i64: 34, 384>}]} {
    %c0_i32 = arith.constant 0 : i32
    %0 = arith.cmpi eq, %arg1, %c0_i32 : i32
    %1 = arith.extui %0 : i1 to i32
    %c0_i32_0 = arith.constant 0 : i32
    %2 = arith.cmpi ne, %1, %c0_i32_0 : i32
    scf.if %2 {
      %c0_8 = arith.constant 0 : index
      %c0_9 = arith.constant 0 : index
      %11 = vector.load %arg2[%c0_8, %c0_9] : memref<34x128xbf16, #tpu.memory_space<vmem>>, vector<34x128xbf16>
      %12 = arith.extf %11 : vector<34x128xbf16> to vector<34x128xf32>
      %cst_10 = arith.constant dense<0.000000e+00> : vector<34xf32>
      %13 = vector.multi_reduction <add>, %12, %cst_10 [1] : vector<34x128xf32> to vector<34xf32>
      %14 = vector.shape_cast %13 : vector<34xf32> to vector<34x1xf32>
      %cst_11 = arith.constant 1.280000e+02 : f32
      %15 = vector.broadcast %cst_11 : f32 to vector<34x1xf32>
      %16 = arith.divf %14, %15 : vector<34x1xf32>
      %17 = vector.broadcast %16 : vector<34x1xf32> to vector<34x128xf32>
      %18 = arith.subf %12, %17 : vector<34x128xf32>
      %19 = arith.mulf %18, %18 : vector<34x128xf32>
      %cst_12 = arith.constant dense<0.000000e+00> : vector<34xf32>
      %20 = vector.multi_reduction <add>, %19, %cst_12 [1] : vector<34x128xf32> to vector<34xf32>
      %21 = vector.shape_cast %20 : vector<34xf32> to vector<34x1xf32>
      %cst_13 = arith.constant 1.280000e+02 : f32
      %22 = vector.broadcast %cst_13 : f32 to vector<34x1xf32>
      %23 = arith.divf %21, %22 : vector<34x1xf32>
      %24 = vector.broadcast %16 : vector<34x1xf32> to vector<34x128xf32>
      %25 = arith.subf %12, %24 : vector<34x128xf32>
      %cst_14 = arith.constant 9.99999974E-6 : f32
      %26 = vector.broadcast %cst_14 : f32 to vector<34x1xf32>
      %27 = arith.addf %23, %26 : vector<34x1xf32>
      %28 = math.rsqrt %27 : vector<34x1xf32>
      %29 = vector.broadcast %28 : vector<34x1xf32> to vector<34x128xf32>
      %30 = arith.mulf %25, %29 : vector<34x128xf32>
      %c0_15 = arith.constant 0 : index
      %c0_16 = arith.constant 0 : index
      %31 = vector.load %arg3[%c0_15, %c0_16] : memref<1x128xf32, #tpu.memory_space<vmem>>, vector<1x128xf32>
      %32 = vector.broadcast %31 : vector<1x128xf32> to vector<34x128xf32>
      %33 = arith.mulf %30, %32 : vector<34x128xf32>
      %c0_17 = arith.constant 0 : index
      %c0_18 = arith.constant 0 : index
      %34 = vector.load %arg4[%c0_17, %c0_18] : memref<1x128xf32, #tpu.memory_space<vmem>>, vector<1x128xf32>
      %35 = vector.broadcast %34 : vector<1x128xf32> to vector<34x128xf32>
      %36 = arith.addf %33, %35 : vector<34x128xf32>
      %37 = arith.truncf %36 : vector<34x128xf32> to vector<34x128xbf16>
      %c0_19 = arith.constant 0 : index
      %c0_20 = arith.constant 0 : index
      %38 = vector.load %arg8[%c0_19, %c0_20] : memref<34x128xbf16, #tpu.memory_space<vmem>>, vector<34x128xbf16>
      tpu.vector_store %arg8[%c0_19, %c0_20], %37 {strides = array<i32>} : memref<34x128xbf16, #tpu.memory_space<vmem>>, vector<34x128xbf16>,
    } else {
    }
    %c0 = arith.constant 0 : index
    %c0_1 = arith.constant 0 : index
    %3 = vector.load %arg8[%c0, %c0_1] : memref<34x128xbf16, #tpu.memory_space<vmem>>, vector<34x128xbf16>
    %c0_2 = arith.constant 0 : index
    %c0_3 = arith.constant 0 : index
    %4 = vector.load %arg5[%c0_2, %c0_3] : memref<128x384xbf16, #tpu.memory_space<vmem>>, vector<128x384xbf16>
    %cst = arith.constant dense<0.000000e+00> : vector<34x384xf32>
    %5 = tpu.matmul %3, %4, %cst {dimension_numbers = #tpu.dot_dimension_numbers<[1], [0], [0], [1], [0, 0, 1, 1], [], []>} : vector<34x128xbf16>, vector<128x384xbf16>, vector<34x384xf32> -> vector<34x384xf32>
    %c0_4 = arith.constant 0 : index
    %c0_5 = arith.constant 0 : index
    %6 = vector.load %arg6[%c0_4, %c0_5] : memref<1x384xf32, #tpu.memory_space<vmem>>, vector<1x384xf32>
    %7 = vector.broadcast %6 : vector<1x384xf32> to vector<34x384xf32>
    %8 = arith.addf %5, %7 : vector<34x384xf32>
    %9 = arith.truncf %8 : vector<34x384xf32> to vector<34x384xbf16>
    %c0_6 = arith.constant 0 : index
    %c0_7 = arith.constant 0 : index
    %10 = vector.load %arg7[%c0_6, %c0_7] : memref<34x384xbf16, #tpu.memory_space<vmem>>, vector<34x384xbf16>
    tpu.vector_store %arg7[%c0_6, %c0_7], %9 {strides = array<i32>} : memref<34x384xbf16, #tpu.memory_space<vmem>>, vector<34x384xbf16>,
    return
  }
  func.func @transform_0(%arg0: i32, %arg1: i32) -> (i32, i32) {
    %c0_i32 = arith.constant 0 : i32
    %c0_i32_0 = arith.constant 0 : i32
    return %arg0, %c0_i32 : i32, i32
  }
  func.func @transform_1(%arg0: i32, %arg1: i32) -> (i32, i32) {
    %c0_i32 = arith.constant 0 : i32
    %c0_i32_0 = arith.constant 0 : i32
    %c0_i32_1 = arith.constant 0 : i32
    return %c0_i32, %c0_i32_0 : i32, i32
  }
  func.func @transform_2(%arg0: i32, %arg1: i32) -> (i32, i32) {
    %c0_i32 = arith.constant 0 : i32
    %c0_i32_0 = arith.constant 0 : i32
    %c0_i32_1 = arith.constant 0 : i32
    return %c0_i32, %c0_i32_0 : i32, i32
  }
  func.func @transform_3(%arg0: i32, %arg1: i32) -> (i32, i32) {
    %c0_i32 = arith.constant 0 : i32
    %c0_i32_0 = arith.constant 0 : i32
    return %c0_i32, %arg1 : i32, i32
  }
  func.func @transform_4(%arg0: i32, %arg1: i32) -> (i32, i32) {
    %c0_i32 = arith.constant 0 : i32
    %c0_i32_0 = arith.constant 0 : i32
    return %c0_i32, %arg1 : i32, i32
  }
  func.func @transform_5(%arg0: i32, %arg1: i32) -> (i32, i32) {
    %c0_i32 = arith.constant 0 : i32
    return %arg0, %arg1 : i32, i32
  }
}

module attributes {stable_mosaic.version = 11 : i64} {
  func.func @_attention_kernel(%arg0: i32, %arg1: i32, %arg2: memref<1x17x128xbf16, #tpu.memory_space<vmem>>, %arg3: memref<1x17x128xbf16, #tpu.memory_space<vmem>>, %arg4: memref<1x17x128xbf16, #tpu.memory_space<vmem>>, %arg5: memref<1x17x128xbf16, #tpu.memory_space<vmem>>) attributes {dimension_semantics = [#tpu.dimension_semantics<parallel>, #tpu.dimension_semantics<parallel>], iteration_bounds = array<i64: 2, 1>, scalar_prefetch = 0 : i64, scratch_operands = 0 : i64, tpu.core_type = #tpu.core_type<tc>, window_params = [{transform_indices = @transform_0, window_bounds = array<i64: 1, 17, 128>}, {transform_indices = @transform_1, window_bounds = array<i64: 1, 17, 128>}, {transform_indices = @transform_2, window_bounds = array<i64: 1, 17, 128>}, {transform_indices = @transform_3, window_bounds = array<i64: 1, 17, 128>}]} {
    %c0 = arith.constant 0 : index
    %c0_0 = arith.constant 0 : index
    %c0_1 = arith.constant 0 : index
    %0 = vector.load %arg2[%c0, %c0_0, %c0_1] : memref<1x17x128xbf16, #tpu.memory_space<vmem>>, vector<1x17x64xbf16>
    %1 = vector.shape_cast %0 : vector<1x17x64xbf16> to vector<17x64xbf16>
    %2 = arith.extf %1 : vector<17x64xbf16> to vector<17x64xf32>
    %cst = arith.constant 1.250000e-01 : f32
    %3 = vector.broadcast %cst : f32 to vector<17x64xf32>
    %4 = arith.mulf %2, %3 : vector<17x64xf32>
    %5 = arith.truncf %4 : vector<17x64xf32> to vector<17x64xbf16>
    %c0_2 = arith.constant 0 : index
    %c0_3 = arith.constant 0 : index
    %c0_4 = arith.constant 0 : index
    %6 = vector.load %arg3[%c0_2, %c0_3, %c0_4] : memref<1x17x128xbf16, #tpu.memory_space<vmem>>, vector<1x17x64xbf16>
    %7 = vector.shape_cast %6 : vector<1x17x64xbf16> to vector<17x64xbf16>
    %c0_5 = arith.constant 0 : index
    %c0_6 = arith.constant 0 : index
    %c0_7 = arith.constant 0 : index
    %8 = vector.load %arg4[%c0_5, %c0_6, %c0_7] : memref<1x17x128xbf16, #tpu.memory_space<vmem>>, vector<1x17x64xbf16>
    %9 = vector.shape_cast %8 : vector<1x17x64xbf16> to vector<17x64xbf16>
    %cst_8 = arith.constant dense<0.000000e+00> : vector<17x17xf32>
    %10 = tpu.matmul %5, %7, %cst_8 {dimension_numbers = #tpu.dot_dimension_numbers<[1], [1], [0], [0], [0, 0, 1, 0], [], []>} : vector<17x64xbf16>, vector<17x64xbf16>, vector<17x17xf32> -> vector<17x17xf32>
    %cst_9 = arith.constant dense<0xFF800000> : vector<17xf32>
    %11 = vector.multi_reduction <maximumf>, %10, %cst_9 [1] : vector<17x17xf32> to vector<17xf32>
    %12 = vector.shape_cast %11 : vector<17xf32> to vector<17x1xf32>
    %13 = vector.broadcast %12 : vector<17x1xf32> to vector<17x17xf32>
    %14 = arith.subf %10, %13 : vector<17x17xf32>
    %15 = math.exp %14 : vector<17x17xf32>
    %cst_10 = arith.constant dense<0.000000e+00> : vector<17xf32>
    %16 = vector.multi_reduction <add>, %15, %cst_10 [1] : vector<17x17xf32> to vector<17xf32>
    %17 = vector.shape_cast %16 : vector<17xf32> to vector<17x1xf32>
    %18 = arith.truncf %15 : vector<17x17xf32> to vector<17x17xbf16>
    %cst_11 = arith.constant dense<0.000000e+00> : vector<17x64xf32>
    %19 = tpu.matmul %18, %9, %cst_11 {dimension_numbers = #tpu.dot_dimension_numbers<[1], [0], [0], [1], [0, 0, 1, 1], [], []>} : vector<17x17xbf16>, vector<17x64xbf16>, vector<17x64xf32> -> vector<17x64xf32>
    %20 = tpu.reciprocal %17 {approx = true} : vector<17x1xf32> -> vector<17x1xf32>
    %21 = vector.broadcast %20 : vector<17x1xf32> to vector<17x64xf32>
    %22 = arith.mulf %19, %21 : vector<17x64xf32>
    %23 = arith.truncf %22 : vector<17x64xf32> to vector<17x64xbf16>
    %c0_12 = arith.constant 0 : index
    %c0_13 = arith.constant 0 : index
    %c0_14 = arith.constant 0 : index
    %24 = vector.load %arg5[%c0_12, %c0_13, %c0_14] : memref<1x17x128xbf16, #tpu.memory_space<vmem>>, vector<1x17x64xbf16>
    %25 = vector.shape_cast %24 : vector<1x17x64xbf16> to vector<17x64xbf16>
    %26 = vector.shape_cast %23 : vector<17x64xbf16> to vector<1x17x64xbf16>
    tpu.vector_store %arg5[%c0_12, %c0_13, %c0_14], %26 {strides = array<i32>} : memref<1x17x128xbf16, #tpu.memory_space<vmem>>, vector<1x17x64xbf16>,
    %c0_15 = arith.constant 0 : index
    %c0_16 = arith.constant 0 : index
    %c64 = arith.constant 64 : index
    %27 = vector.load %arg2[%c0_15, %c0_16, %c64] : memref<1x17x128xbf16, #tpu.memory_space<vmem>>, vector<1x17x64xbf16>
    %28 = vector.shape_cast %27 : vector<1x17x64xbf16> to vector<17x64xbf16>
    %29 = arith.extf %28 : vector<17x64xbf16> to vector<17x64xf32>
    %cst_17 = arith.constant 1.250000e-01 : f32
    %30 = vector.broadcast %cst_17 : f32 to vector<17x64xf32>
    %31 = arith.mulf %29, %30 : vector<17x64xf32>
    %32 = arith.truncf %31 : vector<17x64xf32> to vector<17x64xbf16>
    %c0_18 = arith.constant 0 : index
    %c0_19 = arith.constant 0 : index
    %c64_20 = arith.constant 64 : index
    %33 = vector.load %arg3[%c0_18, %c0_19, %c64_20] : memref<1x17x128xbf16, #tpu.memory_space<vmem>>, vector<1x17x64xbf16>
    %34 = vector.shape_cast %33 : vector<1x17x64xbf16> to vector<17x64xbf16>
    %c0_21 = arith.constant 0 : index
    %c0_22 = arith.constant 0 : index
    %c64_23 = arith.constant 64 : index
    %35 = vector.load %arg4[%c0_21, %c0_22, %c64_23] : memref<1x17x128xbf16, #tpu.memory_space<vmem>>, vector<1x17x64xbf16>
    %36 = vector.shape_cast %35 : vector<1x17x64xbf16> to vector<17x64xbf16>
    %cst_24 = arith.constant dense<0.000000e+00> : vector<17x17xf32>
    %37 = tpu.matmul %32, %34, %cst_24 {dimension_numbers = #tpu.dot_dimension_numbers<[1], [1], [0], [0], [0, 0, 1, 0], [], []>} : vector<17x64xbf16>, vector<17x64xbf16>, vector<17x17xf32> -> vector<17x17xf32>
    %cst_25 = arith.constant dense<0xFF800000> : vector<17xf32>
    %38 = vector.multi_reduction <maximumf>, %37, %cst_25 [1] : vector<17x17xf32> to vector<17xf32>
    %39 = vector.shape_cast %38 : vector<17xf32> to vector<17x1xf32>
    %40 = vector.broadcast %39 : vector<17x1xf32> to vector<17x17xf32>
    %41 = arith.subf %37, %40 : vector<17x17xf32>
    %42 = math.exp %41 : vector<17x17xf32>
    %cst_26 = arith.constant dense<0.000000e+00> : vector<17xf32>
    %43 = vector.multi_reduction <add>, %42, %cst_26 [1] : vector<17x17xf32> to vector<17xf32>
    %44 = vector.shape_cast %43 : vector<17xf32> to vector<17x1xf32>
    %45 = arith.truncf %42 : vector<17x17xf32> to vector<17x17xbf16>
    %cst_27 = arith.constant dense<0.000000e+00> : vector<17x64xf32>
    %46 = tpu.matmul %45, %36, %cst_27 {dimension_numbers = #tpu.dot_dimension_numbers<[1], [0], [0], [1], [0, 0, 1, 1], [], []>} : vector<17x17xbf16>, vector<17x64xbf16>, vector<17x64xf32> -> vector<17x64xf32>
    %47 = tpu.reciprocal %44 {approx = true} : vector<17x1xf32> -> vector<17x1xf32>
    %48 = vector.broadcast %47 : vector<17x1xf32> to vector<17x64xf32>
    %49 = arith.mulf %46, %48 : vector<17x64xf32>
    %50 = arith.truncf %49 : vector<17x64xf32> to vector<17x64xbf16>
    %c0_28 = arith.constant 0 : index
    %c0_29 = arith.constant 0 : index
    %c64_30 = arith.constant 64 : index
    %51 = vector.load %arg5[%c0_28, %c0_29, %c64_30] : memref<1x17x128xbf16, #tpu.memory_space<vmem>>, vector<1x17x64xbf16>
    %52 = vector.shape_cast %51 : vector<1x17x64xbf16> to vector<17x64xbf16>
    %53 = vector.shape_cast %50 : vector<17x64xbf16> to vector<1x17x64xbf16>
    tpu.vector_store %arg5[%c0_28, %c0_29, %c64_30], %53 {strides = array<i32>} : memref<1x17x128xbf16, #tpu.memory_space<vmem>>, vector<1x17x64xbf16>,
    return
  }
  func.func @transform_0(%arg0: i32, %arg1: i32) -> (i32, i32, i32) {
    %c0_i32 = arith.constant 0 : i32
    %0 = arith.addi %arg1, %c0_i32 : i32
    %c0_i32_0 = arith.constant 0 : i32
    %c0_i32_1 = arith.constant 0 : i32
    return %arg0, %c0_i32_0, %0 : i32, i32, i32
  }
  func.func @transform_1(%arg0: i32, %arg1: i32) -> (i32, i32, i32) {
    %c1_i32 = arith.constant 1 : i32
    %0 = arith.addi %arg1, %c1_i32 : i32
    %c0_i32 = arith.constant 0 : i32
    %c0_i32_0 = arith.constant 0 : i32
    return %arg0, %c0_i32, %0 : i32, i32, i32
  }
  func.func @transform_2(%arg0: i32, %arg1: i32) -> (i32, i32, i32) {
    %c2_i32 = arith.constant 2 : i32
    %0 = arith.addi %arg1, %c2_i32 : i32
    %c0_i32 = arith.constant 0 : i32
    %c0_i32_0 = arith.constant 0 : i32
    return %arg0, %c0_i32, %0 : i32, i32, i32
  }
  func.func @transform_3(%arg0: i32, %arg1: i32) -> (i32, i32, i32) {
    %c0_i32 = arith.constant 0 : i32
    %c0_i32_0 = arith.constant 0 : i32
    return %arg0, %c0_i32, %arg1 : i32, i32, i32
  }
}

module attributes {stable_mosaic.version = 11 : i64} {
  func.func @_ln_linear_kernel(%arg0: i32, %arg1: i32, %arg2: memref<34x128xbf16, #tpu.memory_space<vmem>>, %arg3: memref<1x128xf32, #tpu.memory_space<vmem>>, %arg4: memref<1x128xf32, #tpu.memory_space<vmem>>, %arg5: memref<128x512xbf16, #tpu.memory_space<vmem>>, %arg6: memref<1x512xf32, #tpu.memory_space<vmem>>, %arg7: memref<34x512xbf16, #tpu.memory_space<vmem>>, %arg8: memref<34x128xbf16, #tpu.memory_space<vmem>>) attributes {dimension_semantics = [#tpu.dimension_semantics<parallel>, #tpu.dimension_semantics<arbitrary>], iteration_bounds = array<i64: 1, 1>, scalar_prefetch = 0 : i64, scratch_operands = 1 : i64, tpu.core_type = #tpu.core_type<tc>, window_params = [{transform_indices = @transform_0, window_bounds = array<i64: 34, 128>}, {pipeline_mode = #tpu.pipeline_mode<synchronous>, transform_indices = @transform_1, window_bounds = array<i64: 1, 128>}, {pipeline_mode = #tpu.pipeline_mode<synchronous>, transform_indices = @transform_2, window_bounds = array<i64: 1, 128>}, {transform_indices = @transform_3, window_bounds = array<i64: 128, 512>}, {transform_indices = @transform_4, window_bounds = array<i64: 1, 512>}, {transform_indices = @transform_5, window_bounds = array<i64: 34, 512>}]} {
    %c0_i32 = arith.constant 0 : i32
    %0 = arith.cmpi eq, %arg1, %c0_i32 : i32
    %1 = arith.extui %0 : i1 to i32
    %c0_i32_0 = arith.constant 0 : i32
    %2 = arith.cmpi ne, %1, %c0_i32_0 : i32
    scf.if %2 {
      %c0_10 = arith.constant 0 : index
      %c0_11 = arith.constant 0 : index
      %19 = vector.load %arg2[%c0_10, %c0_11] : memref<34x128xbf16, #tpu.memory_space<vmem>>, vector<34x128xbf16>
      %20 = arith.extf %19 : vector<34x128xbf16> to vector<34x128xf32>
      %cst_12 = arith.constant dense<0.000000e+00> : vector<34xf32>
      %21 = vector.multi_reduction <add>, %20, %cst_12 [1] : vector<34x128xf32> to vector<34xf32>
      %22 = vector.shape_cast %21 : vector<34xf32> to vector<34x1xf32>
      %cst_13 = arith.constant 1.280000e+02 : f32
      %23 = vector.broadcast %cst_13 : f32 to vector<34x1xf32>
      %24 = arith.divf %22, %23 : vector<34x1xf32>
      %25 = vector.broadcast %24 : vector<34x1xf32> to vector<34x128xf32>
      %26 = arith.subf %20, %25 : vector<34x128xf32>
      %27 = arith.mulf %26, %26 : vector<34x128xf32>
      %cst_14 = arith.constant dense<0.000000e+00> : vector<34xf32>
      %28 = vector.multi_reduction <add>, %27, %cst_14 [1] : vector<34x128xf32> to vector<34xf32>
      %29 = vector.shape_cast %28 : vector<34xf32> to vector<34x1xf32>
      %cst_15 = arith.constant 1.280000e+02 : f32
      %30 = vector.broadcast %cst_15 : f32 to vector<34x1xf32>
      %31 = arith.divf %29, %30 : vector<34x1xf32>
      %32 = vector.broadcast %24 : vector<34x1xf32> to vector<34x128xf32>
      %33 = arith.subf %20, %32 : vector<34x128xf32>
      %cst_16 = arith.constant 9.99999974E-6 : f32
      %34 = vector.broadcast %cst_16 : f32 to vector<34x1xf32>
      %35 = arith.addf %31, %34 : vector<34x1xf32>
      %36 = math.rsqrt %35 : vector<34x1xf32>
      %37 = vector.broadcast %36 : vector<34x1xf32> to vector<34x128xf32>
      %38 = arith.mulf %33, %37 : vector<34x128xf32>
      %c0_17 = arith.constant 0 : index
      %c0_18 = arith.constant 0 : index
      %39 = vector.load %arg3[%c0_17, %c0_18] : memref<1x128xf32, #tpu.memory_space<vmem>>, vector<1x128xf32>
      %40 = vector.broadcast %39 : vector<1x128xf32> to vector<34x128xf32>
      %41 = arith.mulf %38, %40 : vector<34x128xf32>
      %c0_19 = arith.constant 0 : index
      %c0_20 = arith.constant 0 : index
      %42 = vector.load %arg4[%c0_19, %c0_20] : memref<1x128xf32, #tpu.memory_space<vmem>>, vector<1x128xf32>
      %43 = vector.broadcast %42 : vector<1x128xf32> to vector<34x128xf32>
      %44 = arith.addf %41, %43 : vector<34x128xf32>
      %45 = arith.truncf %44 : vector<34x128xf32> to vector<34x128xbf16>
      %c0_21 = arith.constant 0 : index
      %c0_22 = arith.constant 0 : index
      %46 = vector.load %arg8[%c0_21, %c0_22] : memref<34x128xbf16, #tpu.memory_space<vmem>>, vector<34x128xbf16>
      tpu.vector_store %arg8[%c0_21, %c0_22], %45 {strides = array<i32>} : memref<34x128xbf16, #tpu.memory_space<vmem>>, vector<34x128xbf16>,
    } else {
    }
    %c0 = arith.constant 0 : index
    %c0_1 = arith.constant 0 : index
    %3 = vector.load %arg8[%c0, %c0_1] : memref<34x128xbf16, #tpu.memory_space<vmem>>, vector<34x128xbf16>
    %c0_2 = arith.constant 0 : index
    %c0_3 = arith.constant 0 : index
    %4 = vector.load %arg5[%c0_2, %c0_3] : memref<128x512xbf16, #tpu.memory_space<vmem>>, vector<128x512xbf16>
    %cst = arith.constant dense<0.000000e+00> : vector<34x512xf32>
    %5 = tpu.matmul %3, %4, %cst {dimension_numbers = #tpu.dot_dimension_numbers<[1], [0], [0], [1], [0, 0, 1, 1], [], []>} : vector<34x128xbf16>, vector<128x512xbf16>, vector<34x512xf32> -> vector<34x512xf32>
    %c0_4 = arith.constant 0 : index
    %c0_5 = arith.constant 0 : index
    %6 = vector.load %arg6[%c0_4, %c0_5] : memref<1x512xf32, #tpu.memory_space<vmem>>, vector<1x512xf32>
    %7 = vector.broadcast %6 : vector<1x512xf32> to vector<34x512xf32>
    %8 = arith.addf %5, %7 : vector<34x512xf32>
    %cst_6 = arith.constant 1.702000e+00 : f32
    %9 = vector.broadcast %cst_6 : f32 to vector<34x512xf32>
    %10 = arith.mulf %9, %8 : vector<34x512xf32>
    %11 = arith.negf %10 : vector<34x512xf32>
    %12 = math.exp %11 : vector<34x512xf32>
    %cst_7 = arith.constant 1.000000e+00 : f32
    %13 = vector.broadcast %cst_7 : f32 to vector<34x512xf32>
    %14 = arith.addf %13, %12 : vector<34x512xf32>
    %15 = arith.divf %13, %14 : vector<34x512xf32>
    %16 = arith.mulf %8, %15 : vector<34x512xf32>
    %17 = arith.truncf %16 : vector<34x512xf32> to vector<34x512xbf16>
    %c0_8 = arith.constant 0 : index
    %c0_9 = arith.constant 0 : index
    %18 = vector.load %arg7[%c0_8, %c0_9] : memref<34x512xbf16, #tpu.memory_space<vmem>>, vector<34x512xbf16>
    tpu.vector_store %arg7[%c0_8, %c0_9], %17 {strides = array<i32>} : memref<34x512xbf16, #tpu.memory_space<vmem>>, vector<34x512xbf16>,
    return
  }
  func.func @transform_0(%arg0: i32, %arg1: i32) -> (i32, i32) {
    %c0_i32 = arith.constant 0 : i32
    %c0_i32_0 = arith.constant 0 : i32
    return %arg0, %c0_i32 : i32, i32
  }
  func.func @transform_1(%arg0: i32, %arg1: i32) -> (i32, i32) {
    %c0_i32 = arith.constant 0 : i32
    %c0_i32_0 = arith.constant 0 : i32
    %c0_i32_1 = arith.constant 0 : i32
    return %c0_i32, %c0_i32_0 : i32, i32
  }
  func.func @transform_2(%arg0: i32, %arg1: i32) -> (i32, i32) {
    %c0_i32 = arith.constant 0 : i32
    %c0_i32_0 = arith.constant 0 : i32
    %c0_i32_1 = arith.constant 0 : i32
    return %c0_i32, %c0_i32_0 : i32, i32
  }
  func.func @transform_3(%arg0: i32, %arg1: i32) -> (i32, i32) {
    %c0_i32 = arith.constant 0 : i32
    %c0_i32_0 = arith.constant 0 : i32
    return %c0_i32, %arg1 : i32, i32
  }
  func.func @transform_4(%arg0: i32, %arg1: i32) -> (i32, i32) {
    %c0_i32 = arith.constant 0 : i32
    %c0_i32_0 = arith.constant 0 : i32
    return %c0_i32, %arg1 : i32, i32
  }
  func.func @transform_5(%arg0: i32, %arg1: i32) -> (i32, i32) {
    %c0_i32 = arith.constant 0 : i32
    return %arg0, %arg1 : i32, i32
  }
}

module attributes {stable_mosaic.version = 11 : i64} {
  func.func @kernel(%arg0: i32, %arg1: i32, %arg2: i32, %arg3: memref<34x128xbf16, #tpu.memory_space<vmem>>, %arg4: memref<128x128xbf16, #tpu.memory_space<vmem>>, %arg5: memref<1x128xf32, #tpu.memory_space<vmem>>, %arg6: memref<34x128xbf16, #tpu.memory_space<vmem>>, %arg7: memref<34x128xbf16, #tpu.memory_space<vmem>>, %arg8: memref<34x128xf32, #tpu.memory_space<vmem>>) attributes {dimension_semantics = [#tpu.dimension_semantics<parallel>, #tpu.dimension_semantics<parallel>, #tpu.dimension_semantics<arbitrary>], iteration_bounds = array<i64: 1, 1, 1>, scalar_prefetch = 0 : i64, scratch_operands = 1 : i64, tpu.core_type = #tpu.core_type<tc>, window_params = [{transform_indices = @transform_0, window_bounds = array<i64: 34, 128>}, {transform_indices = @transform_1, window_bounds = array<i64: 128, 128>}, {transform_indices = @transform_2, window_bounds = array<i64: 1, 128>}, {transform_indices = @transform_3, window_bounds = array<i64: 34, 128>}, {transform_indices = @transform_4, window_bounds = array<i64: 34, 128>}]} {
    %c0_i32 = arith.constant 0 : i32
    %0 = arith.cmpi eq, %arg2, %c0_i32 : i32
    %1 = arith.extui %0 : i1 to i32
    %c0_i32_0 = arith.constant 0 : i32
    %2 = arith.cmpi ne, %1, %c0_i32_0 : i32
    scf.if %2 {
      %cst_10 = arith.constant 0.000000e+00 : f32
      %12 = vector.broadcast %cst_10 : f32 to vector<34x128xf32>
      %c0_11 = arith.constant 0 : index
      %c0_12 = arith.constant 0 : index
      %13 = vector.load %arg8[%c0_11, %c0_12] : memref<34x128xf32, #tpu.memory_space<vmem>>, vector<34x128xf32>
      tpu.vector_store %arg8[%c0_11, %c0_12], %12 {strides = array<i32>} : memref<34x128xf32, #tpu.memory_space<vmem>>, vector<34x128xf32>,
    } else {
    }
    %c0 = arith.constant 0 : index
    %c0_1 = arith.constant 0 : index
    %3 = vector.load %arg8[%c0, %c0_1] : memref<34x128xf32, #tpu.memory_space<vmem>>, vector<34x128xf32>
    %c0_2 = arith.constant 0 : index
    %c0_3 = arith.constant 0 : index
    %4 = vector.load %arg3[%c0_2, %c0_3] : memref<34x128xbf16, #tpu.memory_space<vmem>>, vector<34x128xbf16>
    %c0_4 = arith.constant 0 : index
    %c0_5 = arith.constant 0 : index
    %5 = vector.load %arg4[%c0_4, %c0_5] : memref<128x128xbf16, #tpu.memory_space<vmem>>, vector<128x128xbf16>
    %cst = arith.constant dense<0.000000e+00> : vector<34x128xf32>
    %6 = tpu.matmul %4, %5, %cst {dimension_numbers = #tpu.dot_dimension_numbers<[1], [0], [0], [1], [0, 0, 1, 1], [], []>} : vector<34x128xbf16>, vector<128x128xbf16>, vector<34x128xf32> -> vector<34x128xf32>
    %7 = arith.addf %3, %6 : vector<34x128xf32>
    %c0_6 = arith.constant 0 : index
    %c0_7 = arith.constant 0 : index
    %8 = vector.load %arg8[%c0_6, %c0_7] : memref<34x128xf32, #tpu.memory_space<vmem>>, vector<34x128xf32>
    tpu.vector_store %arg8[%c0_6, %c0_7], %7 {strides = array<i32>} : memref<34x128xf32, #tpu.memory_space<vmem>>, vector<34x128xf32>,
    %c0_i32_8 = arith.constant 0 : i32
    %9 = arith.cmpi eq, %arg2, %c0_i32_8 : i32
    %10 = arith.extui %9 : i1 to i32
    %c0_i32_9 = arith.constant 0 : i32
    %11 = arith.cmpi ne, %10, %c0_i32_9 : i32
    scf.if %11 {
      %c0_10 = arith.constant 0 : index
      %c0_11 = arith.constant 0 : index
      %12 = vector.load %arg8[%c0_10, %c0_11] : memref<34x128xf32, #tpu.memory_space<vmem>>, vector<34x128xf32>
      %c0_12 = arith.constant 0 : index
      %c0_13 = arith.constant 0 : index
      %13 = vector.load %arg5[%c0_12, %c0_13] : memref<1x128xf32, #tpu.memory_space<vmem>>, vector<1x128xf32>
      %14 = vector.broadcast %13 : vector<1x128xf32> to vector<34x128xf32>
      %15 = arith.addf %12, %14 : vector<34x128xf32>
      %c0_14 = arith.constant 0 : index
      %c0_15 = arith.constant 0 : index
      %16 = vector.load %arg6[%c0_14, %c0_15] : memref<34x128xbf16, #tpu.memory_space<vmem>>, vector<34x128xbf16>
      %17 = arith.extf %16 : vector<34x128xbf16> to vector<34x128xf32>
      %18 = arith.addf %15, %17 : vector<34x128xf32>
      %19 = arith.truncf %18 : vector<34x128xf32> to vector<34x128xbf16>
      %c0_16 = arith.constant 0 : index
      %c0_17 = arith.constant 0 : index
      %20 = vector.load %arg7[%c0_16, %c0_17] : memref<34x128xbf16, #tpu.memory_space<vmem>>, vector<34x128xbf16>
      tpu.vector_store %arg7[%c0_16, %c0_17], %19 {strides = array<i32>} : memref<34x128xbf16, #tpu.memory_space<vmem>>, vector<34x128xbf16>,
    } else {
    }
    return
  }
  func.func @transform_0(%arg0: i32, %arg1: i32, %arg2: i32) -> (i32, i32) {
    %c0_i32 = arith.constant 0 : i32
    return %arg0, %arg2 : i32, i32
  }
  func.func @transform_1(%arg0: i32, %arg1: i32, %arg2: i32) -> (i32, i32) {
    %c0_i32 = arith.constant 0 : i32
    return %arg2, %arg1 : i32, i32
  }
  func.func @transform_2(%arg0: i32, %arg1: i32, %arg2: i32) -> (i32, i32) {
    %c0_i32 = arith.constant 0 : i32
    %c0_i32_0 = arith.constant 0 : i32
    return %c0_i32, %arg1 : i32, i32
  }
  func.func @transform_3(%arg0: i32, %arg1: i32, %arg2: i32) -> (i32, i32) {
    %c0_i32 = arith.constant 0 : i32
    return %arg0, %arg1 : i32, i32
  }
  func.func @transform_4(%arg0: i32, %arg1: i32, %arg2: i32) -> (i32, i32) {
    %c0_i32 = arith.constant 0 : i32
    return %arg0, %arg1 : i32, i32
  }
}

module attributes {stable_mosaic.version = 11 : i64} {
  func.func @kernel(%arg0: i32, %arg1: i32, %arg2: i32, %arg3: memref<34x512xbf16, #tpu.memory_space<vmem>>, %arg4: memref<512x128xbf16, #tpu.memory_space<vmem>>, %arg5: memref<1x128xf32, #tpu.memory_space<vmem>>, %arg6: memref<34x128xbf16, #tpu.memory_space<vmem>>, %arg7: memref<34x128xbf16, #tpu.memory_space<vmem>>, %arg8: memref<34x128xf32, #tpu.memory_space<vmem>>) attributes {dimension_semantics = [#tpu.dimension_semantics<parallel>, #tpu.dimension_semantics<parallel>, #tpu.dimension_semantics<arbitrary>], iteration_bounds = array<i64: 1, 1, 1>, scalar_prefetch = 0 : i64, scratch_operands = 1 : i64, tpu.core_type = #tpu.core_type<tc>, window_params = [{transform_indices = @transform_0, window_bounds = array<i64: 34, 512>}, {transform_indices = @transform_1, window_bounds = array<i64: 512, 128>}, {transform_indices = @transform_2, window_bounds = array<i64: 1, 128>}, {transform_indices = @transform_3, window_bounds = array<i64: 34, 128>}, {transform_indices = @transform_4, window_bounds = array<i64: 34, 128>}]} {
    %c0_i32 = arith.constant 0 : i32
    %0 = arith.cmpi eq, %arg2, %c0_i32 : i32
    %1 = arith.extui %0 : i1 to i32
    %c0_i32_0 = arith.constant 0 : i32
    %2 = arith.cmpi ne, %1, %c0_i32_0 : i32
    scf.if %2 {
      %cst_10 = arith.constant 0.000000e+00 : f32
      %12 = vector.broadcast %cst_10 : f32 to vector<34x128xf32>
      %c0_11 = arith.constant 0 : index
      %c0_12 = arith.constant 0 : index
      %13 = vector.load %arg8[%c0_11, %c0_12] : memref<34x128xf32, #tpu.memory_space<vmem>>, vector<34x128xf32>
      tpu.vector_store %arg8[%c0_11, %c0_12], %12 {strides = array<i32>} : memref<34x128xf32, #tpu.memory_space<vmem>>, vector<34x128xf32>,
    } else {
    }
    %c0 = arith.constant 0 : index
    %c0_1 = arith.constant 0 : index
    %3 = vector.load %arg8[%c0, %c0_1] : memref<34x128xf32, #tpu.memory_space<vmem>>, vector<34x128xf32>
    %c0_2 = arith.constant 0 : index
    %c0_3 = arith.constant 0 : index
    %4 = vector.load %arg3[%c0_2, %c0_3] : memref<34x512xbf16, #tpu.memory_space<vmem>>, vector<34x512xbf16>
    %c0_4 = arith.constant 0 : index
    %c0_5 = arith.constant 0 : index
    %5 = vector.load %arg4[%c0_4, %c0_5] : memref<512x128xbf16, #tpu.memory_space<vmem>>, vector<512x128xbf16>
    %cst = arith.constant dense<0.000000e+00> : vector<34x128xf32>
    %6 = tpu.matmul %4, %5, %cst {dimension_numbers = #tpu.dot_dimension_numbers<[1], [0], [0], [1], [0, 0, 1, 1], [], []>} : vector<34x512xbf16>, vector<512x128xbf16>, vector<34x128xf32> -> vector<34x128xf32>
    %7 = arith.addf %3, %6 : vector<34x128xf32>
    %c0_6 = arith.constant 0 : index
    %c0_7 = arith.constant 0 : index
    %8 = vector.load %arg8[%c0_6, %c0_7] : memref<34x128xf32, #tpu.memory_space<vmem>>, vector<34x128xf32>
    tpu.vector_store %arg8[%c0_6, %c0_7], %7 {strides = array<i32>} : memref<34x128xf32, #tpu.memory_space<vmem>>, vector<34x128xf32>,
    %c0_i32_8 = arith.constant 0 : i32
    %9 = arith.cmpi eq, %arg2, %c0_i32_8 : i32
    %10 = arith.extui %9 : i1 to i32
    %c0_i32_9 = arith.constant 0 : i32
    %11 = arith.cmpi ne, %10, %c0_i32_9 : i32
    scf.if %11 {
      %c0_10 = arith.constant 0 : index
      %c0_11 = arith.constant 0 : index
      %12 = vector.load %arg8[%c0_10, %c0_11] : memref<34x128xf32, #tpu.memory_space<vmem>>, vector<34x128xf32>
      %c0_12 = arith.constant 0 : index
      %c0_13 = arith.constant 0 : index
      %13 = vector.load %arg5[%c0_12, %c0_13] : memref<1x128xf32, #tpu.memory_space<vmem>>, vector<1x128xf32>
      %14 = vector.broadcast %13 : vector<1x128xf32> to vector<34x128xf32>
      %15 = arith.addf %12, %14 : vector<34x128xf32>
      %c0_14 = arith.constant 0 : index
      %c0_15 = arith.constant 0 : index
      %16 = vector.load %arg6[%c0_14, %c0_15] : memref<34x128xbf16, #tpu.memory_space<vmem>>, vector<34x128xbf16>
      %17 = arith.extf %16 : vector<34x128xbf16> to vector<34x128xf32>
      %18 = arith.addf %15, %17 : vector<34x128xf32>
      %19 = arith.truncf %18 : vector<34x128xf32> to vector<34x128xbf16>
      %c0_16 = arith.constant 0 : index
      %c0_17 = arith.constant 0 : index
      %20 = vector.load %arg7[%c0_16, %c0_17] : memref<34x128xbf16, #tpu.memory_space<vmem>>, vector<34x128xbf16>
      tpu.vector_store %arg7[%c0_16, %c0_17], %19 {strides = array<i32>} : memref<34x128xbf16, #tpu.memory_space<vmem>>, vector<34x128xbf16>,
    } else {
    }
    return
  }
  func.func @transform_0(%arg0: i32, %arg1: i32, %arg2: i32) -> (i32, i32) {
    %c0_i32 = arith.constant 0 : i32
    return %arg0, %arg2 : i32, i32
  }
  func.func @transform_1(%arg0: i32, %arg1: i32, %arg2: i32) -> (i32, i32) {
    %c0_i32 = arith.constant 0 : i32
    return %arg2, %arg1 : i32, i32
  }
  func.func @transform_2(%arg0: i32, %arg1: i32, %arg2: i32) -> (i32, i32) {
    %c0_i32 = arith.constant 0 : i32
    %c0_i32_0 = arith.constant 0 : i32
    return %c0_i32, %arg1 : i32, i32
  }
  func.func @transform_3(%arg0: i32, %arg1: i32, %arg2: i32) -> (i32, i32) {
    %c0_i32 = arith.constant 0 : i32
    return %arg0, %arg1 : i32, i32
  }
  func.func @transform_4(%arg0: i32, %arg1: i32, %arg2: i32) -> (i32, i32) {
    %c0_i32 = arith.constant 0 : i32
    return %arg0, %arg1 : i32, i32
  }
}

module attributes {stable_mosaic.version = 11 : i64} {
  func.func @_ln_linear_kernel(%arg0: i32, %arg1: i32, %arg2: memref<2x128xbf16, #tpu.memory_space<vmem>>, %arg3: memref<1x128xf32, #tpu.memory_space<vmem>>, %arg4: memref<1x128xf32, #tpu.memory_space<vmem>>, %arg5: memref<128x128xbf16, #tpu.memory_space<vmem>>, %arg6: memref<1x128xf32, #tpu.memory_space<vmem>>, %arg7: memref<2x128xf32, #tpu.memory_space<vmem>>, %arg8: memref<2x128xbf16, #tpu.memory_space<vmem>>) attributes {dimension_semantics = [#tpu.dimension_semantics<parallel>, #tpu.dimension_semantics<arbitrary>], iteration_bounds = array<i64: 1, 1>, scalar_prefetch = 0 : i64, scratch_operands = 1 : i64, tpu.core_type = #tpu.core_type<tc>, window_params = [{transform_indices = @transform_0, window_bounds = array<i64: 2, 128>}, {pipeline_mode = #tpu.pipeline_mode<synchronous>, transform_indices = @transform_1, window_bounds = array<i64: 1, 128>}, {pipeline_mode = #tpu.pipeline_mode<synchronous>, transform_indices = @transform_2, window_bounds = array<i64: 1, 128>}, {transform_indices = @transform_3, window_bounds = array<i64: 128, 128>}, {transform_indices = @transform_4, window_bounds = array<i64: 1, 128>}, {transform_indices = @transform_5, window_bounds = array<i64: 2, 128>}]} {
    %c0_i32 = arith.constant 0 : i32
    %0 = arith.cmpi eq, %arg1, %c0_i32 : i32
    %1 = arith.extui %0 : i1 to i32
    %c0_i32_0 = arith.constant 0 : i32
    %2 = arith.cmpi ne, %1, %c0_i32_0 : i32
    scf.if %2 {
      %c0_8 = arith.constant 0 : index
      %c0_9 = arith.constant 0 : index
      %10 = vector.load %arg2[%c0_8, %c0_9] : memref<2x128xbf16, #tpu.memory_space<vmem>>, vector<2x128xbf16>
      %11 = arith.extf %10 : vector<2x128xbf16> to vector<2x128xf32>
      %cst_10 = arith.constant dense<0.000000e+00> : vector<2xf32>
      %12 = vector.multi_reduction <add>, %11, %cst_10 [1] : vector<2x128xf32> to vector<2xf32>
      %13 = vector.shape_cast %12 : vector<2xf32> to vector<2x1xf32>
      %cst_11 = arith.constant 1.280000e+02 : f32
      %14 = vector.broadcast %cst_11 : f32 to vector<2x1xf32>
      %15 = arith.divf %13, %14 : vector<2x1xf32>
      %16 = vector.broadcast %15 : vector<2x1xf32> to vector<2x128xf32>
      %17 = arith.subf %11, %16 : vector<2x128xf32>
      %18 = arith.mulf %17, %17 : vector<2x128xf32>
      %cst_12 = arith.constant dense<0.000000e+00> : vector<2xf32>
      %19 = vector.multi_reduction <add>, %18, %cst_12 [1] : vector<2x128xf32> to vector<2xf32>
      %20 = vector.shape_cast %19 : vector<2xf32> to vector<2x1xf32>
      %cst_13 = arith.constant 1.280000e+02 : f32
      %21 = vector.broadcast %cst_13 : f32 to vector<2x1xf32>
      %22 = arith.divf %20, %21 : vector<2x1xf32>
      %23 = vector.broadcast %15 : vector<2x1xf32> to vector<2x128xf32>
      %24 = arith.subf %11, %23 : vector<2x128xf32>
      %cst_14 = arith.constant 9.99999974E-6 : f32
      %25 = vector.broadcast %cst_14 : f32 to vector<2x1xf32>
      %26 = arith.addf %22, %25 : vector<2x1xf32>
      %27 = math.rsqrt %26 : vector<2x1xf32>
      %28 = vector.broadcast %27 : vector<2x1xf32> to vector<2x128xf32>
      %29 = arith.mulf %24, %28 : vector<2x128xf32>
      %c0_15 = arith.constant 0 : index
      %c0_16 = arith.constant 0 : index
      %30 = vector.load %arg3[%c0_15, %c0_16] : memref<1x128xf32, #tpu.memory_space<vmem>>, vector<1x128xf32>
      %31 = vector.broadcast %30 : vector<1x128xf32> to vector<2x128xf32>
      %32 = arith.mulf %29, %31 : vector<2x128xf32>
      %c0_17 = arith.constant 0 : index
      %c0_18 = arith.constant 0 : index
      %33 = vector.load %arg4[%c0_17, %c0_18] : memref<1x128xf32, #tpu.memory_space<vmem>>, vector<1x128xf32>
      %34 = vector.broadcast %33 : vector<1x128xf32> to vector<2x128xf32>
      %35 = arith.addf %32, %34 : vector<2x128xf32>
      %36 = arith.truncf %35 : vector<2x128xf32> to vector<2x128xbf16>
      %c0_19 = arith.constant 0 : index
      %c0_20 = arith.constant 0 : index
      %37 = vector.load %arg8[%c0_19, %c0_20] : memref<2x128xbf16, #tpu.memory_space<vmem>>, vector<2x128xbf16>
      tpu.vector_store %arg8[%c0_19, %c0_20], %36 {strides = array<i32>} : memref<2x128xbf16, #tpu.memory_space<vmem>>, vector<2x128xbf16>,
    } else {
    }
    %c0 = arith.constant 0 : index
    %c0_1 = arith.constant 0 : index
    %3 = vector.load %arg8[%c0, %c0_1] : memref<2x128xbf16, #tpu.memory_space<vmem>>, vector<2x128xbf16>
    %c0_2 = arith.constant 0 : index
    %c0_3 = arith.constant 0 : index
    %4 = vector.load %arg5[%c0_2, %c0_3] : memref<128x128xbf16, #tpu.memory_space<vmem>>, vector<128x128xbf16>
    %cst = arith.constant dense<0.000000e+00> : vector<2x128xf32>
    %5 = tpu.matmul %3, %4, %cst {dimension_numbers = #tpu.dot_dimension_numbers<[1], [0], [0], [1], [0, 0, 1, 1], [], []>} : vector<2x128xbf16>, vector<128x128xbf16>, vector<2x128xf32> -> vector<2x128xf32>
    %c0_4 = arith.constant 0 : index
    %c0_5 = arith.constant 0 : index
    %6 = vector.load %arg6[%c0_4, %c0_5] : memref<1x128xf32, #tpu.memory_space<vmem>>, vector<1x128xf32>
    %7 = vector.broadcast %6 : vector<1x128xf32> to vector<2x128xf32>
    %8 = arith.addf %5, %7 : vector<2x128xf32>
    %c0_6 = arith.constant 0 : index
    %c0_7 = arith.constant 0 : index
    %9 = vector.load %arg7[%c0_6, %c0_7] : memref<2x128xf32, #tpu.memory_space<vmem>>, vector<2x128xf32>
    tpu.vector_store %arg7[%c0_6, %c0_7], %8 {strides = array<i32>} : memref<2x128xf32, #tpu.memory_space<vmem>>, vector<2x128xf32>,
    return
  }
  func.func @transform_0(%arg0: i32, %arg1: i32) -> (i32, i32) {
    %c0_i32 = arith.constant 0 : i32
    %c0_i32_0 = arith.constant 0 : i32
    return %arg0, %c0_i32 : i32, i32
  }
  func.func @transform_1(%arg0: i32, %arg1: i32) -> (i32, i32) {
    %c0_i32 = arith.constant 0 : i32
    %c0_i32_0 = arith.constant 0 : i32
    %c0_i32_1 = arith.constant 0 : i32
    return %c0_i32, %c0_i32_0 : i32, i32
  }
  func.func @transform_2(%arg0: i32, %arg1: i32) -> (i32, i32) {
    %c0_i32 = arith.constant 0 : i32
    %c0_i32_0 = arith.constant 0 : i32
    %c0_i32_1 = arith.constant 0 : i32
    return %c0_i32, %c0_i32_0 : i32, i32
  }
  func.func @transform_3(%arg0: i32, %arg1: i32) -> (i32, i32) {
    %c0_i32 = arith.constant 0 : i32
    %c0_i32_0 = arith.constant 0 : i32
    return %c0_i32, %arg1 : i32, i32
  }
  func.func @transform_4(%arg0: i32, %arg1: i32) -> (i32, i32) {
    %c0_i32 = arith.constant 0 : i32
    %c0_i32_0 = arith.constant 0 : i32
    return %c0_i32, %arg1 : i32, i32
  }
  func.func @transform_5(%arg0: i32, %arg1: i32) -> (i32, i32) {
    %c0_i32 = arith.constant 0 : i32
    return %arg0, %arg1 : i32, i32
  }
}

</mosaic_0001>

<bundles_post_ra>
// kernel: clip_forward.14
= control target key start
LH: loop header
LB: loop body
LE: loop exit
PB: predicated region body
PF: predicated region fallthrough
CT: control target
= control target key end

     0   :  { %s558_s15 = smov 0   ;;  %s560_s16 = smov 0   ;;  %s616_s0 = inlined_call_operand.vmem [shape: bf16[2,17,128], index: 0, kind: input, shape index: {}]   ;;  %s617_s1 = inlined_call_operand.vmem [shape: f32[1,17,128], index: 1, kind: input, shape index: {}]   ;;  %s618_s2 = inlined_call_operand.vmem [shape: f32[1,1,128], index: 2, kind: input, shape index: {}]   ;;  %s619_s3 = inlined_call_operand.vmem [shape: f32[1,1,128], index: 3, kind: input, shape index: {}]   ;;  %s620_s4 = inlined_call_operand.vmem [shape: bf16[2,17,128], index: 4, kind: output, shape index: {}]  }
   0x1   :  { %s562_s17 = smov 0  }
   0x2 LB: > { %s26_s18 = sadd.s32 1, %s527_s16  ;;  %p456_p0 = scmp.ge.s32.totalorder %s531_s17, 1  ;;  %s531_s17 = sphi %s562_s17, %s14_s17   ;;  %s527_s16 = sphi %s560_s16, %s622_s16   ;;  %s523_s15 = sphi %s558_s15, %s621_s15  }
   0x3   : > { %p28_p1 = scmp.ge.s32.totalorder %s26_s18, 2  ;;  %p194_p2 = scmp.lt.s32.totalorder %s531_s17, 3 }
   0x5   : > { %s624_s18 = smov (%p28_p1, %s26_s18), 0  ;;  %p195_p3 = pnand %p456_p0, %p194_p2 }
   0x6   : > { %p234_p4 = scmp.lt.s32.totalorder (!%p195_p3), %s523_s15, 1  ;;  %v267_v0 = vld [vmem:[%s617_s1 + $0x10] sm:$0x1] (!%p195_p3)  ;;  %v266_v3 = vld [vmem:[%s617_s1 + $0x8] sm:$0xff] (!%p195_p3)  ;;  %vm275_vm0 = vcmask (!%p195_p3), 1040384   ;;  %v265_v8 = vld [vmem:[%s617_s1] sm:$0xff] (!%p195_p3) }
   0x7   : > { %198 = sbr.rel (%p195_p3) target bundleno = 343 (0x157), region = 36  ;;  %v459_v35 = vld [vmem:[%s618_s2] ss:$0 sm:$0xff] (!%p195_p3)  ;;  %vm344_vm1 = vsmask.f32 (!%p195_p3), 256 }
   0x8   : > { %v460_v37 = vld [vmem:[%s619_s3] ss:$0 sm:$0xff] (!%p195_p3)  ;;  %vm345_vm2 = vmand (!%p195_p3), %vm275_vm0, %vm344_vm1 }
   0xe   : > { %s626_s15 = smov (!%p234_p4, %s523_s15), 1 }
   0xf   : > { %s478_s19 = smul.u32 12, %s626_s15 }
  0x11   : > { %s241_s22 = scalar_lea.vmem %s616_s0, %s478_s19  ;;  %s257_s9 = scalar_lea.vmem %s620_s4, %s478_s19 }
  0x12   : > { %v261_v1 = vld [vmem:[%s241_s22 + $0x8] sm:$0x1]  ;;  %v470_v2 = vld [vmem:[%s241_s22] sm:$0xff]  }
  0x13   : > { %v264_v4 = vunpack.c.l.bf16 %v261_v1  ;;  %v472_v5 = vunpack.c.h.bf16 %v470_v2  ;;  %v471_v6 = vunpack.c.l.bf16 %v470_v2  ;;  %v346_v44 = vld [vmem:[%s257_s9 + $0x8] sm:$0x1] }
  0x15   : > { %v270_v7 = vadd.f32 %v267_v0, %v264_v4  ;;  %v269_v9 = vadd.f32 %v472_v5, %v266_v3  ;;  %v268_v11 = vadd.f32 %v471_v6, %v265_v8 }
  0x17   : > { %v276_v10 = vsel %vm275_vm0, %v270_v7, 0.0  ;;  %273 = vadd.xlane.f32.xlu1 %v269_v9 }
  0x18   : > { %277 = vadd.xlane.f32.xlu0 %v276_v10 }
  0x1c   : > { %271 = vadd.xlane.f32.xlu0 %v268_v11 }
  0xa4   : > { %v274_v12 = vpop.xlane.xlu1 %273 }
  0xa5   : > { %v278_v13 = vpop.xlane.xlu0 %277  ;;  %v281_v14 = vmul.f32 0.0078125, %v274_v12 }
  0xa6   : > { %v282_v15 = vmul.f32 0.0078125, %v278_v13 }
  0xa7   : > { %v284_v18 = vsub.f32 %v269_v9, %v281_v14 }
  0xa8   : > { %v285_v16 = vsub.f32 %v270_v7, %v282_v15 }
  0xa9   : > { %v272_v17 = vpop.xlane.xlu0 %271  ;;  %v287_v23 = vmul.f32 %v284_v18, %v284_v18 }
  0xaa   : > { %v280_v19 = vmul.f32 0.0078125, %v272_v17  ;;  %v288_v20 = vmul.f32 %v285_v16, %v285_v16 }
  0xac   : > { %v283_v21 = vsub.f32 %v268_v11, %v280_v19  ;;  %v293_v22 = vsel %vm275_vm0, %v288_v20, 0.0 }
  0xad   : > { %294 = vadd.xlane.f32.xlu1 %v293_v22 }
  0xae   : > { %v286_v24 = vmul.f32 %v283_v21, %v283_v21 }
  0xb0   : > { %289 = vadd.xlane.f32.xlu0 %v286_v24 }
  0xb1   : > { %291 = vadd.xlane.f32.xlu1 %v287_v23 }
 0x13a   : > { %v295_v25 = vpop.xlane.xlu1 %294 }
 0x13b   : > { %v298_v26 = vmul.f32 0.0078125, %v295_v25 }
 0x13d   : > { %v301_v27 = vadd.f32 1e-05, %v298_v26  ;;  %v290_v28 = vpop.xlane.xlu0 %289 }
 0x13e   : > { %v296_v29 = vmul.f32 0.0078125, %v290_v28  ;;  %v292_v30 = vpop.xlane.xlu1 %291 }
 0x13f   : > { %503 = vrsqrt.f32 %v301_v27  ;;  %v297_v31 = vmul.f32 0.0078125, %v292_v30 }
 0x140   : > { %v299_v32 = vadd.f32 1e-05, %v296_v29 }
 0x141   : > { %v300_v33 = vadd.f32 1e-05, %v297_v31 }
 0x142   : > { %505 = vrsqrt.f32 %v299_v32 }
 0x143   : > { %507 = vrsqrt.f32 %v300_v33 }
 0x149   : > { %v504_v34 = vpop.eup %503 }
 0x14a   : > { %v307_v36 = vmul.f32 %v504_v34, %v285_v16 }
 0x14c   : > { %v506_v38 = vpop.eup %505  ;;  %v317_v39 = vmul.f32 %v459_v35, %v307_v36 }
 0x14d   : > { %v508_v40 = vpop.eup %507  ;;  %v305_v41 = vmul.f32 %v506_v38, %v283_v21 }
 0x14e   : > { %v327_v42 = vadd.f32 %v460_v37, %v317_v39  ;;  %v306_v43 = vmul.f32 %v508_v40, %v284_v18 }
 0x14f   : > { %v315_v45 = vmul.f32 %v459_v35, %v305_v41 }
 0x150   : > { %v468_v46 = vpack.c.bf16 %v327_v42, %v327_v42  ;;  %v316_v47 = vmul.f32 %v459_v35, %v306_v43 }
 0x151   : > { %v325_v48 = vadd.f32 %v460_v37, %v315_v45 }
 0x152   : > { %v347_v49 = vsel %vm345_vm2, %v468_v46, %v346_v44  ;;  %v326_v50 = vadd.f32 %v460_v37, %v316_v47 }
 0x153   : > { %348 = vst [vmem:[%s257_s9 + $0x8] sm:$0x1] %v347_v49 }
 0x154   : > { %v476_v51 = vpack.c.bf16 %v326_v50, %v325_v48 }
 0x156   : > { %477 = vst [vmem:[%s257_s9] sm:$0xff] %v476_v51  }
 0x157 PF: > { %s14_s17 = sadd.s32 1, %s531_s17   ;;  %s621_s15 = smov %s527_s16 }
 0x158   : > { %p11_p5 = scmp.ge.s32.totalorder %s14_s17, 4   ;;  %s622_s16 = smov %s624_s18 }
 0x15a   :  { %13 = sbr.rel (!%p11_p5) target bundleno = 2 (0x2), region = 69 }

// kernel: clip_forward.13
= control target key start
LH: loop header
LB: loop body
LE: loop exit
PB: predicated region body
PF: predicated region fallthrough
CT: control target
= control target key end

     0   :  { %v332_v0 = vmov 0   ;;  %vm145_vm0 = vcmask 523264   ;;  %s434_s1 = inlined_call_operand.vmem [shape: bf16[192,128], index: 1, kind: input, shape index: {}]   ;;  %s435_s0 = inlined_call_operand.vmem [shape: bf16[32,192], index: 0, kind: input, shape index: {}]   ;;  %s436_s2 = inlined_call_operand.vmem [shape: f32[1,128], index: 2, kind: input, shape index: {}]   ;;  %s437_s3 = inlined_call_operand.vmem [shape: bf16[32,128], index: 3, kind: output, shape index: {}]  }
   0x1   :  { %152 = vmatprep.subr.bf16.mxu0 %v332_v0  ;;  %289 = vmatprep.subr.bf16.mxu1 %v332_v0  ;;  %v314_v1 = vld [vmem:[%s434_s1] sm:$0xff]   ;;  %v315_v2 = vld [vmem:[%s434_s1 + $0x8] sm:$0xff]   ;;  %v316_v3 = vld [vmem:[%s434_s1 + $0x10] sm:$0xff]  }
   0x2   :  { %153 = vmatpush1.bf16.msra.mxu0 %v314_v1  ;;  %301 = vmatpush1.bf16.msra.mxu1 %v314_v1  ;;  %v317_v4 = vld [vmem:[%s434_s1 + $0x18] sm:$0xff]   ;;  %v328_v5 = vld [vmem:[%s435_s0 + $0x4] ss:$8 sps:$4 sm:$0xff]   ;;  %v320_v9 = vld [vmem:[%s434_s1 + $0x30] sm:$0xff]  }
   0x3   :  { %154 = vmatprep.subr.bf16.mxu0 %v332_v0  ;;  %290 = vmatprep.subr.bf16.mxu1 %v332_v0  ;;  %v318_v6 = vld [vmem:[%s434_s1 + $0x20] sm:$0xff]   ;;  %v331_v7 = vld [vmem:[%s435_s0 + $0x14] ss:$8 sps:$4 sm:$0xff]   ;;  %v319_v8 = vld [vmem:[%s434_s1 + $0x28] sm:$0xff]  }
   0x4   :  { %267 = vmatprep.mubr.msk.bf16.mxu0 %vm145_vm0, %v328_v5  ;;  %268 = vmatprep.mubr.msk.bf16.mxu1 %vm145_vm0, %v331_v7  ;;  %v321_v10 = vld [vmem:[%s434_s1 + $0x38] sm:$0xff]   ;;  %v322_v11 = vld [vmem:[%s434_s1 + $0x40] sm:$0xff]   ;;  %v323_v12 = vld [vmem:[%s434_s1 + $0x48] sm:$0xff]  }
   0x5   :  { %v324_v13 = vld [vmem:[%s434_s1 + $0x50] sm:$0xff]   ;;  %v325_v14 = vld [vmem:[%s434_s1 + $0x58] sm:$0xff]   ;;  %v326_v15 = vld [vmem:[%s435_s0] ss:$8 sps:$4 sm:$0xff]  }
   0x6   :  { %155 = vmatpush1.bf16.msra.mxu0 %v315_v2  ;;  %302 = vmatpush1.bf16.msra.mxu1 %v315_v2  ;;  %v329_v16 = vld [vmem:[%s435_s0 + $0x10] ss:$8 sps:$4 sm:$0xff]   ;;  %v269_v18 = vld [vmem:[%s436_s2] ss:$0 sm:$0xff] }
   0x7   :  { %156 = vmatprep.subr.bf16.mxu0 %v332_v0  ;;  %291 = vmatprep.subr.bf16.mxu1 %v332_v0 }
   0xa   :  { %157 = vmatpush1.bf16.msra.mxu0 %v316_v3  ;;  %303 = vmatpush1.bf16.msra.mxu1 %v316_v3 }
   0xb   :  { %158 = vmatprep.subr.bf16.mxu0 %v332_v0  ;;  %292 = vmatprep.subr.bf16.mxu1 %v332_v0 }
   0xe   :  { %159 = vmatpush1.bf16.msra.mxu0 %v317_v4  ;;  %304 = vmatpush1.bf16.msra.mxu1 %v317_v4 }
   0xf   :  { %160 = vmatprep.subr.bf16.mxu0 %v332_v0  ;;  %293 = vmatprep.subr.bf16.mxu1 %v332_v0 }
  0x12   :  { %161 = vmatpush1.bf16.msra.mxu0 %v318_v6  ;;  %305 = vmatpush1.bf16.msra.mxu1 %v318_v6 }
  0x13   :  { %162 = vmatprep.subr.bf16.mxu0 %v332_v0  ;;  %294 = vmatprep.subr.bf16.mxu1 %v332_v0 }
  0x16   :  { %163 = vmatpush1.bf16.msra.mxu0 %v319_v8  ;;  %306 = vmatpush1.bf16.msra.mxu1 %v319_v8 }
  0x17   :  { %164 = vmatprep.subr.bf16.mxu0 %v332_v0  ;;  %295 = vmatprep.subr.bf16.mxu1 %v332_v0 }
  0x1a   :  { %165 = vmatpush1.bf16.msra.mxu0 %v320_v9  ;;  %307 = vmatpush1.bf16.msra.mxu1 %v320_v9 }
  0x1b   :  { %166 = vmatprep.subr.bf16.mxu0 %v332_v0  ;;  %296 = vmatprep.subr.bf16.mxu1 %v332_v0 }
  0x1e   :  { %167 = vmatpush1.bf16.msra.mxu0 %v321_v10  ;;  %308 = vmatpush1.bf16.msra.mxu1 %v321_v10 }
  0x1f   :  { %168 = vmatprep.subr.bf16.mxu0 %v332_v0  ;;  %297 = vmatprep.subr.bf16.mxu1 %v332_v0 }
  0x22   :  { %169 = vmatpush1.bf16.msra.mxu0 %v322_v11  ;;  %309 = vmatpush1.bf16.msra.mxu1 %v322_v11 }
  0x23   :  { %170 = vmatprep.subr.bf16.mxu0 %v332_v0  ;;  %298 = vmatprep.subr.bf16.mxu1 %v332_v0 }
  0x26   :  { %171 = vmatpush1.bf16.msra.mxu0 %v323_v12  ;;  %310 = vmatpush1.bf16.msra.mxu1 %v323_v12 }
  0x27   :  { %172 = vmatprep.subr.bf16.mxu0 %v332_v0  ;;  %299 = vmatprep.subr.bf16.mxu1 %v332_v0 }
  0x2a   :  { %173 = vmatpush1.bf16.msra.mxu0 %v324_v13  ;;  %311 = vmatpush1.bf16.msra.mxu1 %v324_v13 }
  0x2b   :  { %174 = vmatprep.subr.bf16.mxu0 %v332_v0  ;;  %300 = vmatprep.subr.bf16.mxu1 %v332_v0 }
  0x2e   :  { %175 = vmatpush1.bf16.msra.mxu0 %v325_v14  ;;  %312 = vmatpush1.bf16.msra.mxu1 %v325_v14 }
  0x31   :  { %185 = vmatmul.mubr.bf16.vlgmr.msra.gmra.mrb[0].mxu0 %v326_v15  ;;  %193 = vmatmul.mubr.bf16.vlgmr.msra.gmra.mrb[0].mxu1 %v329_v16 }
 0x104   :  { %v186_v17 = vpop.f32.mrb[0].mxu0  ;;  %v194_v19 = vpop.f32.mrb[0].mxu1 }
 0x105   :  { %v188_v20 = vpop.f32.mrb[1].mxu0  ;;  %v196_v21 = vpop.f32.mrb[1].mxu1  ;;  %v223_v24 = vadd.f32 %v269_v18, %v186_v17  ;;  %v225_v25 = vadd.f32 %v269_v18, %v194_v19 }
 0x106   :  { %v189_v22 = vpop.f32.mrb[2].mxu0  ;;  %v197_v23 = vpop.f32.mrb[2].mxu1 }
 0x107   :  { %v224_v26 = vadd.f32 %v269_v18, %v189_v22  ;;  %v226_v27 = vadd.f32 %v269_v18, %v197_v23  ;;  %v191_v28 = vpop.f32.mrb[3].mxu0  ;;  %v199_v29 = vpop.f32.mrb[3].mxu1 }
 0x109   :  { %v281_v30 = vpack.c.bf16 %v224_v26, %v223_v24  ;;  %v286_v31 = vpack.c.bf16 %v226_v27, %v225_v25 }
 0x10b   :  { %282 = vst [vmem:[%s437_s3] sm:$0xff] %v281_v30   ;;  %288 = vst [vmem:[%s437_s3 + $0x8] sm:$0xff] %v286_v31  }

// kernel: clip_forward.15
= control target key start
LH: loop header
LB: loop body
LE: loop exit
PB: predicated region body
PF: predicated region fallthrough
CT: control target
= control target key end

     0   :  { %vm43_vm0 = vcmask 1041408   ;;  %v692_v32 = vmov 0.0   ;;  %v693_v55 = vmov 0   ;;  %vm694_vm1 = vmmov 0   ;;  %s889_s0 = inlined_call_operand.vmem [shape: bf16[34,128], index: 0, kind: input, shape index: {}]   ;;  %s890_s3 = inlined_call_operand.vmem [shape: bf16[128,384], index: 3, kind: input, shape index: {}]   ;;  %s891_s1 = inlined_call_operand.vmem [shape: f32[1,128], index: 1, kind: input, shape index: {}]   ;;  %s892_s2 = inlined_call_operand.vmem [shape: f32[1,128], index: 2, kind: input, shape index: {}]   ;;  %s893_s4 = inlined_call_operand.vmem [shape: f32[1,384], index: 4, kind: input, shape index: {}]   ;;  %s894_s5 = inlined_call_operand.vmem [shape: bf16[34,384], index: 5, kind: output, shape index: {}]  }
   0x1   :  { %v586_v0 = vld [vmem:[%s889_s0] sm:$0xff]   ;;  %v603_v1 = vld [vmem:[%s889_s0 + $0x8] sm:$0xff]   ;;  %v29_v4 = vld [vmem:[%s889_s0 + $0x10] sm:$0x1]  ;;  %616 = vmatprep.subr.bf16.mxu1 %v692_v32  ;;  %374 = vmatprep.mubr.bf16.mxu0 %v693_v55 }
   0x2   :  { %v587_v2 = vunpack.c.l.bf16 %v586_v0  ;;  %v591_v3 = vunpack.c.l.bf16 %v603_v1  ;;  %v588_v5 = vunpack.c.h.bf16 %v586_v0  ;;  %v592_v6 = vunpack.c.h.bf16 %v603_v1  ;;  %v647_v30 = vld [vmem:[%s890_s3 + $0x4] ss:$12 sps:$4 sm:$0xff]   ;;  %v649_v31 = vld [vmem:[%s890_s3] ss:$12 sps:$4 sm:$0xff]   ;;  %v650_v33 = vld [vmem:[%s890_s3 + $0x8] ss:$12 sps:$4 sm:$0xff]   ;;  %632 = vmatprep.mubr.msk.bf16.mxu1 %vm694_vm1, %v692_v32 }
   0x3   :  { %v34_v7 = vunpack.c.l.bf16 %v29_v4  ;;  %342 = vmatprep.subr.bf16.mxu0 %v647_v30  ;;  %617 = vmatpush3.bf16.msra.mxu1 %v650_v33  ;;  %v651_v34 = vld [vmem:[%s890_s3 + $0x1c] ss:$12 sps:$4 sm:$0xff]   ;;  %v653_v35 = vld [vmem:[%s890_s3 + $0x18] ss:$12 sps:$4 sm:$0xff]   ;;  %v654_v36 = vld [vmem:[%s890_s3 + $0x20] ss:$12 sps:$4 sm:$0xff]  }
   0x4   :  { %35 = vadd.xlane.f32.xlu0 %v587_v2  ;;  %39 = vadd.xlane.f32.xlu1 %v591_v3  ;;  %v655_v37 = vld [vmem:[%s890_s3 + $0x34] ss:$12 sps:$4 sm:$0xff]   ;;  %v657_v38 = vld [vmem:[%s890_s3 + $0x30] ss:$12 sps:$4 sm:$0xff]   ;;  %v658_v39 = vld [vmem:[%s890_s3 + $0x38] ss:$12 sps:$4 sm:$0xff]  }
   0x5   :  { %v44_v8 = vsel %vm43_vm0, %v34_v7, 0.0  ;;  %343 = vmatpush1.bf16.msra.mxu0 %v649_v31  ;;  %618 = vmatprep.subr.bf16.mxu1 %v692_v32  ;;  %v659_v40 = vld [vmem:[%s890_s3 + $0x4c] ss:$12 sps:$4 sm:$0xff]   ;;  %v661_v41 = vld [vmem:[%s890_s3 + $0x48] ss:$12 sps:$4 sm:$0xff]  }
   0x6   :  { %344 = vmatprep.subr.bf16.mxu0 %v651_v34  ;;  %v662_v42 = vld [vmem:[%s890_s3 + $0x50] ss:$12 sps:$4 sm:$0xff]   ;;  %v665_v44 = vld [vmem:[%s890_s3 + $0x60] ss:$12 sps:$4 sm:$0xff]   ;;  %v666_v45 = vld [vmem:[%s890_s3 + $0x68] ss:$12 sps:$4 sm:$0xff]  }
   0x7   :  { %619 = vmatpush3.bf16.msra.mxu1 %v654_v36  ;;  %v663_v43 = vld [vmem:[%s890_s3 + $0x64] ss:$12 sps:$4 sm:$0xff]   ;;  %v667_v46 = vld [vmem:[%s890_s3 + $0x7c] ss:$12 sps:$4 sm:$0xff]   ;;  %v670_v48 = vld [vmem:[%s890_s3 + $0x80] ss:$12 sps:$4 sm:$0xff]   ;;  %v183_v36 = vlaneseq }
   0x8   :  { %37 = vadd.xlane.f32.xlu0 %v588_v5  ;;  %41 = vadd.xlane.f32.xlu1 %v592_v6  ;;  %v669_v47 = vld [vmem:[%s890_s3 + $0x78] ss:$12 sps:$4 sm:$0xff]   ;;  %v671_v49 = vld [vmem:[%s890_s3 + $0x94] ss:$12 sps:$4 sm:$0xff]   ;;  %v673_v50 = vld [vmem:[%s890_s3 + $0x90] ss:$12 sps:$4 sm:$0xff]  }
   0x9   :  { %345 = vmatpush1.bf16.msra.mxu0 %v653_v35  ;;  %620 = vmatprep.subr.bf16.mxu1 %v692_v32  ;;  %v674_v51 = vld [vmem:[%s890_s3 + $0x98] ss:$12 sps:$4 sm:$0xff]   ;;  %v677_v53 = vld [vmem:[%s890_s3 + $0xa8] ss:$12 sps:$4 sm:$0xff]   ;;  %v678_v54 = vld [vmem:[%s890_s3 + $0xb0] ss:$12 sps:$4 sm:$0xff]  }
   0xa   :  { %346 = vmatprep.subr.bf16.mxu0 %v655_v37  ;;  %v675_v52 = vld [vmem:[%s890_s3 + $0xac] ss:$12 sps:$4 sm:$0xff]   ;;  %v184_v37 = vshrl.u32 %v183_v36, 7 }
   0xb   :  { %621 = vmatpush3.bf16.msra.mxu1 %v658_v39 }
   0xc   :  { %45 = vadd.xlane.f32.xlu0 %v44_v8  ;;  %622 = vmatprep.subr.bf16.mxu1 %v692_v32  ;;  %v193_v39 = vsub.s32 2, %v184_v37 }
   0xd   :  { %347 = vmatpush1.bf16.msra.mxu0 %v657_v38  ;;  %v185_v38 = vsub.s32 0, %v184_v37 }
   0xe   :  { %348 = vmatprep.subr.bf16.mxu0 %v659_v40  ;;  %v181_v40 = vld [vmem:[%s893_s4] sm:$0x7] }
   0xf   :  { %623 = vmatpush3.bf16.msra.mxu1 %v662_v42  ;;  %v186_v42 = vrot.slane %v181_v40, %v185_v38 }
  0x10   :  { %624 = vmatprep.subr.bf16.mxu1 %v692_v32 }
  0x11   :  { %349 = vmatpush1.bf16.msra.mxu0 %v661_v41  ;;  %v189_v41 = vsub.s32 1, %v184_v37 }
  0x12   :  { %350 = vmatprep.subr.bf16.mxu0 %v663_v43  ;;  %v194_v43 = vrot.slane %v181_v40, %v193_v39 }
  0x13   :  { %625 = vmatpush3.bf16.msra.mxu1 %v666_v45 }
  0x14   :  { %626 = vmatprep.subr.bf16.mxu1 %v692_v32 }
  0x15   :  { %351 = vmatpush1.bf16.msra.mxu0 %v665_v44  ;;  %v190_v44 = vrot.slane %v181_v40, %v189_v41 }
  0x16   :  { %352 = vmatprep.subr.bf16.mxu0 %v667_v46 }
  0x17   :  { %627 = vmatpush3.bf16.msra.mxu1 %v670_v48 }
  0x18   :  { %628 = vmatprep.subr.bf16.mxu1 %v692_v32 }
  0x19   :  { %353 = vmatpush1.bf16.msra.mxu0 %v669_v47 }
  0x1a   :  { %354 = vmatprep.subr.bf16.mxu0 %v671_v49 }
  0x1b   :  { %629 = vmatpush3.bf16.msra.mxu1 %v674_v51 }
  0x1c   :  { %630 = vmatprep.subr.bf16.mxu1 %v692_v32 }
  0x1d   :  { %355 = vmatpush1.bf16.msra.mxu0 %v673_v50 }
  0x1e   :  { %356 = vmatprep.subr.bf16.mxu0 %v675_v52 }
  0x1f   :  { %631 = vmatpush3.bf16.msra.mxu1 %v678_v54 }
  0x21   :  { %357 = vmatpush1.bf16.msra.mxu0 %v677_v53 }
  0x91   :  { %v36_v9 = vpop.xlane.xlu0 %35  ;;  %v40_v10 = vpop.xlane.xlu1 %39 }
  0x92   :  { %v48_v11 = vmul.f32 0.0078125, %v36_v9  ;;  %v50_v12 = vmul.f32 0.0078125, %v40_v10  ;;  %v526_v9 = vld [vmem:[%s891_s1] ss:$0 sm:$0xff] }
  0x94   :  { %v735_v13 = vsub.f32 %v587_v2, %v48_v11  ;;  %v737_v14 = vsub.f32 %v591_v3, %v50_v12 }
  0x95   :  { %v38_v15 = vpop.xlane.xlu0 %37  ;;  %v42_v16 = vpop.xlane.xlu1 %41 }
  0x96   :  { %v49_v17 = vmul.f32 0.0078125, %v38_v15  ;;  %v58_v18 = vmul.f32 %v735_v13, %v735_v13  ;;  %v51_v19 = vmul.f32 0.0078125, %v42_v16  ;;  %v60_v22 = vmul.f32 %v737_v14, %v737_v14 }
  0x98   :  { %v741_v20 = vsub.f32 %v588_v5, %v49_v17  ;;  %63 = vadd.xlane.f32.xlu1 %v58_v18  ;;  %v743_v21 = vsub.f32 %v592_v6, %v51_v19  ;;  %v527_v17 = vld [vmem:[%s892_s2] ss:$0 sm:$0xff] }
  0x99   :  { %v46_v23 = vpop.xlane.xlu0 %45 }
  0x9a   :  { %v52_v24 = vmul.f32 0.0078125, %v46_v23  ;;  %v59_v25 = vmul.f32 %v741_v20, %v741_v20  ;;  %v61_v27 = vmul.f32 %v743_v21, %v743_v21 }
  0x9c   :  { %v749_v26 = vsub.f32 %v34_v7, %v52_v24  ;;  %67 = vadd.xlane.f32.xlu1 %v60_v22  ;;  %65 = vadd.xlane.f32.xlu0 %v59_v25 }
  0x9e   :  { %v62_v28 = vmul.f32 %v749_v26, %v749_v26 }
  0xa0   :  { %69 = vadd.xlane.f32.xlu0 %v61_v27  ;;  %v71_v29 = vsel %vm43_vm0, %v62_v28, 0.0 }
  0xa1   :  { %72 = vadd.xlane.f32.xlu1 %v71_v29 }
 0x125   :  { %v64_v56 = vpop.xlane.xlu1 %63 }
 0x126   :  { %v74_v57 = vmul.f32 0.0078125, %v64_v56 }
 0x128   :  { %v79_v58 = vadd.f32 1e-05, %v74_v57 }
 0x129   :  { %v68_v59 = vpop.xlane.xlu1 %67  ;;  %v66_v60 = vpop.xlane.xlu0 %65 }
 0x12a   :  { %682 = vrsqrt.f32 %v79_v58  ;;  %v76_v61 = vmul.f32 0.0078125, %v68_v59  ;;  %v75_v62 = vmul.f32 0.0078125, %v66_v60 }
 0x12c   :  { %v81_v63 = vadd.f32 1e-05, %v76_v61  ;;  %v80_v0 = vadd.f32 1e-05, %v75_v62 }
 0x12d   :  { %v70_v1 = vpop.xlane.xlu0 %69 }
 0x12e   :  { %684 = vrsqrt.f32 %v81_v63  ;;  %v77_v2 = vmul.f32 0.0078125, %v70_v1  ;;  %v73_v3 = vpop.xlane.xlu1 %72 }
 0x12f   :  { %686 = vrsqrt.f32 %v80_v0  ;;  %v78_v4 = vmul.f32 0.0078125, %v73_v3 }
 0x130   :  { %v82_v5 = vadd.f32 1e-05, %v77_v2 }
 0x131   :  { %v83_v6 = vadd.f32 1e-05, %v78_v4 }
 0x132   :  { %688 = vrsqrt.f32 %v82_v5 }
 0x133   :  { %690 = vrsqrt.f32 %v83_v6 }
 0x134   :  { %v683_v7 = vpop.eup %682 }
 0x135   :  { %v89_v8 = vmul.f32 %v683_v7, %v735_v13 }
 0x137   :  { %v101_v15 = vmul.f32 %v526_v9, %v89_v8 }
 0x138   :  { %v685_v10 = vpop.eup %684 }
 0x139   :  { %v687_v11 = vpop.eup %686  ;;  %v91_v12 = vmul.f32 %v685_v10, %v737_v14  ;;  %v113_v24 = vadd.f32 %v527_v17, %v101_v15 }
 0x13a   :  { %v90_v16 = vmul.f32 %v687_v11, %v741_v20 }
 0x13b   :  { %v103_v23 = vmul.f32 %v526_v9, %v91_v12 }
 0x13c   :  { %v689_v18 = vpop.eup %688  ;;  %v102_v19 = vmul.f32 %v526_v9, %v90_v16 }
 0x13d   :  { %v691_v22 = vpop.eup %690  ;;  %v92_v13 = vmul.f32 %v689_v18, %v743_v21  ;;  %v115_v30 = vadd.f32 %v527_v17, %v103_v23 }
 0x13e   :  { %v114_v25 = vadd.f32 %v527_v17, %v102_v19  ;;  %v93_v27 = vmul.f32 %v691_v22, %v749_v26 }
 0x13f   :  { %v104_v28 = vmul.f32 %v526_v9, %v92_v13 }
 0x140   :  { %v596_v29 = vpack.c.bf16 %v114_v25, %v113_v24  ;;  %v105_v14 = vmul.f32 %v526_v9, %v93_v27 }
 0x141   :  { %v116_v31 = vadd.f32 %v527_v17, %v104_v28 }
 0x142   :  { %597 = vst [vmem:[#allocation2] sm:$0xff] %v596_v29   ;;  %v117_v20 = vadd.f32 %v527_v17, %v105_v14 }
 0x143   :  { %v601_v33 = vpack.c.bf16 %v116_v31, %v115_v30 }
 0x144   :  { %v574_v34 = vpack.c.bf16 %v117_v20, %v117_v20 }
 0x145   :  { %604 = vst [vmem:[#allocation2 + $0x8] sm:$0xff] %v601_v33  }
 0x146   :  { %143 = vst [vmem:[#allocation2 + $0x10] sm:$0x1] %v574_v34 }
 0x149   :  { %v679_v35 = vld [vmem:[#allocation2] sm:$0xff]  }
 0x14a   :  { %375 = vmatmul.mubr.bf16.vlgmr.msra.gmra.mrb[0].mxu0 %v679_v35  ;;  %633 = vmatmul.mubr.bf16.vlgmr.msra.gmra.mrb[0].mxu1 %v679_v35 }
 0x14b   :  { %384 = vmatprep.mubr.bf16.mxu0 %v693_v55  ;;  %636 = vmatprep.mubr.msk.bf16.mxu1 %vm694_vm1, %v692_v32 }
 0x14c   :  { %v680_v21 = vld [vmem:[#allocation2 + $0x8] sm:$0xff]  }
 0x14d   :  { %v681_v26 = vld [vmem:[#allocation2 + $0x10] ss:$0 sps:$4 sm:$0x11]  }
 0x152   :  { %385 = vmatmul.mubr.bf16.gmra.mrb[4].mxu0 %v680_v21  ;;  %637 = vmatmul.mubr.bf16.gmra.mrb[4].mxu1 %v680_v21 }
 0x153   :  { %394 = vmatprep.mubr.bf16.mxu0 %v693_v55  ;;  %640 = vmatprep.mubr.msk.bf16.mxu1 %vm694_vm1, %v692_v32 }
 0x15a   :  { %395 = vmatmul.mubr.bf16.gmra.mrb[8].mxu0 %v681_v26  ;;  %641 = vmatmul.mubr.bf16.gmra.mrb[8].mxu1 %v681_v26 }
 0x21d   :  { %v376_v45 = vpop.f32.mrb[0].mxu0  ;;  %v437_v46 = vpop.f32.mrb[0].mxu1 }
 0x21e   :  { %v377_v47 = vadd.f32 %v376_v45, %v186_v42  ;;  %v438_v48 = vadd.f32 %v437_v46, %v194_v43  ;;  %v378_v32 = vpop.f32.mrb[1].mxu0  ;;  %v634_v49 = vpop.f32.mrb[1].mxu1 }
 0x21f   :  { %v379_v50 = vadd.f32 %v378_v32, %v190_v44  ;;  %v380_v51 = vpop.f32.mrb[2].mxu0  ;;  %v440_v52 = vpop.f32.mrb[2].mxu1 }
 0x220   :  { %v576_v53 = vpack.c.bf16 %v438_v48, %v438_v48  ;;  %v381_v54 = vadd.f32 %v380_v51, %v186_v42  ;;  %v441_v55 = vadd.f32 %v440_v52, %v194_v43  ;;  %v382_v56 = vpop.f32.mrb[3].mxu0  ;;  %v635_v57 = vpop.f32.mrb[3].mxu1 }
 0x221   :  { %v575_v58 = vpack.c.bf16 %v379_v50, %v377_v47  ;;  %v383_v59 = vadd.f32 %v382_v56, %v190_v44 }
 0x222   :  { %513 = vst [vmem:[%s894_s5 + $0x8] sm:$0xf] %v576_v53  ;;  %v578_v60 = vpack.c.bf16 %v441_v55, %v441_v55 }
 0x223   :  { %512 = vst [vmem:[%s894_s5] sm:$0xff] %v575_v58  ;;  %v577_v61 = vpack.c.bf16 %v383_v59, %v381_v54 }
 0x224   :  { %515 = vst [vmem:[%s894_s5 + $0x14] sm:$0xf] %v578_v60 }
 0x225   :  { %514 = vst [vmem:[%s894_s5 + $0xc] sm:$0xff] %v577_v61  ;;  %v386_v62 = vpop.f32.mrb[4].mxu0  ;;  %v445_v63 = vpop.f32.mrb[4].mxu1 }
 0x226   :  { %v387_v0 = vadd.f32 %v386_v62, %v186_v42  ;;  %v446_v1 = vadd.f32 %v445_v63, %v194_v43  ;;  %v388_v2 = vpop.f32.mrb[5].mxu0  ;;  %v638_v3 = vpop.f32.mrb[5].mxu1 }
 0x227   :  { %v389_v4 = vadd.f32 %v388_v2, %v190_v44  ;;  %v390_v5 = vpop.f32.mrb[6].mxu0  ;;  %v448_v6 = vpop.f32.mrb[6].mxu1 }
 0x228   :  { %v580_v7 = vpack.c.bf16 %v446_v1, %v446_v1  ;;  %v391_v8 = vadd.f32 %v390_v5, %v186_v42  ;;  %v449_v9 = vadd.f32 %v448_v6, %v194_v43  ;;  %v392_v10 = vpop.f32.mrb[7].mxu0  ;;  %v639_v11 = vpop.f32.mrb[7].mxu1 }
 0x229   :  { %v579_v12 = vpack.c.bf16 %v389_v4, %v387_v0  ;;  %v393_v15 = vadd.f32 %v392_v10, %v190_v44 }
 0x22a   :  { %517 = vst [vmem:[%s894_s5 + $0x20] sm:$0xf] %v580_v7  ;;  %v582_v16 = vpack.c.bf16 %v449_v9, %v449_v9 }
 0x22b   :  { %516 = vst [vmem:[%s894_s5 + $0x18] sm:$0xff] %v579_v12  ;;  %v581_v17 = vpack.c.bf16 %v393_v15, %v391_v8 }
 0x22c   :  { %519 = vst [vmem:[%s894_s5 + $0x2c] sm:$0xf] %v582_v16 }
 0x22d   :  { %518 = vst [vmem:[%s894_s5 + $0x24] sm:$0xff] %v581_v17  ;;  %v396_v18 = vpop.f32.mrb[8].mxu0  ;;  %v453_v19 = vpop.f32.mrb[8].mxu1 }
 0x22e   :  { %v397_v22 = vadd.f32 %v396_v18, %v186_v42  ;;  %v454_v23 = vadd.f32 %v453_v19, %v194_v43  ;;  %v398_v13 = vpop.f32.mrb[9].mxu0  ;;  %v642_v24 = vpop.f32.mrb[9].mxu1 }
 0x22f   :  { %v399_v25 = vadd.f32 %v398_v13, %v190_v44  ;;  %v400_v27 = vpop.f32.mrb[10].mxu0  ;;  %v456_v28 = vpop.f32.mrb[10].mxu1 }
 0x230   :  { %v584_v29 = vpack.c.bf16 %v454_v23, %v454_v23  ;;  %v401_v14 = vpop.f32.mrb[11].mxu0  ;;  %v643_v30 = vpop.f32.mrb[11].mxu1 }
 0x231   :  { %v583_v31 = vpack.c.bf16 %v399_v25, %v397_v22 }
 0x232   :  { %521 = vst [vmem:[%s894_s5 + $0x38] sm:$0x1] %v584_v29 }
 0x233   :  { %520 = vst [vmem:[%s894_s5 + $0x30] sm:$0x11] %v583_v31 }

// kernel: clip_forward.16
= control target key start
LH: loop header
LB: loop body
LE: loop exit
PB: predicated region body
PF: predicated region fallthrough
CT: control target
= control target key end

     0   :  { %s1214_s12 = smov 0   ;;  %s1216_s13 = smov 0   ;;  %s1392_s0 = inlined_call_operand.vmem [shape: bf16[2,17,384], index: 0, kind: input, shape index: {}, may-alias: {0,1,2}]   ;;  %s1393_s1 = inlined_call_operand.vmem [shape: bf16[2,17,384], index: 1, kind: input, shape index: {}, may-alias: {0,1,2}]   ;;  %s1394_s2 = inlined_call_operand.vmem [shape: bf16[2,17,384], index: 2, kind: input, shape index: {}, may-alias: {0,1,2}]   ;;  %s1395_s3 = inlined_call_operand.vmem [shape: bf16[2,17,128], index: 3, kind: output, shape index: {}]  }
   0x1   :  { %s1218_s14 = smov 0   ;;  %s1220_s15 = smov 0  }
   0x2   :  { %s1222_s16 = smov 0  }
   0x3 LB: > { %s25_s17 = sadd.s32 1, %s1186_s15  ;;  %p41_p1 = scmp.ne.s32.totalorder %s1178_s13, %s1174_s12  ;;  %s1190_s16 = sphi %s1222_s16, %s13_s16   ;;  %s1186_s15 = sphi %s1220_s15, %s1400_s15   ;;  %s1182_s14 = sphi %s1218_s14, %s1399_s14   ;;  %s1178_s13 = sphi %s1216_s13, %s1398_s13   ;;  %s1174_s12 = sphi %s1214_s12, %s1397_s12  }
   0x4   : > { %p27_p0 = scmp.ge.s32.totalorder %s25_s17, 2  ;;  %p42_p2 = scmp.eq.s32.totalorder %s1190_s16, 0 }
   0x5   : > { %s34_s20 = sadd.s32 1, %s1178_s13  ;;  %p970_p5 = scmp.ge.s32.totalorder %s1190_s16, 2 }
   0x6   : > { %s1402_s17 = smov (%p27_p0, %s25_s17), 0  ;;  %p1245_p3 = por %p42_p2, %p41_p1 }
   0x7   : > { %s29_s19 = ssub.s32 %s1186_s15, %s1402_s17  ;;  %155 = sbr.rel (%p970_p5) target bundleno = 35 (0x23), region = 16 }
   0x8   : > { %p32_p4 = scmp.eq.s32.totalorder %s29_s19, 0 }
   0xa   : > { %s1253_s21 = scalar_select %p32_p4, %s1178_s13, %s34_s20  }
   0xe   : > { %158 = sbr.rel (!%p1245_p3) target bundleno = 21 (0x15), region = 20  ;;  %s160_s22 = sand.u32 (%p1245_p3), 1, %s1178_s13  }
   0xf   : > { %s1073_s23 = smul.u32 (%p1245_p3), 36, %s1186_s15 }
  0x10   : > { %s1072_s24 = smul.u32 (%p1245_p3), 12, %s160_s22 }
  0x11   : > { %s166_s27 = scalar_lea.vmem (%p1245_p3), %s1392_s0, %s1073_s23 }
  0x12   : > { %v182_v0 = vld [vmem:[%s166_s27] sm:$0xf] (%p1245_p3)  ;;  %v184_v1 = vld [vmem:[%s166_s27 + $0xc] sm:$0xf] (%p1245_p3)  ;;  %s162_s28 = scalar_lea.vmem (%p1245_p3), [#allocation2], %s1072_s24 }
  0x13   : > { %183 = vst [vmem:[%s162_s28] sm:$0xf] (%p1245_p3), %v182_v0  ;;  %185 = vst [vmem:[%s162_s28 + $0x4] sm:$0xf] (%p1245_p3), %v184_v1  ;;  %v186_v2 = vld [vmem:[%s166_s27 + $0x18] sm:$0xf] (%p1245_p3) }
  0x14   : > { %187 = vst [vmem:[%s162_s28 + $0x8] sm:$0xf] (%p1245_p3), %v186_v2 }
  0x15 PF: > { %216 = sbr.rel (!%p1245_p3) target bundleno = 28 (0x1c), region = 61  ;;  %s218_s29 = sand.u32 (%p1245_p3), 1, %s1178_s13  }
  0x16   : > { %s972_s30 = smul.u32 (%p1245_p3), 36, %s1186_s15 }
  0x17   : > { %s1074_s4 = smul.u32 (%p1245_p3), 12, %s218_s29 }
  0x18   : > { %s878_s7 = scalar_lea.vmem (%p1245_p3), %s1393_s1, %s972_s30 }
  0x19   : > { %v973_v3 = vld [vmem:[%s878_s7 + $0x4] sm:$0xf] (%p1245_p3)  ;;  %v974_v4 = vld [vmem:[%s878_s7 + $0x10] sm:$0xf] (%p1245_p3)  ;;  %s220_s8 = scalar_lea.vmem (%p1245_p3), [#allocation3], %s1074_s4 }
  0x1a   : > { %242 = vst [vmem:[%s220_s8] sm:$0xf] (%p1245_p3), %v973_v3  ;;  %244 = vst [vmem:[%s220_s8 + $0x4] sm:$0xf] (%p1245_p3), %v974_v4  ;;  %v975_v5 = vld [vmem:[%s878_s7 + $0x1c] sm:$0xf] (%p1245_p3) }
  0x1b   : > { %246 = vst [vmem:[%s220_s8 + $0x8] sm:$0xf] (%p1245_p3), %v975_v5 }
  0x1c PF: > { %275 = sbr.rel (!%p1245_p3) target bundleno = 35 (0x23), region = 102  ;;  %s277_s9 = sand.u32 (%p1245_p3), 1, %s1178_s13  }
  0x1d   : > { %s976_s10 = smul.u32 (%p1245_p3), 36, %s1186_s15 }
  0x1e   : > { %s1075_s11 = smul.u32 (%p1245_p3), 12, %s277_s9 }
  0x1f   : > { %s885_s22 = scalar_lea.vmem (%p1245_p3), %s1394_s2, %s976_s10 }
  0x20   : > { %v977_v6 = vld [vmem:[%s885_s22 + $0x8] sm:$0xf] (%p1245_p3)  ;;  %v978_v7 = vld [vmem:[%s885_s22 + $0x14] sm:$0xf] (%p1245_p3)  ;;  %s279_s23 = scalar_lea.vmem (%p1245_p3), [#allocation4], %s1075_s11 }
  0x21   : > { %301 = vst [vmem:[%s279_s23] sm:$0xf] (%p1245_p3), %v977_v6  ;;  %303 = vst [vmem:[%s279_s23 + $0x4] sm:$0xf] (%p1245_p3), %v978_v7  ;;  %v979_v8 = vld [vmem:[%s885_s22 + $0x20] sm:$0xf] (%p1245_p3) }
  0x22   : > { %305 = vst [vmem:[%s279_s23 + $0x8] sm:$0xf] (%p1245_p3), %v979_v8 }
  0x23 PF: > { %p980_p6 = scmp.ge.s32.totalorder %s1190_s16, 1  ;;  %p333_p7 = scmp.lt.s32.totalorder %s1190_s16, 3 }
  0x25   : > { %p334_p8 = pnand %p980_p6, %p333_p7 }
  0x26   : > { %s340_s18 = sand.u32 (!%p334_p8), 1, %s1174_s12   ;;  %vm424_vm0 = vcmask (!%p334_p8), 523264   ;;  %vm492_vm1 = vcmask (!%p334_p8), 131072   ;;  %vm485_vm2 = vcmask (!%p334_p8), 138240   ;;  %s1192_s12 = smov (!%p334_p8), 64   ;;  %vm531_vm3 = vcmask (!%p334_p8), 1040384  }
  0x27   : > { %337 = sbr.rel (%p334_p8) target bundleno = 1168 (0x490), region = 143  ;;  %v1193_v38 = vmov (!%p334_p8), 0   ;;  %p390_p9 = scmp.lt.s32.totalorder (!%p334_p8), %s1182_s14, 1  ;;  %vm607_vm4 = vcmask (!%p334_p8), 516096   ;;  %vm608_vm5 = vsmask.f32 (!%p334_p8), 256 }
  0x28   : > { %s1280_s24 = smul.u32 (!%p334_p8), 12, %s340_s18  ;;  %v1311_v39 = vsel (!%p334_p8), %vm531_vm3, 65535, %v1193_v38  ;;  %vm609_vm6 = vmand (!%p334_p8), %vm607_vm4, %vm608_vm5  ;;  %vm604_vm7 = vcmask (!%p334_p8), 519168   ;;  %vm835_vm8 = vcmask (!%p334_p8), 1040896   ;;  %vm832_vm10 = vcmask (!%p334_p8), 1043968  }
  0x29   : > { %vm836_vm9 = vmand (!%p334_p8), %vm835_vm8, %vm608_vm5 }
  0x2a   : > { %s1283_s25 = scalar_lea.vmem (!%p334_p8), [#allocation3], %s1280_s24  ;;  %s1288_s26 = scalar_lea.vmem (!%p334_p8), [#allocation2], %s1280_s24 }
  0x2b   : > { %v1120_v9 = vld [vmem:[%s1283_s25] sm:$0xff] (!%p334_p8)   ;;  %v1121_v10 = vld [vmem:[%s1283_s25 + $0x8] ss:$0 sps:$4 sm:$0x11] (!%p334_p8)   ;;  %v401_v15 = vld [vmem:[%s1288_s26 + $0x8] sm:$0x1] (!%p334_p8) }
  0x2c   : > { %v1013_v11 = vld [vmem:[%s1288_s26] sm:$0xff] (!%p334_p8)   ;;  %1068 = vmatprep.subr.msk.bf16.mxu0 (!%p334_p8), %vm424_vm0, %v1120_v9  ;;  %v432_v12 = vsel (!%p334_p8), %vm424_vm0, %v1120_v9, 0  ;;  %v404_v19 = vunpack.c.l.bf16 (!%p334_p8), %v401_v15  ;;  %v435_v20 = vsel (!%p334_p8), %vm424_vm0, %v1121_v10, 0  ;;  %v615_v30 = vld [vmem:[%s1288_s26 + $0x8] sm:$0x1] (!%p334_p8)  ;;  %v1122_v31 = vld [vmem:[%s1283_s25] sm:$0xff] (!%p334_p8)  }
  0x2d   : > { %v1014_v13 = vunpack.c.l.bf16 (!%p334_p8), %v1013_v11  ;;  %v1015_v14 = vunpack.c.h.bf16 (!%p334_p8), %v1013_v11  ;;  %1037 = vmatpush3.bf16.xpose.msra.mxu0 (!%p334_p8), %v432_v12  ;;  %v618_v32 = vunpack.c.l.bf16 (!%p334_p8), %v615_v30  ;;  %v1123_v34 = vld [vmem:[%s1283_s25 + $0x8] ss:$0 sps:$4 sm:$0x11] (!%p334_p8)   ;;  %s1307_s27 = scalar_lea.vmem (!%p334_p8), [#allocation4], %s1280_s24 }
  0x2e   : > { %1069 = vmatprep.subr.msk.bf16.mxu0 %vm424_vm0, %v1121_v10  ;;  %v407_v21 = vmul.f32 0.125, %v404_v19  ;;  %v1124_v36 = vld [vmem:[%s1307_s27] sm:$0xff]   ;;  %v1125_v37 = vld [vmem:[%s1307_s27 + $0x8] ss:$0 sps:$4 sm:$0x11]   ;;  %s1404_s14 = smov (!%p390_p9, %s1182_s14), 1 }
  0x2f   : > { %v405_v16 = vmul.f32 0.125, %v1014_v13  ;;  %v406_v17 = vmul.f32 0.125, %v1015_v14  ;;  %v621_v33 = vmul.f32 0.125, %v618_v32  ;;  %1044 = vmatprep.subr.bf16.mxu1 %v1124_v36  ;;  %v535_v40 = vand.u32 %v1125_v37, %v1311_v39  ;;  %v1127_v8 = vld [vmem:[%s1307_s27 + $0x8] ss:$0 sps:$4 sm:$0x11]  }
  0x30   : > { %v409_v22 = vpack.c.bf16 %v407_v21, %v407_v21  ;;  %1045 = vmatpush3.bf16.msra.mxu1 %v1124_v36  ;;  %v1126_v9 = vld [vmem:[%s1307_s27] sm:$0xff]   ;;  %s1077_s28 = smul.u32 12, %s1404_s14 }
  0x31   : > { %v408_v18 = vpack.c.bf16 %v406_v17, %v405_v16  ;;  %v623_v35 = vpack.c.bf16 %v621_v33, %v621_v33  ;;  %1046 = vmatprep.subr.bf16.mxu1 %v535_v40 }
  0x32   : > { %s1359_s4 = scalar_lea.vmem %s1395_s3, %s1077_s28 }
  0x33   : > { %1040 = vmatprep.mubr.msk.bf16.mxu0 %vm424_vm0, %v408_v18 }
  0x34   : > { %1047 = vmatpush3.bf16.msra.mxu1 %v535_v40 }
  0x35   : > { %1039 = vmatpush3.bf16.xpose.msra.mxu0 %v435_v20 }
  0x3c   : > { %1041 = vmatmul.mubr.msk.bf16.vlgmr.msra.gmra.mrb[0].mxu0 %vm424_vm0, %v409_v22 }
 0x10f   : > { %v1042_v23 = vpop.f32.mrb[0].mxu0 }
 0x110   : > { %v471_v24 = vpop.f32.mrb[1].mxu0  ;;  %v493_v25 = vsel %vm492_vm1, %v1042_v23, -inf }
 0x111   : > { %494 = vmax.xlane.f32.xlu1 %v493_v25  ;;  %v1043_v26 = vpop.f32.mrb[2].mxu0  ;;  %v486_v27 = vsel %vm485_vm2, %v471_v24, -inf }
 0x112   : > { %487 = vmax.xlane.f32.xlu0 %v486_v27  ;;  %v474_v28 = vpop.f32.mrb[3].mxu0 }
 0x113   : > { %v489_v29 = vsel %vm485_vm2, %v474_v28, -inf }
 0x116   : > { %490 = vmax.xlane.f32.xlu0 %v489_v29 }
 0x122   : > { %644 = vrot.lane.b32.xlu1 %v1122_v31, %s1192_s12 }
 0x126   : > { %632 = vrot.lane.b32.xlu1 %v408_v18, %s1192_s12 }
 0x12a   : > { %634 = vrot.lane.b32.xlu1 %v623_v35, %s1192_s12 }
 0x12c   : > { %646 = vrot.lane.b32.xlu0 %v1123_v34, %s1192_s12 }
 0x19e   : > { %v495_v41 = vpop.xlane.xlu1 %494 }
 0x19f   : > { %v498_v42 = vsub.f32 %v1042_v23, %v495_v41  ;;  %v488_v43 = vpop.xlane.xlu0 %487  ;;  %v610_v41 = vld [vmem:[%s1359_s4 + $0x8] sm:$0x1] }
 0x1a0   : > { %v496_v44 = vsub.f32 %v471_v24, %v488_v43 }
 0x1a1   : > { %v503_v45 = vmul.f32 1.442695, %v498_v42 }
 0x1a2   : > { %v645_v46 = vpop.permute.xlu1 %644  ;;  %v499_v47 = vmul.f32 1.442695, %v496_v44 }
 0x1a3   : > { %v491_v48 = vpop.xlane.xlu0 %490  ;;  %1070 = vmatprep.subr.msk.bf16.mxu1 %vm424_vm0, %v645_v46  ;;  %1128 = vpow2.f32 %v503_v45  ;;  %v655_v55 = vsel %vm424_vm0, %v645_v46, 0 }
 0x1a4   : > { %v497_v49 = vsub.f32 %v474_v28, %v491_v48  ;;  %1130 = vpow2.f32 %v499_v47 }
 0x1a6   : > { %v501_v50 = vmul.f32 1.442695, %v497_v49  ;;  %v633_v57 = vpop.permute.xlu1 %632 }
 0x1a7   : > { %v647_v58 = vpop.permute.xlu0 %646 }
 0x1a8   : > { %1132 = vpow2.f32 %v501_v50  ;;  %v658_v59 = vsel %vm424_vm0, %v647_v58, 0 }
 0x1aa   : > { %v635_v60 = vpop.permute.xlu1 %634 }
 0x1ad   : > { %v1129_v51 = vpop.eup %1128 }
 0x1ae   : > { %v1317_v52 = vpop.eup %1130  ;;  %v515_v56 = vpack.c.bf16 %v1129_v51, %v1129_v51  ;;  %v511_v27 = vsel %vm492_vm1, %v1129_v51, 0.0 }
 0x1af   : > { %v505_v32 = vsel %vm485_vm2, %v1317_v52, 0.0 }
 0x1b2   : > { %v1319_v53 = vpop.eup %1132 }
 0x1b3   : > { %v514_v54 = vpack.c.bf16 %v1319_v53, %v1317_v52  ;;  %v508_v31 = vsel %vm485_vm2, %v1319_v53, 0.0 }
 0x1b5   : > { %1048 = vmatprep.mubr.msk.bf16.mxu1 %vm485_vm2, %v514_v54 }
 0x1b6   : > { %1049 = vmatmul.mubr.msk.bf16.vlgmr.msra.gmra.mrb[0].mxu1 %vm485_vm2, %v515_v56 }
 0x1b7   : > { %1053 = vmatpush3.bf16.xpose.msra.mxu1 %v655_v55  ;;  %1056 = vmatprep.mubr.msk.bf16.mxu1 %vm424_vm0, %v633_v57 }
 0x1b8   : > { %1071 = vmatprep.subr.msk.bf16.mxu1 %vm424_vm0, %v647_v58 }
 0x1bf   : > { %1055 = vmatpush3.bf16.xpose.msra.mxu1 %v658_v59 }
 0x1c6   : > { %1057 = vmatmul.mubr.msk.bf16.vlgmr.msra.gmra.mrb[4].mxu1 %vm424_vm0, %v635_v60 }
 0x289   : > { %v1330_v61 = vpop.f32.mrb[0].mxu1 }
 0x28a   : > { %v1332_v62 = vpop.f32.mrb[1].mxu1 }
 0x28b   : > { %v1051_v63 = vpop.f32.mrb[2].mxu1 }
 0x28c   : > { %v1334_v0 = vpop.f32.mrb[3].mxu1 }
 0x299   : > { %v1058_v1 = vpop.f32.mrb[4].mxu1 }
 0x29a   : > { %v694_v2 = vpop.f32.mrb[5].mxu1  ;;  %v714_v3 = vsel %vm492_vm1, %v1058_v1, -inf }
 0x29b   : > { %715 = vmax.xlane.f32.xlu0 %v714_v3  ;;  %v1059_v4 = vpop.f32.mrb[6].mxu1  ;;  %v708_v5 = vsel %vm485_vm2, %v694_v2, -inf }
 0x29c   : > { %709 = vmax.xlane.f32.xlu1 %v708_v5  ;;  %v697_v6 = vpop.f32.mrb[7].mxu1 }
 0x29d   : > { %v711_v7 = vsel %vm485_vm2, %v697_v6, -inf }
 0x29f   : > { %712 = vmax.xlane.f32.xlu0 %v711_v7 }
 0x2ad   : > { %747 = vrot.lane.b32.xlu1 %v1127_v8, %s1192_s12 }
 0x2b5   : > { %745 = vrot.lane.b32.xlu0 %v1126_v9, %s1192_s12 }
 0x328   : > { %v716_v10 = vpop.xlane.xlu0 %715 }
 0x329   : > { %v719_v11 = vsub.f32 %v1058_v1, %v716_v10  ;;  %v710_v12 = vpop.xlane.xlu1 %709 }
 0x32a   : > { %v717_v13 = vsub.f32 %v694_v2, %v710_v12 }
 0x32b   : > { %v724_v14 = vmul.f32 1.442695, %v719_v11 }
 0x32c   : > { %v720_v15 = vmul.f32 1.442695, %v717_v13  ;;  %v713_v16 = vpop.xlane.xlu0 %712 }
 0x32d   : > { %1134 = vpow2.f32 %v724_v14  ;;  %v718_v17 = vsub.f32 %v697_v6, %v713_v16  ;;  %v748_v18 = vpop.permute.xlu1 %747 }
 0x32e   : > { %1136 = vpow2.f32 %v720_v15  ;;  %v757_v20 = vand.u32 %v748_v18, %v1311_v39 }
 0x32f   : > { %v722_v19 = vmul.f32 1.442695, %v718_v17 }
 0x330   : > { %v746_v21 = vpop.permute.xlu0 %745 }
 0x331   : > { %1138 = vpow2.f32 %v722_v19  ;;  %1060 = vmatprep.subr.bf16.mxu0 %v746_v21 }
 0x332   : > { %1061 = vmatpush3.bf16.msra.mxu0 %v746_v21 }
 0x333   : > { %1062 = vmatprep.subr.bf16.mxu0 %v757_v20 }
 0x336   : > { %1063 = vmatpush3.bf16.msra.mxu0 %v757_v20 }
 0x337   : > { %v1135_v22 = vpop.eup %1134 }
 0x338   : > { %v1137_v23 = vpop.eup %1136  ;;  %v732_v24 = vsel %vm492_vm1, %v1135_v22, 0.0  ;;  %v736_v30 = vpack.c.bf16 %v1135_v22, %v1135_v22 }
 0x339   : > { %733 = vadd.xlane.f32.xlu1 %v732_v24  ;;  %v726_v25 = vsel %vm485_vm2, %v1137_v23, 0.0 }
 0x33a   : > { %727 = vadd.xlane.f32.xlu0 %v726_v25 }
 0x33b   : > { %v1139_v26 = vpop.eup %1138 }
 0x33c   : > { %v735_v28 = vpack.c.bf16 %v1139_v26, %v1137_v23  ;;  %v729_v29 = vsel %vm485_vm2, %v1139_v26, 0.0 }
 0x33d   : > { %512 = vadd.xlane.f32.xlu1 %v511_v27 }
 0x33e   : > { %1064 = vmatprep.mubr.msk.bf16.mxu0 %vm485_vm2, %v735_v28  ;;  %730 = vadd.xlane.f32.xlu0 %v729_v29 }
 0x33f   : > { %1065 = vmatmul.mubr.msk.bf16.vlgmr.msra.gmra.mrb[4].mxu0 %vm485_vm2, %v736_v30 }
 0x341   : > { %509 = vadd.xlane.f32.xlu1 %v508_v31 }
 0x342   : > { %506 = vadd.xlane.f32.xlu0 %v505_v32 }
 0x3c6   : > { %v734_v33 = vpop.xlane.xlu1 %733 }
 0x3c7   : > { %v728_v34 = vpop.xlane.xlu0 %727 }
 0x3ca   : > { %v513_v35 = vpop.xlane.xlu1 %512 }
 0x3cb   : > { %1140 = vrcp.f32 %v513_v35  ;;  %v731_v36 = vpop.xlane.xlu0 %730 }
 0x3ce   : > { %v510_v37 = vpop.xlane.xlu1 %509 }
 0x3cf   : > { %1142 = vrcp.f32 %v510_v37  ;;  %v507_v38 = vpop.xlane.xlu0 %506 }
 0x3d0   : > { %1144 = vrcp.f32 %v507_v38 }
 0x3d1   : > { %1146 = vrcp.f32 %v734_v33 }
 0x3d2   : > { %1148 = vrcp.f32 %v728_v34 }
 0x3d3   : > { %1150 = vrcp.f32 %v731_v36 }
 0x3d5   : > { %v1141_v39 = vpop.eup %1140 }
 0x3d6   : > { %v590_v40 = vmul.f32 %v1141_v39, %v1330_v61 }
 0x3d8   : > { %v1008_v42 = vpack.c.bf16 %v590_v40, %v590_v40 }
 0x3d9   : > { %v1143_v43 = vpop.eup %1142 }
 0x3da   : > { %v1145_v44 = vpop.eup %1144  ;;  %v589_v45 = vmul.f32 %v1143_v43, %v1334_v0  ;;  %v611_v46 = vsel %vm609_vm6, %v1008_v42, %v610_v41 }
 0x3db   : > { %v588_v47 = vmul.f32 %v1145_v44, %v1332_v62  ;;  %612 = vst [vmem:[%s1359_s4 + $0x8] sm:$0x1] %v611_v46  ;;  %v1147_v50 = vpop.eup %1146 }
 0x3dc   : > { %v1007_v48 = vpack.c.bf16 %v589_v45, %v589_v45  ;;  %v1149_v52 = vpop.eup %1148 }
 0x3dd   : > { %v1006_v49 = vpack.c.bf16 %v588_v47, %v588_v47  ;;  %v1151_v57 = vpop.eup %1150 }
 0x3de   : > { %606 = vst.msk [vmem:[%s1359_s4 + $0x4] sm:$0xf] %vm604_vm7, %v1007_v48 }
 0x3df   : > { %605 = vst.msk [vmem:[%s1359_s4] sm:$0xf] %vm604_vm7, %v1006_v49 }
 0x3e2   : > { %v837_v63 = vld [vmem:[%s1359_s4 + $0x8] sm:$0x1] }
 0x412   : > { %v1066_v51 = vpop.f32.mrb[4].mxu0 }
 0x413   : > { %v812_v53 = vmul.f32 %v1147_v50, %v1066_v51  ;;  %v793_v54 = vpop.f32.mrb[5].mxu0 }
 0x414   : > { %v810_v55 = vmul.f32 %v1149_v52, %v793_v54  ;;  %v1067_v56 = vpop.f32.mrb[6].mxu0 }
 0x415   : > { %v1011_v58 = vpack.c.bf16 %v812_v53, %v812_v53  ;;  %v796_v59 = vpop.f32.mrb[7].mxu0 }
 0x416   : > { %v1009_v60 = vpack.c.bf16 %v810_v55, %v810_v55  ;;  %v811_v61 = vmul.f32 %v1151_v57, %v796_v59 }
 0x417   : > { %827 = vrot.lane.b32.xlu0 %v1011_v58, %s1192_s12 }
 0x418   : > { %823 = vrot.lane.b32.xlu1 %v1009_v60, %s1192_s12  ;;  %v1010_v62 = vpack.c.bf16 %v811_v61, %v811_v61 }
 0x41c   : > { %825 = vrot.lane.b32.xlu1 %v1010_v62, %s1192_s12 }
 0x489   : > { %v828_v0 = vpop.permute.xlu0 %827 }
 0x48a   : > { %v838_v1 = vsel %vm836_vm9, %v828_v0, %v837_v63  ;;  %v824_v2 = vpop.permute.xlu1 %823 }
 0x48b   : > { %839 = vst [vmem:[%s1359_s4 + $0x8] sm:$0x1] %v838_v1  ;;  %833 = vst.msk [vmem:[%s1359_s4] sm:$0xf] %vm832_vm10, %v824_v2 }
 0x48e   : > { %v826_v3 = vpop.permute.xlu1 %825 }
 0x48f   : > { %834 = vst.msk [vmem:[%s1359_s4 + $0x4] sm:$0xf] %vm832_vm10, %v826_v3 }
 0x490 PF: > { %s13_s16 = sadd.s32 1, %s1190_s16   ;;  %s1397_s12 = smov %s1178_s13 }
 0x491   : > { %p10_p10 = scmp.ge.s32.totalorder %s13_s16, 4   ;;  %s1398_s13 = smov %s1253_s21 }
 0x492   : > { %s1399_s14 = smov %s1186_s15  ;;  %s1400_s15 = smov %s1402_s17 }
 0x493   :  { %12 = sbr.rel (!%p10_p10) target bundleno = 3 (0x3), region = 206 }

// kernel: clip_forward.17
= control target key start
LH: loop header
LB: loop body
LE: loop exit
PB: predicated region body
PF: predicated region fallthrough
CT: control target
= control target key end

     0   :  { %v358_v0 = vmov 0.0   ;;  %vm359_vm0 = vmmov 0   ;;  %s442_s1 = inlined_call_operand.vmem [shape: bf16[128,128], index: 1, kind: input, shape index: {}]   ;;  %s443_s0 = inlined_call_operand.vmem [shape: bf16[34,128], index: 0, kind: input, shape index: {}]   ;;  %s444_s3 = inlined_call_operand.vmem [shape: bf16[34,128], index: 3, kind: input, shape index: {}]   ;;  %s445_s2 = inlined_call_operand.vmem [shape: f32[1,128], index: 2, kind: input, shape index: {}]   ;;  %s446_s4 = inlined_call_operand.vmem [shape: bf16[34,128], index: 4, kind: output, shape index: {}]  }
   0x1   :  { %329 = vmatprep.subr.bf16.mxu1 %v358_v0  ;;  %26 = vst [vmem:[#allocation2 + $0x20] sm:$0x3] %v358_v0  ;;  %v347_v1 = vld [vmem:[%s442_s1] sm:$0xff]   ;;  %301 = vmatprep.subr.bf16.mxu0 %v358_v0  ;;  %v348_v2 = vld [vmem:[%s442_s1 + $0x8] sm:$0xff]   ;;  %v349_v3 = vld [vmem:[%s442_s1 + $0x10] sm:$0xff]  }
   0x2   :  { %321 = vmatprep.mubr.msk.bf16.mxu1 %vm359_vm0, %v358_v0  ;;  %317 = vmatprep.mubr.msk.bf16.mxu0 %vm359_vm0, %v358_v0  ;;  %v350_v4 = vld [vmem:[%s442_s1 + $0x18] sm:$0xff]   ;;  %v351_v5 = vld [vmem:[%s442_s1 + $0x20] sm:$0xff]   ;;  %v352_v6 = vld [vmem:[%s442_s1 + $0x28] sm:$0xff]  }
   0x3   :  { %337 = vmatpush3.bf16.msra.mxu1 %v347_v1  ;;  %302 = vmatpush3.bf16.msra.mxu0 %v347_v1  ;;  %v353_v7 = vld [vmem:[%s442_s1 + $0x30] sm:$0xff]   ;;  %v354_v8 = vld [vmem:[%s442_s1 + $0x38] sm:$0xff]   ;;  %v355_v9 = vld [vmem:[%s443_s0 + $0x8] sm:$0xff]  }
   0x4   :  { %330 = vmatprep.subr.bf16.mxu1 %v358_v0  ;;  %303 = vmatprep.subr.bf16.mxu0 %v358_v0  ;;  %v356_v10 = vld [vmem:[%s443_s0] sm:$0xff]   ;;  %v357_v11 = vld [vmem:[%s443_s0 + $0x10] ss:$0 sps:$4 sm:$0x11]   ;;  %v288_v13 = vld [vmem:[%s444_s3 + $0x8] sm:$0xff]  }
   0x5   :  { %v271_v12 = vld [vmem:[%s444_s3] sm:$0xff]   ;;  %v276_v20 = vunpack.c.l.bf16 %v288_v13  ;;  %v277_v22 = vunpack.c.h.bf16 %v288_v13  ;;  %v207_v43 = vld [vmem:[%s444_s3 + $0x10] sm:$0x1] }
   0x6   :  { %v259_v15 = vld [vmem:[%s445_s2] ss:$0 sm:$0xff]  ;;  %v272_v18 = vunpack.c.l.bf16 %v271_v12  ;;  %v273_v24 = vunpack.c.h.bf16 %v271_v12  ;;  %v212_v44 = vunpack.c.l.bf16 %v207_v43 }
   0x7   :  { %338 = vmatpush3.bf16.msra.mxu1 %v348_v2  ;;  %304 = vmatpush3.bf16.msra.mxu0 %v348_v2 }
   0x8   :  { %331 = vmatprep.subr.bf16.mxu1 %v358_v0  ;;  %305 = vmatprep.subr.bf16.mxu0 %v358_v0  ;;  %v31_v32 = vld [vmem:[#allocation2 + $0x20] sm:$0x3] }
   0xb   :  { %339 = vmatpush3.bf16.msra.mxu1 %v349_v3  ;;  %306 = vmatpush3.bf16.msra.mxu0 %v349_v3 }
   0xc   :  { %332 = vmatprep.subr.bf16.mxu1 %v358_v0  ;;  %307 = vmatprep.subr.bf16.mxu0 %v358_v0 }
   0xf   :  { %340 = vmatpush3.bf16.msra.mxu1 %v350_v4  ;;  %308 = vmatpush3.bf16.msra.mxu0 %v350_v4 }
  0x10   :  { %333 = vmatprep.subr.bf16.mxu1 %v358_v0  ;;  %309 = vmatprep.subr.bf16.mxu0 %v358_v0 }
  0x13   :  { %341 = vmatpush3.bf16.msra.mxu1 %v351_v5  ;;  %310 = vmatpush3.bf16.msra.mxu0 %v351_v5 }
  0x14   :  { %334 = vmatprep.subr.bf16.mxu1 %v358_v0  ;;  %311 = vmatprep.subr.bf16.mxu0 %v358_v0 }
  0x17   :  { %342 = vmatpush3.bf16.msra.mxu1 %v352_v6  ;;  %312 = vmatpush3.bf16.msra.mxu0 %v352_v6 }
  0x18   :  { %335 = vmatprep.subr.bf16.mxu1 %v358_v0  ;;  %313 = vmatprep.subr.bf16.mxu0 %v358_v0 }
  0x1b   :  { %343 = vmatpush3.bf16.msra.mxu1 %v353_v7  ;;  %314 = vmatpush3.bf16.msra.mxu0 %v353_v7 }
  0x1c   :  { %336 = vmatprep.subr.bf16.mxu1 %v358_v0  ;;  %315 = vmatprep.subr.bf16.mxu0 %v358_v0 }
  0x1f   :  { %344 = vmatpush3.bf16.msra.mxu1 %v354_v8  ;;  %316 = vmatpush3.bf16.msra.mxu0 %v354_v8 }
  0x22   :  { %322 = vmatmul.mubr.bf16.vlgmr.msra.gmra.mrb[0].mxu1 %v355_v9  ;;  %318 = vmatmul.mubr.bf16.vlgmr.msra.gmra.mrb[0].mxu0 %v356_v10 }
  0x23   :  { %325 = vmatprep.mubr.msk.bf16.mxu1 %vm359_vm0, %v358_v0 }
  0x2a   :  { %326 = vmatmul.mubr.bf16.gmra.mrb[4].mxu1 %v357_v11 }
  0xf5   :  { %v159_v14 = vpop.f32.mrb[0].mxu1  ;;  %v151_v16 = vpop.f32.mrb[0].mxu0 }
  0xf6   :  { %v323_v17 = vpop.f32.mrb[1].mxu1  ;;  %v319_v19 = vpop.f32.mrb[1].mxu0  ;;  %v200_v25 = vadd.f32 %v259_v15, %v159_v14  ;;  %v198_v26 = vadd.f32 %v259_v15, %v151_v16 }
  0xf7   :  { %v162_v21 = vpop.f32.mrb[2].mxu1  ;;  %v154_v23 = vpop.f32.mrb[2].mxu0 }
  0xf8   :  { %v324_v27 = vpop.f32.mrb[3].mxu1  ;;  %v320_v28 = vpop.f32.mrb[3].mxu0  ;;  %v201_v29 = vadd.f32 %v259_v15, %v162_v21  ;;  %v213_v30 = vadd.f32 %v272_v18, %v198_v26  ;;  %v199_v31 = vadd.f32 %v259_v15, %v154_v23  ;;  %v215_v33 = vadd.f32 %v276_v20, %v200_v25 }
  0xfa   :  { %v216_v34 = vadd.f32 %v277_v22, %v201_v29  ;;  %v214_v35 = vadd.f32 %v273_v24, %v199_v31 }
  0xfc   :  { %v286_v37 = vpack.c.bf16 %v216_v34, %v215_v33  ;;  %v281_v38 = vpack.c.bf16 %v214_v35, %v213_v30 }
  0xfd   :  { %v167_v36 = vpop.f32.mrb[4].mxu1 }
  0xfe   :  { %v177_v39 = vadd.f32 %v167_v36, %v31_v32  ;;  %v327_v40 = vpop.f32.mrb[5].mxu1  ;;  %289 = vst [vmem:[%s446_s4 + $0x8] sm:$0xff] %v286_v37   ;;  %282 = vst [vmem:[%s446_s4] sm:$0xff] %v281_v38  }
  0xff   :  { %v170_v41 = vpop.f32.mrb[6].mxu1 }
 0x100   :  { %182 = vst [vmem:[#allocation2 + $0x20] sm:$0x3] %v177_v39  ;;  %v328_v42 = vpop.f32.mrb[7].mxu1 }
 0x107   :  { %v190_v45 = vld [vmem:[#allocation2 + $0x20] sm:$0x3] }
 0x108   :  { %v202_v46 = vadd.f32 %v259_v15, %v190_v45 }
 0x10a   :  { %v217_v47 = vadd.f32 %v212_v44, %v202_v46 }
 0x10c   :  { %v269_v48 = vpack.c.bf16 %v217_v47, %v217_v47 }
 0x10e   :  { %243 = vst [vmem:[%s446_s4 + $0x10] sm:$0x1] %v269_v48 }

// kernel: clip_forward.18
= control target key start
LH: loop header
LB: loop body
LE: loop exit
PB: predicated region body
PF: predicated region fallthrough
CT: control target
= control target key end

     0   :  { %vm43_vm0 = vcmask 1041408   ;;  %v988_v62 = vmov 0   ;;  %s1304_s0 = inlined_call_operand.vmem [shape: bf16[34,128], index: 0, kind: input, shape index: {}]   ;;  %s1305_s3 = inlined_call_operand.vmem [shape: bf16[128,512], index: 3, kind: input, shape index: {}]   ;;  %s1306_s1 = inlined_call_operand.vmem [shape: f32[1,128], index: 1, kind: input, shape index: {}]   ;;  %s1307_s2 = inlined_call_operand.vmem [shape: f32[1,128], index: 2, kind: input, shape index: {}]   ;;  %s1308_s4 = inlined_call_operand.vmem [shape: f32[1,512], index: 4, kind: input, shape index: {}]   ;;  %s1309_s5 = inlined_call_operand.vmem [shape: bf16[34,512], index: 5, kind: output, shape index: {}]  }
   0x1   :  { %v827_v0 = vld [vmem:[%s1304_s0] sm:$0xff]   ;;  %v844_v1 = vld [vmem:[%s1304_s0 + $0x8] sm:$0xff]   ;;  %v29_v4 = vld [vmem:[%s1304_s0 + $0x10] sm:$0x1]  ;;  %411 = vmatprep.mubr.bf16.mxu0 %v988_v62  ;;  %472 = vmatprep.mubr.bf16.mxu1 %v988_v62 }
   0x2   :  { %v828_v2 = vunpack.c.l.bf16 %v827_v0  ;;  %v832_v3 = vunpack.c.l.bf16 %v844_v1  ;;  %v829_v5 = vunpack.c.h.bf16 %v827_v0  ;;  %v833_v6 = vunpack.c.h.bf16 %v844_v1  ;;  %v847_v30 = vld [vmem:[%s1305_s3 + $0x4] ss:$16 sps:$4 sm:$0xff]   ;;  %v849_v31 = vld [vmem:[%s1305_s3 + $0xc] ss:$16 sps:$4 sm:$0xff]   ;;  %v851_v32 = vld [vmem:[%s1305_s3] ss:$16 sps:$4 sm:$0xff]  }
   0x3   :  { %v34_v7 = vunpack.c.l.bf16 %v29_v4  ;;  %379 = vmatprep.subr.bf16.mxu0 %v847_v30  ;;  %v852_v33 = vld [vmem:[%s1305_s3 + $0x8] ss:$16 sps:$4 sm:$0xff]   ;;  %440 = vmatprep.subr.bf16.mxu1 %v849_v31  ;;  %v853_v34 = vld [vmem:[%s1305_s3 + $0x24] ss:$16 sps:$4 sm:$0xff]   ;;  %v855_v35 = vld [vmem:[%s1305_s3 + $0x2c] ss:$16 sps:$4 sm:$0xff]  }
   0x4   :  { %35 = vadd.xlane.f32.xlu0 %v828_v2  ;;  %39 = vadd.xlane.f32.xlu1 %v832_v3  ;;  %v857_v36 = vld [vmem:[%s1305_s3 + $0x20] ss:$16 sps:$4 sm:$0xff]   ;;  %v858_v37 = vld [vmem:[%s1305_s3 + $0x28] ss:$16 sps:$4 sm:$0xff]   ;;  %v859_v38 = vld [vmem:[%s1305_s3 + $0x44] ss:$16 sps:$4 sm:$0xff]  }
   0x5   :  { %v44_v8 = vsel %vm43_vm0, %v34_v7, 0.0  ;;  %380 = vmatpush1.bf16.msra.mxu0 %v851_v32  ;;  %441 = vmatpush1.bf16.msra.mxu1 %v852_v33  ;;  %v861_v39 = vld [vmem:[%s1305_s3 + $0x4c] ss:$16 sps:$4 sm:$0xff]   ;;  %v863_v40 = vld [vmem:[%s1305_s3 + $0x40] ss:$16 sps:$4 sm:$0xff]  }
   0x6   :  { %381 = vmatprep.subr.bf16.mxu0 %v853_v34  ;;  %442 = vmatprep.subr.bf16.mxu1 %v855_v35  ;;  %v864_v41 = vld [vmem:[%s1305_s3 + $0x48] ss:$16 sps:$4 sm:$0xff]   ;;  %v865_v42 = vld [vmem:[%s1305_s3 + $0x64] ss:$16 sps:$4 sm:$0xff]   ;;  %v867_v43 = vld [vmem:[%s1305_s3 + $0x6c] ss:$16 sps:$4 sm:$0xff]  }
   0x7   :  { %v869_v44 = vld [vmem:[%s1305_s3 + $0x60] ss:$16 sps:$4 sm:$0xff]   ;;  %v870_v45 = vld [vmem:[%s1305_s3 + $0x68] ss:$16 sps:$4 sm:$0xff]   ;;  %v871_v46 = vld [vmem:[%s1305_s3 + $0x84] ss:$16 sps:$4 sm:$0xff]  }
   0x8   :  { %37 = vadd.xlane.f32.xlu0 %v829_v5  ;;  %41 = vadd.xlane.f32.xlu1 %v833_v6  ;;  %v873_v47 = vld [vmem:[%s1305_s3 + $0x8c] ss:$16 sps:$4 sm:$0xff]   ;;  %v875_v48 = vld [vmem:[%s1305_s3 + $0x80] ss:$16 sps:$4 sm:$0xff]   ;;  %v876_v49 = vld [vmem:[%s1305_s3 + $0x88] ss:$16 sps:$4 sm:$0xff]  }
   0x9   :  { %382 = vmatpush1.bf16.msra.mxu0 %v857_v36  ;;  %443 = vmatpush1.bf16.msra.mxu1 %v858_v37  ;;  %v877_v50 = vld [vmem:[%s1305_s3 + $0xa4] ss:$16 sps:$4 sm:$0xff]   ;;  %v879_v51 = vld [vmem:[%s1305_s3 + $0xac] ss:$16 sps:$4 sm:$0xff]   ;;  %v881_v52 = vld [vmem:[%s1305_s3 + $0xa0] ss:$16 sps:$4 sm:$0xff]  }
   0xa   :  { %383 = vmatprep.subr.bf16.mxu0 %v859_v38  ;;  %444 = vmatprep.subr.bf16.mxu1 %v861_v39  ;;  %v882_v53 = vld [vmem:[%s1305_s3 + $0xa8] ss:$16 sps:$4 sm:$0xff]   ;;  %v883_v54 = vld [vmem:[%s1305_s3 + $0xc4] ss:$16 sps:$4 sm:$0xff]   ;;  %v885_v55 = vld [vmem:[%s1305_s3 + $0xcc] ss:$16 sps:$4 sm:$0xff]  }
   0xb   :  { %v887_v56 = vld [vmem:[%s1305_s3 + $0xc0] ss:$16 sps:$4 sm:$0xff]   ;;  %v888_v57 = vld [vmem:[%s1305_s3 + $0xc8] ss:$16 sps:$4 sm:$0xff]   ;;  %v889_v58 = vld [vmem:[%s1305_s3 + $0xe4] ss:$16 sps:$4 sm:$0xff]  }
   0xc   :  { %45 = vadd.xlane.f32.xlu0 %v44_v8  ;;  %v891_v59 = vld [vmem:[%s1305_s3 + $0xec] ss:$16 sps:$4 sm:$0xff]   ;;  %v893_v60 = vld [vmem:[%s1305_s3 + $0xe0] ss:$16 sps:$4 sm:$0xff]   ;;  %v894_v61 = vld [vmem:[%s1305_s3 + $0xe8] ss:$16 sps:$4 sm:$0xff]  }
   0xd   :  { %384 = vmatpush1.bf16.msra.mxu0 %v863_v40  ;;  %445 = vmatpush1.bf16.msra.mxu1 %v864_v41 }
   0xe   :  { %385 = vmatprep.subr.bf16.mxu0 %v865_v42  ;;  %446 = vmatprep.subr.bf16.mxu1 %v867_v43  ;;  %v183_v42 = vlaneseq }
  0x10   :  { %v184_v43 = vshrl.u32 %v183_v42, 7 }
  0x11   :  { %386 = vmatpush1.bf16.msra.mxu0 %v869_v44  ;;  %447 = vmatpush1.bf16.msra.mxu1 %v870_v45 }
  0x12   :  { %387 = vmatprep.subr.bf16.mxu0 %v871_v46  ;;  %448 = vmatprep.subr.bf16.mxu1 %v873_v47  ;;  %v185_v44 = vsub.s32 0, %v184_v43  ;;  %v193_v45 = vsub.s32 2, %v184_v43  ;;  %v181_v46 = vld [vmem:[%s1308_s4] sm:$0xf]  ;;  %v189_v47 = vsub.s32 1, %v184_v43 }
  0x15   :  { %388 = vmatpush1.bf16.msra.mxu0 %v875_v48  ;;  %449 = vmatpush1.bf16.msra.mxu1 %v876_v49  ;;  %v197_v48 = vsub.s32 3, %v184_v43  ;;  %v1166_v49 = vrot.slane %v181_v46, %v185_v44 }
  0x16   :  { %389 = vmatprep.subr.bf16.mxu0 %v877_v50  ;;  %450 = vmatprep.subr.bf16.mxu1 %v879_v51  ;;  %v1168_v50 = vrot.slane %v181_v46, %v193_v45  ;;  %v1170_v51 = vrot.slane %v181_v46, %v189_v47 }
  0x19   :  { %390 = vmatpush1.bf16.msra.mxu0 %v881_v52  ;;  %451 = vmatpush1.bf16.msra.mxu1 %v882_v53  ;;  %v1172_v52 = vrot.slane %v181_v46, %v197_v48 }
  0x1a   :  { %391 = vmatprep.subr.bf16.mxu0 %v883_v54  ;;  %452 = vmatprep.subr.bf16.mxu1 %v885_v55 }
  0x1d   :  { %392 = vmatpush1.bf16.msra.mxu0 %v887_v56  ;;  %453 = vmatpush1.bf16.msra.mxu1 %v888_v57 }
  0x1e   :  { %393 = vmatprep.subr.bf16.mxu0 %v889_v58  ;;  %454 = vmatprep.subr.bf16.mxu1 %v891_v59 }
  0x21   :  { %394 = vmatpush1.bf16.msra.mxu0 %v893_v60  ;;  %455 = vmatpush1.bf16.msra.mxu1 %v894_v61 }
  0x91   :  { %v36_v9 = vpop.xlane.xlu0 %35  ;;  %v40_v10 = vpop.xlane.xlu1 %39 }
  0x92   :  { %v48_v11 = vmul.f32 0.0078125, %v36_v9  ;;  %v50_v12 = vmul.f32 0.0078125, %v40_v10 }
  0x94   :  { %v1029_v13 = vsub.f32 %v828_v2, %v48_v11  ;;  %v1031_v14 = vsub.f32 %v832_v3, %v50_v12 }
  0x95   :  { %v38_v15 = vpop.xlane.xlu0 %37  ;;  %v42_v16 = vpop.xlane.xlu1 %41 }
  0x96   :  { %v49_v17 = vmul.f32 0.0078125, %v38_v15  ;;  %v58_v18 = vmul.f32 %v1029_v13, %v1029_v13  ;;  %v51_v19 = vmul.f32 0.0078125, %v42_v16  ;;  %v60_v22 = vmul.f32 %v1031_v14, %v1031_v14 }
  0x98   :  { %v1035_v20 = vsub.f32 %v829_v5, %v49_v17  ;;  %63 = vadd.xlane.f32.xlu1 %v58_v18  ;;  %v1037_v21 = vsub.f32 %v833_v6, %v51_v19  ;;  %v739_v18 = vld [vmem:[%s1306_s1] ss:$0 sm:$0xff] }
  0x99   :  { %v46_v23 = vpop.xlane.xlu0 %45 }
  0x9a   :  { %v52_v24 = vmul.f32 0.0078125, %v46_v23  ;;  %v59_v25 = vmul.f32 %v1035_v20, %v1035_v20  ;;  %v61_v27 = vmul.f32 %v1037_v21, %v1037_v21 }
  0x9c   :  { %v1043_v26 = vsub.f32 %v34_v7, %v52_v24  ;;  %67 = vadd.xlane.f32.xlu1 %v60_v22  ;;  %65 = vadd.xlane.f32.xlu0 %v59_v25 }
  0x9e   :  { %v62_v28 = vmul.f32 %v1043_v26, %v1043_v26 }
  0xa0   :  { %69 = vadd.xlane.f32.xlu0 %v61_v27  ;;  %v71_v29 = vsel %vm43_vm0, %v62_v28, 0.0  ;;  %v740_v27 = vld [vmem:[%s1307_s2] ss:$0 sm:$0xff] }
  0xa1   :  { %72 = vadd.xlane.f32.xlu1 %v71_v29 }
 0x125   :  { %v64_v63 = vpop.xlane.xlu1 %63 }
 0x126   :  { %v74_v0 = vmul.f32 0.0078125, %v64_v63 }
 0x128   :  { %v79_v1 = vadd.f32 1e-05, %v74_v0 }
 0x129   :  { %v68_v2 = vpop.xlane.xlu1 %67  ;;  %v66_v3 = vpop.xlane.xlu0 %65 }
 0x12a   :  { %898 = vrsqrt.f32 %v79_v1  ;;  %v76_v4 = vmul.f32 0.0078125, %v68_v2  ;;  %v75_v5 = vmul.f32 0.0078125, %v66_v3 }
 0x12c   :  { %v81_v6 = vadd.f32 1e-05, %v76_v4  ;;  %v80_v7 = vadd.f32 1e-05, %v75_v5 }
 0x12d   :  { %v70_v8 = vpop.xlane.xlu0 %69 }
 0x12e   :  { %900 = vrsqrt.f32 %v81_v6  ;;  %v77_v9 = vmul.f32 0.0078125, %v70_v8  ;;  %v73_v10 = vpop.xlane.xlu1 %72 }
 0x12f   :  { %902 = vrsqrt.f32 %v80_v7  ;;  %v78_v11 = vmul.f32 0.0078125, %v73_v10 }
 0x130   :  { %v82_v12 = vadd.f32 1e-05, %v77_v9 }
 0x131   :  { %v83_v15 = vadd.f32 1e-05, %v78_v11 }
 0x132   :  { %904 = vrsqrt.f32 %v82_v12 }
 0x133   :  { %906 = vrsqrt.f32 %v83_v15 }
 0x134   :  { %v899_v16 = vpop.eup %898 }
 0x135   :  { %v89_v17 = vmul.f32 %v899_v16, %v1029_v13 }
 0x137   :  { %v101_v24 = vmul.f32 %v739_v18, %v89_v17 }
 0x138   :  { %v901_v19 = vpop.eup %900 }
 0x139   :  { %v903_v22 = vpop.eup %902  ;;  %v91_v23 = vmul.f32 %v901_v19, %v1031_v14  ;;  %v113_v32 = vadd.f32 %v740_v27, %v101_v24 }
 0x13a   :  { %v90_v25 = vmul.f32 %v903_v22, %v1035_v20 }
 0x13b   :  { %v103_v31 = vmul.f32 %v739_v18, %v91_v23 }
 0x13c   :  { %v905_v28 = vpop.eup %904  ;;  %v102_v29 = vmul.f32 %v739_v18, %v90_v25 }
 0x13d   :  { %v907_v30 = vpop.eup %906  ;;  %v92_v13 = vmul.f32 %v905_v28, %v1037_v21  ;;  %v115_v37 = vadd.f32 %v740_v27, %v103_v31 }
 0x13e   :  { %v114_v33 = vadd.f32 %v740_v27, %v102_v29  ;;  %v93_v34 = vmul.f32 %v907_v30, %v1043_v26 }
 0x13f   :  { %v104_v35 = vmul.f32 %v739_v18, %v92_v13 }
 0x140   :  { %v837_v36 = vpack.c.bf16 %v114_v33, %v113_v32  ;;  %v105_v14 = vmul.f32 %v739_v18, %v93_v34 }
 0x141   :  { %v116_v38 = vadd.f32 %v740_v27, %v104_v35 }
 0x142   :  { %838 = vst [vmem:[#allocation2] sm:$0xff] %v837_v36   ;;  %v117_v20 = vadd.f32 %v740_v27, %v105_v14 }
 0x143   :  { %v842_v39 = vpack.c.bf16 %v116_v38, %v115_v37 }
 0x144   :  { %v815_v40 = vpack.c.bf16 %v117_v20, %v117_v20 }
 0x145   :  { %845 = vst [vmem:[#allocation2 + $0x8] sm:$0xff] %v842_v39  }
 0x146   :  { %143 = vst [vmem:[#allocation2 + $0x10] sm:$0x1] %v815_v40 }
 0x149   :  { %v895_v41 = vld [vmem:[#allocation2] sm:$0xff]  }
 0x14a   :  { %412 = vmatmul.mubr.bf16.vlgmr.msra.gmra.mrb[0].mxu0 %v895_v41  ;;  %473 = vmatmul.mubr.bf16.vlgmr.msra.gmra.mrb[0].mxu1 %v895_v41 }
 0x14b   :  { %421 = vmatprep.mubr.bf16.mxu0 %v988_v62  ;;  %482 = vmatprep.mubr.bf16.mxu1 %v988_v62 }
 0x14c   :  { %v896_v21 = vld [vmem:[#allocation2 + $0x8] sm:$0xff]  }
 0x14d   :  { %v897_v26 = vld [vmem:[#allocation2 + $0x10] ss:$0 sps:$4 sm:$0x11]  }
 0x152   :  { %422 = vmatmul.mubr.bf16.gmra.mrb[4].mxu0 %v896_v21  ;;  %483 = vmatmul.mubr.bf16.gmra.mrb[4].mxu1 %v896_v21 }
 0x153   :  { %431 = vmatprep.mubr.bf16.mxu0 %v988_v62  ;;  %492 = vmatprep.mubr.bf16.mxu1 %v988_v62 }
 0x15a   :  { %432 = vmatmul.mubr.bf16.gmra.mrb[8].mxu0 %v897_v26  ;;  %493 = vmatmul.mubr.bf16.gmra.mrb[8].mxu1 %v897_v26 }
 0x21d   :  { %v413_v53 = vpop.f32.mrb[0].mxu0  ;;  %v474_v54 = vpop.f32.mrb[0].mxu1 }
 0x21e   :  { %v1175_v55 = vadd.f32 %v413_v53, %v1166_v49  ;;  %v1178_v56 = vadd.f32 %v474_v54, %v1168_v50  ;;  %v415_v57 = vpop.f32.mrb[1].mxu0  ;;  %v476_v58 = vpop.f32.mrb[1].mxu1 }
 0x21f   :  { %v1181_v59 = vadd.f32 %v415_v57, %v1170_v51  ;;  %v1184_v60 = vadd.f32 %v476_v58, %v1172_v52  ;;  %v417_v61 = vpop.f32.mrb[2].mxu0  ;;  %v478_v62 = vpop.f32.mrb[2].mxu1 }
 0x220   :  { %v781_v63 = vmul.f32 -1.702, %v1175_v55  ;;  %v783_v0 = vmul.f32 -1.702, %v1178_v56  ;;  %v1189_v1 = vadd.f32 %v417_v61, %v1166_v49  ;;  %v1192_v2 = vadd.f32 %v478_v62, %v1168_v50  ;;  %v419_v3 = vpop.f32.mrb[3].mxu0  ;;  %v480_v4 = vpop.f32.mrb[3].mxu1 }
 0x221   :  { %v782_v5 = vmul.f32 -1.702, %v1181_v59  ;;  %v784_v6 = vmul.f32 -1.702, %v1184_v60  ;;  %v1197_v7 = vadd.f32 %v419_v3, %v1170_v51  ;;  %v1200_v8 = vadd.f32 %v480_v4, %v1172_v52 }
 0x222   :  { %v541_v9 = vmul.f32 1.442695, %v781_v63  ;;  %v545_v10 = vmul.f32 1.442695, %v783_v0  ;;  %v785_v11 = vmul.f32 -1.702, %v1189_v1 }
 0x223   :  { %v543_v12 = vmul.f32 1.442695, %v782_v5  ;;  %v547_v15 = vmul.f32 1.442695, %v784_v6  ;;  %v787_v16 = vmul.f32 -1.702, %v1192_v2 }
 0x224   :  { %908 = vpow2.f32 %v541_v9  ;;  %v549_v17 = vmul.f32 1.442695, %v785_v11  ;;  %v786_v18 = vmul.f32 -1.702, %v1197_v7  ;;  %v788_v19 = vmul.f32 -1.702, %v1200_v8 }
 0x225   :  { %910 = vpow2.f32 %v545_v10  ;;  %v553_v22 = vmul.f32 1.442695, %v787_v16  ;;  %v423_v23 = vpop.f32.mrb[4].mxu0  ;;  %v484_v24 = vpop.f32.mrb[4].mxu1 }
 0x226   :  { %912 = vpow2.f32 %v543_v12  ;;  %v551_v25 = vmul.f32 1.442695, %v786_v18  ;;  %v555_v27 = vmul.f32 1.442695, %v788_v19  ;;  %v1207_v28 = vadd.f32 %v423_v23, %v1166_v49  ;;  %v425_v29 = vpop.f32.mrb[5].mxu0  ;;  %v486_v30 = vpop.f32.mrb[5].mxu1 }
 0x227   :  { %914 = vpow2.f32 %v547_v15  ;;  %v1210_v31 = vadd.f32 %v484_v24, %v1168_v50  ;;  %v1213_v13 = vadd.f32 %v425_v29, %v1170_v51  ;;  %v1216_v32 = vadd.f32 %v486_v30, %v1172_v52  ;;  %v427_v33 = vpop.f32.mrb[6].mxu0  ;;  %v488_v34 = vpop.f32.mrb[6].mxu1 }
 0x228   :  { %916 = vpow2.f32 %v549_v17  ;;  %v789_v35 = vmul.f32 -1.702, %v1207_v28  ;;  %v1220_v36 = vadd.f32 %v427_v33, %v1166_v49  ;;  %v429_v14 = vpop.f32.mrb[7].mxu0  ;;  %v490_v37 = vpop.f32.mrb[7].mxu1  ;;  %v1227_v9 = vadd.f32 %v488_v34, %v1168_v50 }
 0x229   :  { %918 = vpow2.f32 %v553_v22  ;;  %v791_v38 = vmul.f32 -1.702, %v1210_v31  ;;  %v790_v20 = vmul.f32 -1.702, %v1213_v13  ;;  %v792_v39 = vmul.f32 -1.702, %v1216_v32 }
 0x22a   :  { %920 = vpow2.f32 %v551_v25  ;;  %v557_v40 = vmul.f32 1.442695, %v789_v35  ;;  %v793_v41 = vmul.f32 -1.702, %v1220_v36  ;;  %v1230_v12 = vadd.f32 %v429_v14, %v1170_v51 }
 0x22b   :  { %922 = vpow2.f32 %v555_v27  ;;  %v561_v21 = vmul.f32 1.442695, %v791_v38  ;;  %v559_v26 = vmul.f32 1.442695, %v790_v20  ;;  %v563_v42 = vmul.f32 1.442695, %v792_v39 }
 0x22c   :  { %924 = vpow2.f32 %v557_v40  ;;  %v565_v43 = vmul.f32 1.442695, %v793_v41  ;;  %v1233_v17 = vadd.f32 %v490_v37, %v1172_v52  ;;  %v795_v25 = vmul.f32 -1.702, %v1227_v9 }
 0x22d   :  { %926 = vpow2.f32 %v561_v21  ;;  %v433_v44 = vpop.f32.mrb[8].mxu0  ;;  %v494_v45 = vpop.f32.mrb[8].mxu1  ;;  %v794_v33 = vmul.f32 -1.702, %v1230_v12 }
 0x22e   :  { %v909_v46 = vpop.eup %908  ;;  %928 = vpow2.f32 %v559_v26  ;;  %v435_v47 = vpop.f32.mrb[9].mxu0  ;;  %v1236_v22 = vadd.f32 %v433_v44, %v1166_v49  ;;  %v1240_v27 = vadd.f32 %v494_v45, %v1168_v50  ;;  %v796_v14 = vmul.f32 -1.702, %v1233_v17 }
 0x22f   :  { %v496_v48 = vpop.f32.mrb[9].mxu1  ;;  %v911_v53 = vpop.eup %910  ;;  %v581_v54 = vadd.f32 1.0, %v909_v46  ;;  %930 = vpow2.f32 %v563_v42  ;;  %v1244_v34 = vadd.f32 %v435_v47, %v1170_v51  ;;  %v569_v41 = vmul.f32 1.442695, %v795_v25 }
 0x230   :  { %v437_v57 = vpop.f32.mrb[10].mxu0  ;;  %v498_v58 = vpop.f32.mrb[10].mxu1  ;;  %v583_v62 = vadd.f32 1.0, %v911_v53  ;;  %932 = vpow2.f32 %v565_v43  ;;  %v1248_v37 = vadd.f32 %v496_v48, %v1172_v52  ;;  %v797_v20 = vmul.f32 -1.702, %v1236_v22 }
 0x231   :  { %v913_v61 = vpop.eup %912  ;;  %v438_v63 = vpop.f32.mrb[11].mxu0  ;;  %934 = vrcp.f32 %v581_v54  ;;  %v799_v51 = vmul.f32 -1.702, %v1240_v27  ;;  %v567_v26 = vmul.f32 1.442695, %v794_v33 }
 0x232   :  { %v915_v0 = vpop.eup %914  ;;  %v582_v3 = vadd.f32 1.0, %v913_v61  ;;  %v499_v4 = vpop.f32.mrb[11].mxu1  ;;  %936 = vrcp.f32 %v583_v62  ;;  %v798_v42 = vmul.f32 -1.702, %v1244_v34  ;;  %v571_v44 = vmul.f32 1.442695, %v796_v14 }
 0x233   :  { %v917_v5 = vpop.eup %916  ;;  %v584_v6 = vadd.f32 1.0, %v915_v0  ;;  %v800_v45 = vmul.f32 -1.702, %v1248_v37  ;;  %v573_v48 = vmul.f32 1.442695, %v797_v20 }
 0x234   :  { %v919_v10 = vpop.eup %918  ;;  %938 = vrcp.f32 %v582_v3  ;;  %v585_v11 = vadd.f32 1.0, %v917_v5  ;;  %v577_v57 = vmul.f32 1.442695, %v799_v51  ;;  %v575_v62 = vmul.f32 1.442695, %v798_v42 }
 0x235   :  { %v921_v15 = vpop.eup %920  ;;  %940 = vrcp.f32 %v584_v6  ;;  %v587_v16 = vadd.f32 1.0, %v919_v10  ;;  %v579_v3 = vmul.f32 1.442695, %v800_v45 }
 0x236   :  { %v923_v18 = vpop.eup %922  ;;  %942 = vrcp.f32 %v585_v11  ;;  %v586_v19 = vadd.f32 1.0, %v921_v15 }
 0x237   :  { %v925_v23 = vpop.eup %924  ;;  %944 = vrcp.f32 %v587_v16  ;;  %v588_v24 = vadd.f32 1.0, %v923_v18 }
 0x238   :  { %v927_v29 = vpop.eup %926  ;;  %946 = vrcp.f32 %v586_v19  ;;  %v589_v30 = vadd.f32 1.0, %v925_v23 }
 0x239   :  { %v929_v35 = vpop.eup %928  ;;  %948 = vrcp.f32 %v588_v24  ;;  %v591_v49 = vadd.f32 1.0, %v927_v29 }
 0x23a   :  { %v931_v38 = vpop.eup %930  ;;  %950 = vrcp.f32 %v589_v30  ;;  %v590_v50 = vadd.f32 1.0, %v929_v35 }
 0x23b   :  { %v933_v39 = vpop.eup %932  ;;  %952 = vrcp.f32 %v591_v49  ;;  %v592_v40 = vadd.f32 1.0, %v931_v38 }
 0x23c   :  { %v935_v21 = vpop.eup %934  ;;  %954 = vrcp.f32 %v590_v50  ;;  %v593_v15 = vadd.f32 1.0, %v933_v39 }
 0x23d   :  { %v937_v43 = vpop.eup %936  ;;  %v641_v52 = vmul.f32 %v935_v21, %v1175_v55  ;;  %956 = vrcp.f32 %v592_v40 }
 0x23e   :  { %v939_v46 = vpop.eup %938  ;;  %v643_v47 = vmul.f32 %v937_v43, %v1178_v56  ;;  %958 = vpow2.f32 %v569_v41 }
 0x23f   :  { %v941_v53 = vpop.eup %940  ;;  %v642_v54 = vmul.f32 %v939_v46, %v1181_v59  ;;  %960 = vpow2.f32 %v567_v26 }
 0x240   :  { %v943_v58 = vpop.eup %942  ;;  %v644_v61 = vmul.f32 %v941_v53, %v1184_v60  ;;  %962 = vpow2.f32 %v571_v44 }
 0x241   :  { %v945_v63 = vpop.eup %944  ;;  %v816_v55 = vpack.c.bf16 %v642_v54, %v641_v52  ;;  %v645_v0 = vmul.f32 %v943_v58, %v1189_v1  ;;  %964 = vpow2.f32 %v573_v48 }
 0x242   :  { %v947_v4 = vpop.eup %946  ;;  %v817_v5 = vpack.c.bf16 %v644_v61, %v643_v47  ;;  %v647_v56 = vmul.f32 %v945_v63, %v1192_v2  ;;  %966 = vpow2.f32 %v577_v57 }
 0x243   :  { %v949_v6 = vpop.eup %948  ;;  %725 = vst [vmem:[%s1309_s5] sm:$0xff] %v816_v55  ;;  %v646_v59 = vmul.f32 %v947_v4, %v1197_v7  ;;  %968 = vpow2.f32 %v575_v62 }
 0x244   :  { %v951_v60 = vpop.eup %950  ;;  %726 = vst [vmem:[%s1309_s5 + $0x8] sm:$0xff] %v817_v5  ;;  %v648_v1 = vmul.f32 %v949_v6, %v1200_v8  ;;  %970 = vpow2.f32 %v579_v3 }
 0x245   :  { %v953_v10 = vpop.eup %952  ;;  %v818_v11 = vpack.c.bf16 %v646_v59, %v645_v0  ;;  %v649_v2 = vmul.f32 %v951_v60, %v1207_v28  ;;  %972 = vrcp.f32 %v593_v15 }
 0x246   :  { %v955_v16 = vpop.eup %954  ;;  %v819_v18 = vpack.c.bf16 %v648_v1, %v647_v56  ;;  %v651_v19 = vmul.f32 %v953_v10, %v1210_v31 }
 0x247   :  { %v957_v7 = vpop.eup %956  ;;  %727 = vst [vmem:[%s1309_s5 + $0x10] sm:$0xff] %v818_v11  ;;  %v650_v23 = vmul.f32 %v955_v16, %v1213_v13 }
 0x248   :  { %728 = vst [vmem:[%s1309_s5 + $0x18] sm:$0xff] %v819_v18  ;;  %v652_v8 = vmul.f32 %v957_v7, %v1216_v32  ;;  %v959_v28 = vpop.eup %958 }
 0x249   :  { %v820_v24 = vpack.c.bf16 %v650_v23, %v649_v2  ;;  %v961_v25 = vpop.eup %960  ;;  %v595_v30 = vadd.f32 1.0, %v959_v28 }
 0x24a   :  { %v821_v29 = vpack.c.bf16 %v652_v8, %v651_v19  ;;  %v963_v31 = vpop.eup %962  ;;  %v594_v33 = vadd.f32 1.0, %v961_v25 }
 0x24b   :  { %729 = vst [vmem:[%s1309_s5 + $0x20] sm:$0xff] %v820_v24  ;;  %v965_v35 = vpop.eup %964  ;;  %974 = vrcp.f32 %v595_v30  ;;  %v596_v13 = vadd.f32 1.0, %v963_v31 }
 0x24c   :  { %730 = vst [vmem:[%s1309_s5 + $0x28] sm:$0xff] %v821_v29  ;;  %v967_v32 = vpop.eup %966  ;;  %976 = vrcp.f32 %v594_v33  ;;  %v597_v49 = vadd.f32 1.0, %v965_v35 }
 0x24d   :  { %v969_v14 = vpop.eup %968  ;;  %978 = vrcp.f32 %v596_v13  ;;  %v599_v38 = vadd.f32 1.0, %v967_v32 }
 0x24e   :  { %v971_v50 = vpop.eup %970  ;;  %980 = vrcp.f32 %v597_v49  ;;  %v598_v20 = vadd.f32 1.0, %v969_v14 }
 0x24f   :  { %982 = vrcp.f32 %v599_v38  ;;  %v600_v39 = vadd.f32 1.0, %v971_v50  ;;  %v973_v40 = vpop.eup %972 }
 0x250   :  { %984 = vrcp.f32 %v598_v20  ;;  %v653_v51 = vmul.f32 %v973_v40, %v1220_v36 }
 0x251   :  { %986 = vrcp.f32 %v600_v39 }
 0x255   :  { %v975_v41 = vpop.eup %974 }
 0x256   :  { %v977_v21 = vpop.eup %976  ;;  %v655_v26 = vmul.f32 %v975_v41, %v1227_v9 }
 0x257   :  { %v979_v42 = vpop.eup %978  ;;  %v654_v43 = vmul.f32 %v977_v21, %v1230_v12 }
 0x258   :  { %v981_v52 = vpop.eup %980  ;;  %v656_v44 = vmul.f32 %v979_v42, %v1233_v17 }
 0x259   :  { %v983_v45 = vpop.eup %982  ;;  %v822_v46 = vpack.c.bf16 %v654_v43, %v653_v51  ;;  %v657_v47 = vmul.f32 %v981_v52, %v1236_v22 }
 0x25a   :  { %v985_v48 = vpop.eup %984  ;;  %v823_v53 = vpack.c.bf16 %v656_v44, %v655_v26  ;;  %v659_v54 = vmul.f32 %v983_v45, %v1240_v27 }
 0x25b   :  { %v987_v57 = vpop.eup %986  ;;  %731 = vst [vmem:[%s1309_s5 + $0x30] sm:$0xff] %v822_v46  ;;  %v658_v36 = vmul.f32 %v985_v48, %v1244_v34 }
 0x25c   :  { %732 = vst [vmem:[%s1309_s5 + $0x38] sm:$0xff] %v823_v53  ;;  %v660_v9 = vmul.f32 %v987_v57, %v1248_v37 }
 0x25d   :  { %v824_v12 = vpack.c.bf16 %v658_v36, %v657_v47 }
 0x25e   :  { %v825_v17 = vpack.c.bf16 %v660_v9, %v659_v54 }
 0x25f   :  { %733 = vst [vmem:[%s1309_s5 + $0x40] sm:$0x11] %v824_v12 }
 0x260   :  { %734 = vst [vmem:[%s1309_s5 + $0x48] sm:$0x11] %v825_v17 }

// kernel: clip_forward.19
= control target key start
LH: loop header
LB: loop body
LE: loop exit
PB: predicated region body
PF: predicated region fallthrough
CT: control target
= control target key end

     0   :  { %v731_v46 = vmov 0.0   ;;  %s904_s1 = inlined_call_operand.vmem [shape: bf16[512,128], index: 1, kind: input, shape index: {}]   ;;  %s905_s0 = inlined_call_operand.vmem [shape: bf16[34,512], index: 0, kind: input, shape index: {}]   ;;  %s906_s2 = inlined_call_operand.vmem [shape: f32[1,128], index: 2, kind: input, shape index: {}]   ;;  %s907_s3 = inlined_call_operand.vmem [shape: bf16[34,128], index: 3, kind: input, shape index: {}]   ;;  %s908_s4 = inlined_call_operand.vmem [shape: bf16[34,128], index: 4, kind: output, shape index: {}]  }
   0x1   :  { %v683_v0 = vld [vmem:[%s904_s1 + $0x40] sm:$0xff]   ;;  %v687_v4 = vld [vmem:[%s904_s1 + $0x48] sm:$0xff]   ;;  %v691_v8 = vld [vmem:[%s904_s1 + $0x50] sm:$0xff]   ;;  %26 = vst [vmem:[#allocation2 + $0x20] sm:$0x3] %v731_v46 }
   0x2   :  { %v684_v1 = vld [vmem:[%s904_s1 + $0xc0] sm:$0xff]   ;;  %614 = vmatprep.subr.bf16.mxu0 %v683_v0  ;;  %v688_v5 = vld [vmem:[%s904_s1 + $0xc8] sm:$0xff]   ;;  %v692_v9 = vld [vmem:[%s904_s1 + $0xd0] sm:$0xff]  }
   0x3   :  { %v685_v2 = vld [vmem:[%s904_s1] sm:$0xff]   ;;  %648 = vmatprep.subr.bf16.mxu1 %v684_v1  ;;  %v689_v6 = vld [vmem:[%s904_s1 + $0x8] sm:$0xff]   ;;  %v693_v10 = vld [vmem:[%s904_s1 + $0x10] sm:$0xff]  }
   0x4   :  { %v686_v3 = vld [vmem:[%s904_s1 + $0x80] sm:$0xff]   ;;  %615 = vmatpush3.bf16.msra.mxu0 %v685_v2  ;;  %v690_v7 = vld [vmem:[%s904_s1 + $0x88] sm:$0xff]   ;;  %v694_v11 = vld [vmem:[%s904_s1 + $0x90] sm:$0xff]  }
   0x5   :  { %649 = vmatpush3.bf16.msra.mxu1 %v686_v3  ;;  %616 = vmatprep.subr.bf16.mxu0 %v687_v4  ;;  %v695_v12 = vld [vmem:[%s904_s1 + $0x58] sm:$0xff]   ;;  %v699_v16 = vld [vmem:[%s904_s1 + $0x60] sm:$0xff]   ;;  %v703_v20 = vld [vmem:[%s904_s1 + $0x68] sm:$0xff]  }
   0x6   :  { %650 = vmatprep.subr.bf16.mxu1 %v688_v5  ;;  %v696_v13 = vld [vmem:[%s904_s1 + $0xd8] sm:$0xff]   ;;  %v700_v17 = vld [vmem:[%s904_s1 + $0xe0] sm:$0xff]   ;;  %v704_v21 = vld [vmem:[%s904_s1 + $0xe8] sm:$0xff]  }
   0x7   :  { %v697_v14 = vld [vmem:[%s904_s1 + $0x18] sm:$0xff]   ;;  %v701_v18 = vld [vmem:[%s904_s1 + $0x20] sm:$0xff]   ;;  %v705_v22 = vld [vmem:[%s904_s1 + $0x28] sm:$0xff]  }
   0x8   :  { %617 = vmatpush3.bf16.msra.mxu0 %v689_v6  ;;  %v698_v15 = vld [vmem:[%s904_s1 + $0x98] sm:$0xff]   ;;  %v702_v19 = vld [vmem:[%s904_s1 + $0xa0] sm:$0xff]   ;;  %v706_v23 = vld [vmem:[%s904_s1 + $0xa8] sm:$0xff]  }
   0x9   :  { %651 = vmatpush3.bf16.msra.mxu1 %v690_v7  ;;  %618 = vmatprep.subr.bf16.mxu0 %v691_v8  ;;  %v707_v24 = vld [vmem:[%s904_s1 + $0x70] sm:$0xff]   ;;  %v711_v28 = vld [vmem:[%s904_s1 + $0x78] sm:$0xff]   ;;  %v40_v38 = vld [vmem:[%s905_s0 + $0x40] sm:$0x11] }
   0xa   :  { %652 = vmatprep.subr.bf16.mxu1 %v692_v9  ;;  %v708_v25 = vld [vmem:[%s904_s1 + $0xf0] sm:$0xff]   ;;  %v712_v29 = vld [vmem:[%s904_s1 + $0xf8] sm:$0xff]   ;;  %v41_v39 = vld [vmem:[%s905_s0 + $0x48] sm:$0x11]  ;;  %v548_v42 = vcombine.high %v40_v38, %v40_v38  ;;  %v547_v44 = vcombine.low %v40_v38, %v40_v38 }
   0xb   :  { %v709_v26 = vld [vmem:[%s904_s1 + $0x30] sm:$0xff]   ;;  %v713_v30 = vld [vmem:[%s904_s1 + $0x38] sm:$0xff]   ;;  %v550_v43 = vcombine.high %v41_v39, %v41_v39  ;;  %v549_v45 = vcombine.low %v41_v39, %v41_v39  ;;  %v583_v60 = vld [vmem:[%s906_s2] ss:$0 sm:$0xff] }
   0xc   :  { %619 = vmatpush3.bf16.msra.mxu0 %v693_v10  ;;  %v710_v27 = vld [vmem:[%s904_s1 + $0xb0] sm:$0xff]   ;;  %v714_v31 = vld [vmem:[%s904_s1 + $0xb8] sm:$0xff]   ;;  %v595_v61 = vld [vmem:[%s907_s3] sm:$0xff]  }
   0xd   :  { %653 = vmatpush3.bf16.msra.mxu1 %v694_v11  ;;  %620 = vmatprep.subr.bf16.mxu0 %v695_v12  ;;  %v715_v32 = vld [vmem:[%s905_s0] ss:$16 sps:$4 sm:$0xff]   ;;  %v717_v33 = vld [vmem:[%s905_s0 + $0x4] ss:$16 sps:$4 sm:$0xff]   ;;  %v718_v34 = vld [vmem:[%s905_s0 + $0x8] ss:$16 sps:$4 sm:$0xff]   ;;  %v596_v1 = vunpack.c.l.bf16 %v595_v61  ;;  %v597_v2 = vunpack.c.h.bf16 %v595_v61 }
   0xe   :  { %654 = vmatprep.subr.bf16.mxu1 %v696_v13  ;;  %v720_v35 = vld [vmem:[%s905_s0 + $0xc] ss:$16 sps:$4 sm:$0xff]   ;;  %384 = vmatprep.mubr.bf16.mxu0 %v717_v33  ;;  %v721_v36 = vld [vmem:[%s905_s0 + $0x24] ss:$16 sps:$4 sm:$0xff]   ;;  %v725_v40 = vld [vmem:[%s905_s0 + $0x20] ss:$16 sps:$4 sm:$0xff]  }
   0xf   :  { %440 = vmatprep.mubr.bf16.mxu1 %v720_v35  ;;  %v723_v37 = vld [vmem:[%s905_s0 + $0x2c] ss:$16 sps:$4 sm:$0xff]   ;;  %v726_v41 = vld [vmem:[%s905_s0 + $0x28] ss:$16 sps:$4 sm:$0xff]  }
  0x10   :  { %621 = vmatpush3.bf16.msra.mxu0 %v697_v14 }
  0x11   :  { %655 = vmatpush3.bf16.msra.mxu1 %v698_v15  ;;  %622 = vmatprep.subr.bf16.mxu0 %v699_v16 }
  0x12   :  { %656 = vmatprep.subr.bf16.mxu1 %v700_v17 }
  0x14   :  { %623 = vmatpush3.bf16.msra.mxu0 %v701_v18  ;;  %v612_v18 = vld [vmem:[%s907_s3 + $0x8] sm:$0xff]  }
  0x15   :  { %657 = vmatpush3.bf16.msra.mxu1 %v702_v19  ;;  %624 = vmatprep.subr.bf16.mxu0 %v703_v20 }
  0x16   :  { %658 = vmatprep.subr.bf16.mxu1 %v704_v21 }
  0x18   :  { %625 = vmatpush3.bf16.msra.mxu0 %v705_v22 }
  0x19   :  { %659 = vmatpush3.bf16.msra.mxu1 %v706_v23  ;;  %626 = vmatprep.subr.bf16.mxu0 %v707_v24  ;;  %v600_v23 = vunpack.c.l.bf16 %v612_v18  ;;  %v601_v24 = vunpack.c.h.bf16 %v612_v18 }
  0x1a   :  { %660 = vmatprep.subr.bf16.mxu1 %v708_v25 }
  0x1c   :  { %627 = vmatpush3.bf16.msra.mxu0 %v709_v26 }
  0x1d   :  { %661 = vmatpush3.bf16.msra.mxu1 %v710_v27  ;;  %628 = vmatprep.subr.bf16.mxu0 %v711_v28 }
  0x1e   :  { %662 = vmatprep.subr.bf16.mxu1 %v712_v29 }
  0x20   :  { %629 = vmatpush3.bf16.msra.mxu0 %v713_v30 }
  0x21   :  { %663 = vmatpush3.bf16.msra.mxu1 %v714_v31 }
  0x23   :  { %385 = vmatmul.mubr.bf16.vlgmr.msra.gmra.mrb[0].mxu0 %v715_v32 }
  0x24   :  { %441 = vmatmul.mubr.bf16.vlgmr.msra.gmra.mrb[0].mxu1 %v718_v34  ;;  %392 = vmatprep.mubr.bf16.mxu0 %v721_v36  ;;  %v31_v34 = vld [vmem:[#allocation2 + $0x20] sm:$0x3] }
  0x25   :  { %448 = vmatprep.mubr.bf16.mxu1 %v723_v37 }
  0x2b   :  { %393 = vmatmul.mubr.bf16.gmra.mrb[4].mxu0 %v725_v40 }
  0x2c   :  { %449 = vmatmul.mubr.bf16.gmra.mrb[4].mxu1 %v726_v41  ;;  %400 = vmatprep.mubr.bf16.mxu0 %v548_v42  ;;  %v498_v41 = vld [vmem:[%s907_s3 + $0x10] sm:$0x1] }
  0x2d   :  { %456 = vmatprep.mubr.bf16.mxu1 %v550_v43  ;;  %v503_v42 = vunpack.c.l.bf16 %v498_v41 }
  0x33   :  { %401 = vmatmul.mubr.bf16.gmra.mrb[8].mxu0 %v547_v44 }
  0x34   :  { %457 = vmatmul.mubr.bf16.gmra.mrb[8].mxu1 %v549_v45 }
  0xf6   :  { %v630_v47 = vpop.f32.mrb[0].mxu0 }
  0xf7   :  { %v664_v48 = vpop.f32.mrb[0].mxu1  ;;  %v631_v49 = vpop.f32.mrb[1].mxu0 }
  0xf8   :  { %v632_v50 = vadd.f32 %v631_v49, %v630_v47  ;;  %v665_v51 = vpop.f32.mrb[1].mxu1  ;;  %v633_v52 = vpop.f32.mrb[2].mxu0 }
  0xf9   :  { %v666_v53 = vadd.f32 %v665_v51, %v664_v48  ;;  %v667_v54 = vpop.f32.mrb[2].mxu1  ;;  %v634_v55 = vpop.f32.mrb[3].mxu0 }
  0xfa   :  { %v635_v56 = vadd.f32 %v634_v55, %v633_v52  ;;  %v668_v57 = vpop.f32.mrb[3].mxu1 }
  0xfb   :  { %v443_v58 = vadd.f32 %v666_v53, %v632_v50  ;;  %v669_v59 = vadd.f32 %v668_v57, %v667_v54 }
  0xfd   :  { %v446_v62 = vadd.f32 %v669_v59, %v635_v56  ;;  %v489_v0 = vadd.f32 %v583_v60, %v443_v58 }
  0xfe   :  { %v636_v63 = vpop.f32.mrb[4].mxu0 }
  0xff   :  { %v670_v3 = vpop.f32.mrb[4].mxu1  ;;  %v637_v4 = vpop.f32.mrb[5].mxu0  ;;  %v490_v8 = vadd.f32 %v583_v60, %v446_v62  ;;  %v504_v14 = vadd.f32 %v596_v1, %v489_v0 }
 0x100   :  { %v638_v5 = vadd.f32 %v637_v4, %v636_v63  ;;  %v671_v6 = vpop.f32.mrb[5].mxu1  ;;  %v639_v7 = vpop.f32.mrb[6].mxu0 }
 0x101   :  { %v672_v9 = vadd.f32 %v671_v6, %v670_v3  ;;  %v673_v10 = vpop.f32.mrb[6].mxu1  ;;  %v640_v11 = vpop.f32.mrb[7].mxu0  ;;  %v505_v15 = vadd.f32 %v597_v2, %v490_v8 }
 0x102   :  { %v641_v12 = vadd.f32 %v640_v11, %v639_v7  ;;  %v674_v13 = vpop.f32.mrb[7].mxu1 }
 0x103   :  { %v451_v16 = vadd.f32 %v672_v9, %v638_v5  ;;  %v675_v17 = vadd.f32 %v674_v13, %v673_v10  ;;  %v605_v19 = vpack.c.bf16 %v505_v15, %v504_v14 }
 0x105   :  { %v454_v20 = vadd.f32 %v675_v17, %v641_v12  ;;  %606 = vst [vmem:[%s908_s4] sm:$0xff] %v605_v19   ;;  %v491_v22 = vadd.f32 %v583_v60, %v451_v16 }
 0x106   :  { %v642_v21 = vpop.f32.mrb[8].mxu0 }
 0x107   :  { %v676_v25 = vpop.f32.mrb[8].mxu1  ;;  %v643_v26 = vpop.f32.mrb[9].mxu0  ;;  %v492_v30 = vadd.f32 %v583_v60, %v454_v20  ;;  %v506_v36 = vadd.f32 %v600_v23, %v491_v22 }
 0x108   :  { %v644_v27 = vadd.f32 %v643_v26, %v642_v21  ;;  %v677_v28 = vpop.f32.mrb[9].mxu1  ;;  %v645_v29 = vpop.f32.mrb[10].mxu0 }
 0x109   :  { %v678_v31 = vadd.f32 %v677_v28, %v676_v25  ;;  %v679_v32 = vpop.f32.mrb[10].mxu1  ;;  %v646_v33 = vpop.f32.mrb[11].mxu0  ;;  %v507_v37 = vadd.f32 %v601_v24, %v492_v30 }
 0x10a   :  { %v680_v35 = vpop.f32.mrb[11].mxu1 }
 0x10b   :  { %v459_v38 = vadd.f32 %v678_v31, %v644_v27  ;;  %v610_v39 = vpack.c.bf16 %v507_v37, %v506_v36 }
 0x10d   :  { %v468_v40 = vadd.f32 %v459_v38, %v31_v34  ;;  %613 = vst [vmem:[%s908_s4 + $0x8] sm:$0xff] %v610_v39  }
 0x10f   :  { %473 = vst [vmem:[#allocation2 + $0x20] sm:$0x3] %v468_v40 }
 0x116   :  { %v481_v43 = vld [vmem:[#allocation2 + $0x20] sm:$0x3] }
 0x117   :  { %v493_v44 = vadd.f32 %v583_v60, %v481_v43 }
 0x119   :  { %v508_v45 = vadd.f32 %v503_v42, %v493_v44 }
 0x11b   :  { %v593_v46 = vpack.c.bf16 %v508_v45, %v508_v45 }
 0x11d   :  { %534 = vst [vmem:[%s908_s4 + $0x10] sm:$0x1] %v593_v46 }

// kernel: clip_forward.25
= control target key start
LH: loop header
LB: loop body
LE: loop exit
PB: predicated region body
PF: predicated region fallthrough
CT: control target
= control target key end

     0   :  { %vm27_vm0 = vcmask 1041408   ;;  %v229_v3 = vmov 0.0   ;;  %vm230_vm1 = vmmov 0   ;;  %s300_s0 = inlined_call_operand.vmem [shape: bf16[2,128], index: 0, kind: input, shape index: {}]   ;;  %s301_s3 = inlined_call_operand.vmem [shape: bf16[128,128], index: 3, kind: input, shape index: {}]   ;;  %s302_s1 = inlined_call_operand.vmem [shape: f32[1,128], index: 1, kind: input, shape index: {}]   ;;  %s303_s2 = inlined_call_operand.vmem [shape: f32[1,128], index: 2, kind: input, shape index: {}]   ;;  %s304_s4 = inlined_call_operand.vmem [shape: f32[1,128], index: 4, kind: input, shape index: {}]   ;;  %s305_s5 = inlined_call_operand.vmem [shape: f32[2,128], index: 5, kind: output, shape index: {}]  }
   0x1   :  { %v25_v0 = vld [vmem:[%s300_s0] sm:$0x1]  ;;  %197 = vmatprep.subr.bf16.mxu0 %v229_v3  ;;  %v220_v10 = vld [vmem:[%s301_s3 + $0x8] sm:$0xff]   ;;  %v221_v11 = vld [vmem:[%s301_s3 + $0x10] sm:$0xff]   ;;  %213 = vmatprep.mubr.msk.bf16.mxu0 %vm230_vm1, %v229_v3 }
   0x2   :  { %v26_v1 = vunpack.c.l.bf16 %v25_v0  ;;  %v219_v9 = vld [vmem:[%s301_s3] sm:$0xff]   ;;  %v222_v12 = vld [vmem:[%s301_s3 + $0x18] sm:$0xff]   ;;  %v224_v14 = vld [vmem:[%s301_s3 + $0x28] sm:$0xff]  }
   0x3   :  { %198 = vmatpush3.bf16.msra.mxu0 %v219_v9  ;;  %v223_v13 = vld [vmem:[%s301_s3 + $0x20] sm:$0xff]   ;;  %v225_v15 = vld [vmem:[%s301_s3 + $0x30] sm:$0xff]   ;;  %v226_v16 = vld [vmem:[%s301_s3 + $0x38] sm:$0xff]  }
   0x4   :  { %v28_v2 = vsel %vm27_vm0, %v26_v1, 0.0  ;;  %199 = vmatprep.subr.bf16.mxu0 %v229_v3  ;;  %v177_v21 = vld [vmem:[%s302_s1] ss:$0 sm:$0xff] }
   0x5   :  { %29 = vadd.xlane.f32.xlu0 %v28_v2  ;;  %v178_v23 = vld [vmem:[%s303_s2] ss:$0 sm:$0xff] }
   0x6   :  { %v179_v28 = vld [vmem:[%s304_s4] ss:$0 sm:$0xff] }
   0x7   :  { %200 = vmatpush3.bf16.msra.mxu0 %v220_v10 }
   0x8   :  { %201 = vmatprep.subr.bf16.mxu0 %v229_v3 }
   0xb   :  { %202 = vmatpush3.bf16.msra.mxu0 %v221_v11 }
   0xc   :  { %203 = vmatprep.subr.bf16.mxu0 %v229_v3 }
   0xf   :  { %204 = vmatpush3.bf16.msra.mxu0 %v222_v12 }
  0x10   :  { %205 = vmatprep.subr.bf16.mxu0 %v229_v3 }
  0x13   :  { %206 = vmatpush3.bf16.msra.mxu0 %v223_v13 }
  0x14   :  { %207 = vmatprep.subr.bf16.mxu0 %v229_v3 }
  0x17   :  { %208 = vmatpush3.bf16.msra.mxu0 %v224_v14 }
  0x18   :  { %209 = vmatprep.subr.bf16.mxu0 %v229_v3 }
  0x1b   :  { %210 = vmatpush3.bf16.msra.mxu0 %v225_v15 }
  0x1c   :  { %211 = vmatprep.subr.bf16.mxu0 %v229_v3 }
  0x1f   :  { %212 = vmatpush3.bf16.msra.mxu0 %v226_v16 }
  0x92   :  { %v30_v4 = vpop.xlane.xlu0 %29 }
  0x93   :  { %v32_v5 = vmul.f32 0.0078125, %v30_v4 }
  0x95   :  { %v33_v6 = vsub.f32 %v26_v1, %v32_v5 }
  0x97   :  { %v34_v7 = vmul.f32 %v33_v6, %v33_v6 }
  0x99   :  { %v35_v8 = vsel %vm27_vm0, %v34_v7, 0.0 }
  0x9a   :  { %36 = vadd.xlane.f32.xlu0 %v35_v8 }
 0x127   :  { %v37_v17 = vpop.xlane.xlu0 %36 }
 0x128   :  { %v38_v18 = vmul.f32 0.0078125, %v37_v17 }
 0x12a   :  { %v39_v19 = vadd.f32 1e-05, %v38_v18 }
 0x12c   :  { %227 = vrsqrt.f32 %v39_v19 }
 0x136   :  { %v228_v20 = vpop.eup %227 }
 0x137   :  { %v41_v22 = vmul.f32 %v228_v20, %v33_v6 }
 0x139   :  { %v49_v24 = vmul.f32 %v177_v21, %v41_v22 }
 0x13b   :  { %v57_v25 = vadd.f32 %v178_v23, %v49_v24 }
 0x13d   :  { %v58_v26 = vpack.c.bf16 %v57_v25, %v57_v25 }
 0x13f   :  { %59 = vst [vmem:[#allocation2] sm:$0x1] %v58_v26 }
 0x146   :  { %v60_v27 = vld [vmem:[#allocation2] sm:$0x1] }
 0x147   :  { %214 = vmatmul.mubr.bf16.vlgmr.msra.gmra.mrb[0].mxu0 %v60_v27 }
 0x21a   :  { %v166_v29 = vpop.f32.mrb[0].mxu0 }
 0x21b   :  { %v167_v30 = vadd.f32 %v179_v28, %v166_v29  ;;  %v215_v31 = vpop.f32.mrb[1].mxu0 }
 0x21c   :  { %v169_v32 = vpop.f32.mrb[2].mxu0 }
 0x21d   :  { %172 = vst [vmem:[%s305_s5] sm:$0x3] %v167_v30  ;;  %v216_v33 = vpop.f32.mrb[3].mxu0 }

</bundles_post_ra>
